<compile_context>
chip_gen: v6e
topology: v6e:2x2x1
jax: 0.10.0
libtpu: 0.0.40
codegen_flags: <defaults>
</compile_context>

<pallas_src>
import math

import jax
import jax.numpy as jnp
from jax import lax
from jax.experimental import pallas as pl
from jax.experimental.pallas import tpu as pltpu


_VMEM_SPEC = pl.BlockSpec(memory_space=pltpu.MemorySpace.VMEM)


# ---------------------------------------------------------------------------
# Fused kernel: all layers, both directions, FC + Tanh in one invocation
# ---------------------------------------------------------------------------

def _build_fused_kernel(num_layers, dirs, T, B, H):
    def kernel(*refs):
        it = iter(refs)
        x_ref = next(it)                                     # [T*B, F]
        layer_refs = []
        for l in range(num_layers):
            n_chunks = 1 if l == 0 else dirs
            per_dir = []
            for _d in range(dirs):
                wih = [next(it) for _ in range(n_chunks)]    # [chunk_in, 3H] each
                whh = next(it)                               # [H, 3H]
                bg = next(it)                                # [1, 3H]  (r,z folded)
                bhn = next(it)                               # [1, H]
                per_dir.append((wih, whh, bg, bhn))
            layer_refs.append(per_dir)
        fc_w = [next(it) for _ in range(dirs)]               # [H, O] each
        fc_b = next(it)                                      # [1, O]
        out_ref = next(it)                                   # [T*B, O]
        gi_scr = [[next(it) for _ in range(dirs)]            # [T*B, 3H] each
                  for _ in range(num_layers)]
        act_scr = [[next(it) for _ in range(dirs)]           # [T*B, H] each
                   for _ in range(num_layers)]

        # Current layer input as list of [T*B, chunk_in] values
        # (1 chunk for the raw input, `dirs` chunks afterwards: the
        # bidirectional "concat" is realized as a split matmul).
        layer_in = [x_ref[...]]

        for l in range(num_layers):
            # ---- hoisted, gate-packed input projections: one whole-sequence
            #      matmul per input chunk per direction, single scratch store.
            for d in range(dirs):
                wih, _whh, bg, _bhn = layer_refs[l][d]
                acc = None
                for c, chunk in enumerate(layer_in):
                    p = jnp.dot(chunk, wih[c][...],
                                preferred_element_type=jnp.float32)
                    acc = p if acc is None else acc + p
                gi_scr[l][d][...] = acc + bg[...]            # bias broadcast once

            # ---- hoist recurrent weights / b_hn broadcast out of the loop.
            whh_v = [layer_refs[l][d][1][...] for d in range(dirs)]
            bhn_v = [jnp.broadcast_to(layer_refs[l][d][3][...], (B, H))
                     for d in range(dirs)]

            # ---- fused fwd + bwd recurrence, fully unrolled (T static).
            h = [jnp.zeros((B, H), jnp.float32) for _ in range(dirs)]
            for s in range(T):
                for d in range(dirs):
                    t = s if d == 0 else T - 1 - s
                    rows = pl.ds(t * B, B)
                    g = gi_scr[l][d][rows, :]                # [B, 3H]
                    hh = jnp.dot(h[d], whh_v[d],             # ONE matmul / step
                                 preferred_element_type=jnp.float32)
                    r = jax.nn.sigmoid(g[:, :H] + hh[:, :H])
                    z = jax.nn.sigmoid(g[:, H:2 * H] + hh[:, H:2 * H])
                    n = jnp.tanh(g[:, 2 * H:] + r * (hh[:, 2 * H:] + bhn_v[d]))
                    h[d] = (1.0 - z) * n + z * h[d]
                    # off the dependency chain; feeds next layer / FC slab
                    act_scr[l][d][rows, :] = h[d]

            layer_in = [act_scr[l][d][...] for d in range(dirs)]

        # ---- fused output Linear + Tanh over the whole sequence.
        acc = None
        for d, chunk in enumerate(layer_in):
            p = jnp.dot(chunk, fc_w[d][...], preferred_element_type=jnp.float32)
            acc = p if acc is None else acc + p
        out_ref[...] = jnp.tanh(acc + fc_b[...])

    return kernel


# ---------------------------------------------------------------------------
# Forward wrapper (host-side packing: gate order r | z | n, PyTorch GRU)
# ---------------------------------------------------------------------------

def sequence_model_forward(x, params, bidirectional=True):
    """x: [B, F, T]  ->  [B, output_size, T]"""
    assert x.ndim == 3
    B, F, T = x.shape
    dirs = 2 if bidirectional else 1
    num_layers = len(params["gru"])
    H = params["gru"][0]["fwd"][1].shape[0]          # w_hh: [H, 3H]
    O = params["fc_w"].shape[-1]

    # time-major flat layout: row index = t*B + b  (lane-dense feature axis)
    x_flat = jnp.transpose(x, (2, 0, 1)).reshape(T * B, F).astype(jnp.float32)

    inputs = [x_flat]
    for l, layer in enumerate(params["gru"]):
        n_chunks = 1 if l == 0 else dirs
        for d in range(dirs):
            w_ih, w_hh, b_ih, b_hh = layer["fwd" if d == 0 else "bwd"]
            chunk_in = w_ih.shape[0] // n_chunks
            for c in range(n_chunks):                 # split rows, keep 2-D [*, 3H]
                inputs.append(w_ih[c * chunk_in:(c + 1) * chunk_in, :])
            inputs.append(w_hh)                       # [H, 3H]
            # fold b_hh into b_ih for r,z; keep b_hn separate
            b_gates = jnp.concatenate(
                [b_ih[:, :2 * H] + b_hh[:, :2 * H], b_ih[:, 2 * H:]], axis=1)
            inputs.append(b_gates)                    # [1, 3H]
            inputs.append(b_hh[:, 2 * H:])            # [1, H]   (b_hn)
    for c in range(dirs):
        inputs.append(params["fc_w"][c * H:(c + 1) * H, :])   # [H, O]
    inputs.append(params["fc_b"])                              # [1, O]

    kernel = _build_fused_kernel(num_layers, dirs, T, B, H)

    out_flat = pl.pallas_call(
        kernel,
        out_shape=jax.ShapeDtypeStruct((T * B, O), jnp.float32),
        in_specs=[_VMEM_SPEC] * len(inputs),
        out_specs=_VMEM_SPEC,
        scratch_shapes=(
            [pltpu.VMEM((T * B, 3 * H), jnp.float32)           # gate pre-acts
             for _ in range(num_layers * dirs)]
            + [pltpu.VMEM((T * B, H), jnp.float32)             # layer outputs
               for _ in range(num_layers * dirs)]
        ),
    )(*inputs)

    # lane-dense [T*B, O] slab from the kernel; single XLA transpose to [B,O,T]
    return jnp.transpose(out_flat.reshape(T, B, O), (1, 2, 0))


# ---------------------------------------------------------------------------
# Pure-JAX reference (PyTorch GRU semantics), HIGHEST matmul precision
# ---------------------------------------------------------------------------

def gru_reference(x, params, bidirectional=True):
    B, F, T = x.shape
    dirs = 2 if bidirectional else 1

    def hi(a, b):
        return jnp.dot(a, b, precision=lax.Precision.HIGHEST)

    h_seq = jnp.transpose(x, (2, 0, 1)).astype(jnp.float32)    # [T, B, F]
    for layer in params["gru"]:
        outs = []
        for d in range(dirs):
            w_ih, w_hh, b_ih, b_hh = layer["fwd" if d == 0 else "bwd"]
            H = w_hh.shape[0]
            xs = h_seq if d == 0 else h_seq[::-1]

            def step(h, x_t, w_ih=w_ih, w_hh=w_hh, b_ih=b_ih, b_hh=b_hh, H=H):
                gi = hi(x_t, w_ih) + b_ih
                gh = hi(h, w_hh) + b_hh
                r = jax.nn.sigmoid(gi[:, :H] + gh[:, :H])
                z = jax.nn.sigmoid(gi[:, H:2 * H] + gh[:, H:2 * H])
                n = jnp.tanh(gi[:, 2 * H:] + r * gh[:, 2 * H:])
                h_new = (1.0 - z) * n + z * h
                return h_new, h_new

            _, ys = lax.scan(step, jnp.zeros((B, H), jnp.float32), xs)
            outs.append(ys if d == 0 else ys[::-1])
        h_seq = outs[0] if dirs == 1 else jnp.concatenate(outs, axis=-1)
    o = jnp.tanh(hi(h_seq, params["fc_w"]) + params["fc_b"])   # [T, B, O]
    return jnp.transpose(o, (1, 2, 0))                         # [B, O, T]


# ---------------------------------------------------------------------------
# Deterministic parameter init (PyTorch-style uniform(-1/sqrt(H), 1/sqrt(H)))
# ---------------------------------------------------------------------------

def init_params(key, input_size, output_size, hidden_size, num_layers,
                bidirectional):
    H = hidden_size
    k = 1.0 / math.sqrt(H)
    dirs = 2 if bidirectional else 1
    gru = []
    d_in = input_size
    for _ in range(num_layers):
        layer = {}
        for d in range(dirs):
            key, k0, k1, k2, k3 = jax.random.split(key, 5)
            layer["fwd" if d == 0 else "bwd"] = (
                jax.random.uniform(k0, (d_in, 3 * H), jnp.float32, -k, k),
                jax.random.uniform(k1, (H, 3 * H), jnp.float32, -k, k),
                jax.random.uniform(k2, (1, 3 * H), jnp.float32, -k, k),
                jax.random.uniform(k3, (1, 3 * H), jnp.float32, -k, k),
            )
        gru.append(layer)
        d_in = H * dirs

    fc_in = H * dirs
    kf = 1.0 / math.sqrt(fc_in)
    key, k1, k2 = jax.random.split(key, 3)
    fc_w = jax.random.uniform(k1, (fc_in, output_size), jnp.float32, -kf, kf)
    fc_b = jax.random.uniform(k2, (1, output_size), jnp.float32, -kf, kf)
    return {"gru": gru, "fc_w": fc_w, "fc_b": fc_b}


# ---------------------------------------------------------------------------
# Main
# ---------------------------------------------------------------------------

if __name__ == "__main__":
    # SequenceModel(input_size=16, output_size=16, hidden_size=32,
    #               num_layers=2, bidirectional=True,
    #               sequence_model='GRU', output_activate_function='Tanh')
    B, F, T = 2, 16, 8
    input_size, output_size, hidden_size = 16, 16, 32
    num_layers, bidirectional = 2, True

    key = jax.random.PRNGKey(0)
    key, pkey, xkey = jax.random.split(key, 3)
    params = init_params(pkey, input_size, output_size, hidden_size,
                         num_layers, bidirectional)
    x = jax.random.normal(xkey, (B, F, T), dtype=jnp.float32)   # [B, F, T]

    out = jax.block_until_ready(
        sequence_model_forward(x, params, bidirectional=bidirectional))
    assert out.shape == (B, output_size, T), out.shape

    ref = jax.block_until_ready(gru_reference(x, params, bidirectional))
    max_err = float(jnp.max(jnp.abs(out - ref)))
    # Tightened tolerance (was 5e-2): both paths are f32 with f32 accumulation;
    # only MXU multi-pass rounding differences remain. Structural bugs give
    # O(0.1+) errors.
    assert max_err < 2e-3, f"kernel/reference mismatch: max_err={max_err}"

    print("KERNEL_OK")
</pallas_src>

<mosaic_0001>
module attributes {stable_mosaic.version = 11 : i64} {
  func.func @kernel(%arg0: memref<16x16xf32, #tpu.memory_space<vmem>>, %arg1: memref<16x96xf32, #tpu.memory_space<vmem>>, %arg2: memref<32x96xf32, #tpu.memory_space<vmem>>, %arg3: memref<1x96xf32, #tpu.memory_space<vmem>>, %arg4: memref<1x32xf32, #tpu.memory_space<vmem>>, %arg5: memref<16x96xf32, #tpu.memory_space<vmem>>, %arg6: memref<32x96xf32, #tpu.memory_space<vmem>>, %arg7: memref<1x96xf32, #tpu.memory_space<vmem>>, %arg8: memref<1x32xf32, #tpu.memory_space<vmem>>, %arg9: memref<32x96xf32, #tpu.memory_space<vmem>>, %arg10: memref<32x96xf32, #tpu.memory_space<vmem>>, %arg11: memref<32x96xf32, #tpu.memory_space<vmem>>, %arg12: memref<1x96xf32, #tpu.memory_space<vmem>>, %arg13: memref<1x32xf32, #tpu.memory_space<vmem>>, %arg14: memref<32x96xf32, #tpu.memory_space<vmem>>, %arg15: memref<32x96xf32, #tpu.memory_space<vmem>>, %arg16: memref<32x96xf32, #tpu.memory_space<vmem>>, %arg17: memref<1x96xf32, #tpu.memory_space<vmem>>, %arg18: memref<1x32xf32, #tpu.memory_space<vmem>>, %arg19: memref<32x16xf32, #tpu.memory_space<vmem>>, %arg20: memref<32x16xf32, #tpu.memory_space<vmem>>, %arg21: memref<1x16xf32, #tpu.memory_space<vmem>>, %arg22: memref<16x16xf32, #tpu.memory_space<vmem>>, %arg23: memref<16x96xf32, #tpu.memory_space<vmem>>, %arg24: memref<16x96xf32, #tpu.memory_space<vmem>>, %arg25: memref<16x96xf32, #tpu.memory_space<vmem>>, %arg26: memref<16x96xf32, #tpu.memory_space<vmem>>, %arg27: memref<16x32xf32, #tpu.memory_space<vmem>>, %arg28: memref<16x32xf32, #tpu.memory_space<vmem>>, %arg29: memref<16x32xf32, #tpu.memory_space<vmem>>, %arg30: memref<16x32xf32, #tpu.memory_space<vmem>>) attributes {dimension_semantics = [], scalar_prefetch = 0 : i64, scratch_operands = 8 : i64, tpu.core_type = #tpu.core_type<tc>} {
    %c0 = arith.constant 0 : index
    %c0_0 = arith.constant 0 : index
    %0 = vector.load %arg0[%c0, %c0_0] : memref<16x16xf32, #tpu.memory_space<vmem>>, vector<16x16xf32>
    %c0_1 = arith.constant 0 : index
    %c0_2 = arith.constant 0 : index
    %1 = vector.load %arg1[%c0_1, %c0_2] : memref<16x96xf32, #tpu.memory_space<vmem>>, vector<16x96xf32>
    %cst = arith.constant dense<0.000000e+00> : vector<16x96xf32>
    %2 = tpu.matmul %0, %1, %cst {dimension_numbers = #tpu.dot_dimension_numbers<[1], [0], [0], [1], [0, 0, 1, 1], [], []>} : vector<16x16xf32>, vector<16x96xf32>, vector<16x96xf32> -> vector<16x96xf32>
    %c0_3 = arith.constant 0 : index
    %c0_4 = arith.constant 0 : index
    %3 = vector.load %arg3[%c0_3, %c0_4] : memref<1x96xf32, #tpu.memory_space<vmem>>, vector<1x96xf32>
    %4 = vector.broadcast %3 : vector<1x96xf32> to vector<16x96xf32>
    %5 = arith.addf %2, %4 : vector<16x96xf32>
    %c0_5 = arith.constant 0 : index
    %c0_6 = arith.constant 0 : index
    %6 = vector.load %arg23[%c0_5, %c0_6] : memref<16x96xf32, #tpu.memory_space<vmem>>, vector<16x96xf32>
    tpu.vector_store %arg23[%c0_5, %c0_6], %5 {strides = array<i32>} : memref<16x96xf32, #tpu.memory_space<vmem>>, vector<16x96xf32>,
    %c0_7 = arith.constant 0 : index
    %c0_8 = arith.constant 0 : index
    %7 = vector.load %arg5[%c0_7, %c0_8] : memref<16x96xf32, #tpu.memory_space<vmem>>, vector<16x96xf32>
    %cst_9 = arith.constant dense<0.000000e+00> : vector<16x96xf32>
    %8 = tpu.matmul %0, %7, %cst_9 {dimension_numbers = #tpu.dot_dimension_numbers<[1], [0], [0], [1], [0, 0, 1, 1], [], []>} : vector<16x16xf32>, vector<16x96xf32>, vector<16x96xf32> -> vector<16x96xf32>
    %c0_10 = arith.constant 0 : index
    %c0_11 = arith.constant 0 : index
    %9 = vector.load %arg7[%c0_10, %c0_11] : memref<1x96xf32, #tpu.memory_space<vmem>>, vector<1x96xf32>
    %10 = vector.broadcast %9 : vector<1x96xf32> to vector<16x96xf32>
    %11 = arith.addf %8, %10 : vector<16x96xf32>
    %c0_12 = arith.constant 0 : index
    %c0_13 = arith.constant 0 : index
    %12 = vector.load %arg24[%c0_12, %c0_13] : memref<16x96xf32, #tpu.memory_space<vmem>>, vector<16x96xf32>
    tpu.vector_store %arg24[%c0_12, %c0_13], %11 {strides = array<i32>} : memref<16x96xf32, #tpu.memory_space<vmem>>, vector<16x96xf32>,
    %c0_14 = arith.constant 0 : index
    %c0_15 = arith.constant 0 : index
    %13 = vector.load %arg2[%c0_14, %c0_15] : memref<32x96xf32, #tpu.memory_space<vmem>>, vector<32x96xf32>
    %c0_16 = arith.constant 0 : index
    %c0_17 = arith.constant 0 : index
    %14 = vector.load %arg6[%c0_16, %c0_17] : memref<32x96xf32, #tpu.memory_space<vmem>>, vector<32x96xf32>
    %c0_18 = arith.constant 0 : index
    %c0_19 = arith.constant 0 : index
    %15 = vector.load %arg4[%c0_18, %c0_19] : memref<1x32xf32, #tpu.memory_space<vmem>>, vector<1x32xf32>
    %16 = vector.shape_cast %15 : vector<1x32xf32> to vector<1x32xf32>
    %17 = vector.broadcast %16 : vector<1x32xf32> to vector<2x32xf32>
    %c0_20 = arith.constant 0 : index
    %c0_21 = arith.constant 0 : index
    %18 = vector.load %arg8[%c0_20, %c0_21] : memref<1x32xf32, #tpu.memory_space<vmem>>, vector<1x32xf32>
    %19 = vector.shape_cast %18 : vector<1x32xf32> to vector<1x32xf32>
    %20 = vector.broadcast %19 : vector<1x32xf32> to vector<2x32xf32>
    %cst_22 = arith.constant 0.000000e+00 : f32
    %21 = vector.broadcast %cst_22 : f32 to vector<2x32xf32>
    %cst_23 = arith.constant 0.000000e+00 : f32
    %22 = vector.broadcast %cst_23 : f32 to vector<2x32xf32>
    %c0_24 = arith.constant 0 : index
    %c0_25 = arith.constant 0 : index
    %23 = vector.load %arg23[%c0_24, %c0_25] : memref<16x96xf32, #tpu.memory_space<vmem>>, vector<2x96xf32>
    %cst_26 = arith.constant dense<0.000000e+00> : vector<2x96xf32>
    %24 = tpu.matmul %21, %13, %cst_26 {dimension_numbers = #tpu.dot_dimension_numbers<[1], [0], [0], [1], [0, 0, 1, 1], [], []>} : vector<2x32xf32>, vector<32x96xf32>, vector<2x96xf32> -> vector<2x96xf32>
    %25 = vector.extract_strided_slice %23 {offsets = [0, 0], sizes = [2, 32], strides = [1, 1]} : vector<2x96xf32> to vector<2x32xf32>
    %26 = vector.extract_strided_slice %24 {offsets = [0, 0], sizes = [2, 32], strides = [1, 1]} : vector<2x96xf32> to vector<2x32xf32>
    %27 = arith.addf %25, %26 : vector<2x32xf32>
    %28 = arith.negf %27 : vector<2x32xf32>
    %29 = math.exp %28 : vector<2x32xf32>
    %cst_27 = arith.constant 1.000000e+00 : f32
    %30 = vector.broadcast %cst_27 : f32 to vector<2x32xf32>
    %31 = arith.addf %30, %29 : vector<2x32xf32>
    %32 = arith.divf %30, %31 : vector<2x32xf32>
    %33 = vector.extract_strided_slice %23 {offsets = [0, 32], sizes = [2, 32], strides = [1, 1]} : vector<2x96xf32> to vector<2x32xf32>
    %34 = vector.extract_strided_slice %24 {offsets = [0, 32], sizes = [2, 32], strides = [1, 1]} : vector<2x96xf32> to vector<2x32xf32>
    %35 = arith.addf %33, %34 : vector<2x32xf32>
    %36 = arith.negf %35 : vector<2x32xf32>
    %37 = math.exp %36 : vector<2x32xf32>
    %cst_28 = arith.constant 1.000000e+00 : f32
    %38 = vector.broadcast %cst_28 : f32 to vector<2x32xf32>
    %39 = arith.addf %38, %37 : vector<2x32xf32>
    %40 = arith.divf %38, %39 : vector<2x32xf32>
    %41 = vector.extract_strided_slice %23 {offsets = [0, 64], sizes = [2, 32], strides = [1, 1]} : vector<2x96xf32> to vector<2x32xf32>
    %42 = vector.extract_strided_slice %24 {offsets = [0, 64], sizes = [2, 32], strides = [1, 1]} : vector<2x96xf32> to vector<2x32xf32>
    %43 = arith.addf %42, %17 : vector<2x32xf32>
    %44 = arith.mulf %32, %43 : vector<2x32xf32>
    %45 = arith.addf %41, %44 : vector<2x32xf32>
    %46 = math.tanh %45 : vector<2x32xf32>
    %cst_29 = arith.constant 1.000000e+00 : f32
    %47 = vector.broadcast %cst_29 : f32 to vector<2x32xf32>
    %48 = arith.subf %47, %40 : vector<2x32xf32>
    %49 = arith.mulf %48, %46 : vector<2x32xf32>
    %50 = arith.mulf %40, %21 : vector<2x32xf32>
    %51 = arith.addf %49, %50 : vector<2x32xf32>
    %c0_30 = arith.constant 0 : index
    %c0_31 = arith.constant 0 : index
    %52 = vector.load %arg27[%c0_30, %c0_31] : memref<16x32xf32, #tpu.memory_space<vmem>>, vector<2x32xf32>
    tpu.vector_store %arg27[%c0_30, %c0_31], %51 {strides = array<i32>} : memref<16x32xf32, #tpu.memory_space<vmem>>, vector<2x32xf32>,
    %c14 = arith.constant 14 : index
    %c0_32 = arith.constant 0 : index
    %53 = vector.load %arg24[%c14, %c0_32] : memref<16x96xf32, #tpu.memory_space<vmem>>, vector<2x96xf32>
    %cst_33 = arith.constant dense<0.000000e+00> : vector<2x96xf32>
    %54 = tpu.matmul %22, %14, %cst_33 {dimension_numbers = #tpu.dot_dimension_numbers<[1], [0], [0], [1], [0, 0, 1, 1], [], []>} : vector<2x32xf32>, vector<32x96xf32>, vector<2x96xf32> -> vector<2x96xf32>
    %55 = vector.extract_strided_slice %53 {offsets = [0, 0], sizes = [2, 32], strides = [1, 1]} : vector<2x96xf32> to vector<2x32xf32>
    %56 = vector.extract_strided_slice %54 {offsets = [0, 0], sizes = [2, 32], strides = [1, 1]} : vector<2x96xf32> to vector<2x32xf32>
    %57 = arith.addf %55, %56 : vector<2x32xf32>
    %58 = arith.negf %57 : vector<2x32xf32>
    %59 = math.exp %58 : vector<2x32xf32>
    %cst_34 = arith.constant 1.000000e+00 : f32
    %60 = vector.broadcast %cst_34 : f32 to vector<2x32xf32>
    %61 = arith.addf %60, %59 : vector<2x32xf32>
    %62 = arith.divf %60, %61 : vector<2x32xf32>
    %63 = vector.extract_strided_slice %53 {offsets = [0, 32], sizes = [2, 32], strides = [1, 1]} : vector<2x96xf32> to vector<2x32xf32>
    %64 = vector.extract_strided_slice %54 {offsets = [0, 32], sizes = [2, 32], strides = [1, 1]} : vector<2x96xf32> to vector<2x32xf32>
    %65 = arith.addf %63, %64 : vector<2x32xf32>
    %66 = arith.negf %65 : vector<2x32xf32>
    %67 = math.exp %66 : vector<2x32xf32>
    %cst_35 = arith.constant 1.000000e+00 : f32
    %68 = vector.broadcast %cst_35 : f32 to vector<2x32xf32>
    %69 = arith.addf %68, %67 : vector<2x32xf32>
    %70 = arith.divf %68, %69 : vector<2x32xf32>
    %71 = vector.extract_strided_slice %53 {offsets = [0, 64], sizes = [2, 32], strides = [1, 1]} : vector<2x96xf32> to vector<2x32xf32>
    %72 = vector.extract_strided_slice %54 {offsets = [0, 64], sizes = [2, 32], strides = [1, 1]} : vector<2x96xf32> to vector<2x32xf32>
    %73 = arith.addf %72, %20 : vector<2x32xf32>
    %74 = arith.mulf %62, %73 : vector<2x32xf32>
    %75 = arith.addf %71, %74 : vector<2x32xf32>
    %76 = math.tanh %75 : vector<2x32xf32>
    %cst_36 = arith.constant 1.000000e+00 : f32
    %77 = vector.broadcast %cst_36 : f32 to vector<2x32xf32>
    %78 = arith.subf %77, %70 : vector<2x32xf32>
    %79 = arith.mulf %78, %76 : vector<2x32xf32>
    %80 = arith.mulf %70, %22 : vector<2x32xf32>
    %81 = arith.addf %79, %80 : vector<2x32xf32>
    %c14_37 = arith.constant 14 : index
    %c0_38 = arith.constant 0 : index
    %82 = vector.load %arg28[%c14_37, %c0_38] : memref<16x32xf32, #tpu.memory_space<vmem>>, vector<2x32xf32>
    tpu.vector_store %arg28[%c14_37, %c0_38], %81 {strides = array<i32>} : memref<16x32xf32, #tpu.memory_space<vmem>>, vector<2x32xf32>,
    %c2 = arith.constant 2 : index
    %c0_39 = arith.constant 0 : index
    %83 = vector.load %arg23[%c2, %c0_39] : memref<16x96xf32, #tpu.memory_space<vmem>>, vector<2x96xf32>
    %cst_40 = arith.constant dense<0.000000e+00> : vector<2x96xf32>
    %84 = tpu.matmul %51, %13, %cst_40 {dimension_numbers = #tpu.dot_dimension_numbers<[1], [0], [0], [1], [0, 0, 1, 1], [], []>} : vector<2x32xf32>, vector<32x96xf32>, vector<2x96xf32> -> vector<2x96xf32>
    %85 = vector.extract_strided_slice %83 {offsets = [0, 0], sizes = [2, 32], strides = [1, 1]} : vector<2x96xf32> to vector<2x32xf32>
    %86 = vector.extract_strided_slice %84 {offsets = [0, 0], sizes = [2, 32], strides = [1, 1]} : vector<2x96xf32> to vector<2x32xf32>
    %87 = arith.addf %85, %86 : vector<2x32xf32>
    %88 = arith.negf %87 : vector<2x32xf32>
    %89 = math.exp %88 : vector<2x32xf32>
    %cst_41 = arith.constant 1.000000e+00 : f32
    %90 = vector.broadcast %cst_41 : f32 to vector<2x32xf32>
    %91 = arith.addf %90, %89 : vector<2x32xf32>
    %92 = arith.divf %90, %91 : vector<2x32xf32>
    %93 = vector.extract_strided_slice %83 {offsets = [0, 32], sizes = [2, 32], strides = [1, 1]} : vector<2x96xf32> to vector<2x32xf32>
    %94 = vector.extract_strided_slice %84 {offsets = [0, 32], sizes = [2, 32], strides = [1, 1]} : vector<2x96xf32> to vector<2x32xf32>
    %95 = arith.addf %93, %94 : vector<2x32xf32>
    %96 = arith.negf %95 : vector<2x32xf32>
    %97 = math.exp %96 : vector<2x32xf32>
    %cst_42 = arith.constant 1.000000e+00 : f32
    %98 = vector.broadcast %cst_42 : f32 to vector<2x32xf32>
    %99 = arith.addf %98, %97 : vector<2x32xf32>
    %100 = arith.divf %98, %99 : vector<2x32xf32>
    %101 = vector.extract_strided_slice %83 {offsets = [0, 64], sizes = [2, 32], strides = [1, 1]} : vector<2x96xf32> to vector<2x32xf32>
    %102 = vector.extract_strided_slice %84 {offsets = [0, 64], sizes = [2, 32], strides = [1, 1]} : vector<2x96xf32> to vector<2x32xf32>
    %103 = arith.addf %102, %17 : vector<2x32xf32>
    %104 = arith.mulf %92, %103 : vector<2x32xf32>
    %105 = arith.addf %101, %104 : vector<2x32xf32>
    %106 = math.tanh %105 : vector<2x32xf32>
    %cst_43 = arith.constant 1.000000e+00 : f32
    %107 = vector.broadcast %cst_43 : f32 to vector<2x32xf32>
    %108 = arith.subf %107, %100 : vector<2x32xf32>
    %109 = arith.mulf %108, %106 : vector<2x32xf32>
    %110 = arith.mulf %100, %51 : vector<2x32xf32>
    %111 = arith.addf %109, %110 : vector<2x32xf32>
    %c2_44 = arith.constant 2 : index
    %c0_45 = arith.constant 0 : index
    %112 = vector.load %arg27[%c2_44, %c0_45] : memref<16x32xf32, #tpu.memory_space<vmem>>, vector<2x32xf32>
    tpu.vector_store %arg27[%c2_44, %c0_45], %111 {strides = array<i32>} : memref<16x32xf32, #tpu.memory_space<vmem>>, vector<2x32xf32>,
    %c12 = arith.constant 12 : index
    %c0_46 = arith.constant 0 : index
    %113 = vector.load %arg24[%c12, %c0_46] : memref<16x96xf32, #tpu.memory_space<vmem>>, vector<2x96xf32>
    %cst_47 = arith.constant dense<0.000000e+00> : vector<2x96xf32>
    %114 = tpu.matmul %81, %14, %cst_47 {dimension_numbers = #tpu.dot_dimension_numbers<[1], [0], [0], [1], [0, 0, 1, 1], [], []>} : vector<2x32xf32>, vector<32x96xf32>, vector<2x96xf32> -> vector<2x96xf32>
    %115 = vector.extract_strided_slice %113 {offsets = [0, 0], sizes = [2, 32], strides = [1, 1]} : vector<2x96xf32> to vector<2x32xf32>
    %116 = vector.extract_strided_slice %114 {offsets = [0, 0], sizes = [2, 32], strides = [1, 1]} : vector<2x96xf32> to vector<2x32xf32>
    %117 = arith.addf %115, %116 : vector<2x32xf32>
    %118 = arith.negf %117 : vector<2x32xf32>
    %119 = math.exp %118 : vector<2x32xf32>
    %cst_48 = arith.constant 1.000000e+00 : f32
    %120 = vector.broadcast %cst_48 : f32 to vector<2x32xf32>
    %121 = arith.addf %120, %119 : vector<2x32xf32>
    %122 = arith.divf %120, %121 : vector<2x32xf32>
    %123 = vector.extract_strided_slice %113 {offsets = [0, 32], sizes = [2, 32], strides = [1, 1]} : vector<2x96xf32> to vector<2x32xf32>
    %124 = vector.extract_strided_slice %114 {offsets = [0, 32], sizes = [2, 32], strides = [1, 1]} : vector<2x96xf32> to vector<2x32xf32>
    %125 = arith.addf %123, %124 : vector<2x32xf32>
    %126 = arith.negf %125 : vector<2x32xf32>
    %127 = math.exp %126 : vector<2x32xf32>
    %cst_49 = arith.constant 1.000000e+00 : f32
    %128 = vector.broadcast %cst_49 : f32 to vector<2x32xf32>
    %129 = arith.addf %128, %127 : vector<2x32xf32>
    %130 = arith.divf %128, %129 : vector<2x32xf32>
    %131 = vector.extract_strided_slice %113 {offsets = [0, 64], sizes = [2, 32], strides = [1, 1]} : vector<2x96xf32> to vector<2x32xf32>
    %132 = vector.extract_strided_slice %114 {offsets = [0, 64], sizes = [2, 32], strides = [1, 1]} : vector<2x96xf32> to vector<2x32xf32>
    %133 = arith.addf %132, %20 : vector<2x32xf32>
    %134 = arith.mulf %122, %133 : vector<2x32xf32>
    %135 = arith.addf %131, %134 : vector<2x32xf32>
    %136 = math.tanh %135 : vector<2x32xf32>
    %cst_50 = arith.constant 1.000000e+00 : f32
    %137 = vector.broadcast %cst_50 : f32 to vector<2x32xf32>
    %138 = arith.subf %137, %130 : vector<2x32xf32>
    %139 = arith.mulf %138, %136 : vector<2x32xf32>
    %140 = arith.mulf %130, %81 : vector<2x32xf32>
    %141 = arith.addf %139, %140 : vector<2x32xf32>
    %c12_51 = arith.constant 12 : index
    %c0_52 = arith.constant 0 : index
    %142 = vector.load %arg28[%c12_51, %c0_52] : memref<16x32xf32, #tpu.memory_space<vmem>>, vector<2x32xf32>
    tpu.vector_store %arg28[%c12_51, %c0_52], %141 {strides = array<i32>} : memref<16x32xf32, #tpu.memory_space<vmem>>, vector<2x32xf32>,
    %c4 = arith.constant 4 : index
    %c0_53 = arith.constant 0 : index
    %143 = vector.load %arg23[%c4, %c0_53] : memref<16x96xf32, #tpu.memory_space<vmem>>, vector<2x96xf32>
    %cst_54 = arith.constant dense<0.000000e+00> : vector<2x96xf32>
    %144 = tpu.matmul %111, %13, %cst_54 {dimension_numbers = #tpu.dot_dimension_numbers<[1], [0], [0], [1], [0, 0, 1, 1], [], []>} : vector<2x32xf32>, vector<32x96xf32>, vector<2x96xf32> -> vector<2x96xf32>
    %145 = vector.extract_strided_slice %143 {offsets = [0, 0], sizes = [2, 32], strides = [1, 1]} : vector<2x96xf32> to vector<2x32xf32>
    %146 = vector.extract_strided_slice %144 {offsets = [0, 0], sizes = [2, 32], strides = [1, 1]} : vector<2x96xf32> to vector<2x32xf32>
    %147 = arith.addf %145, %146 : vector<2x32xf32>
    %148 = arith.negf %147 : vector<2x32xf32>
    %149 = math.exp %148 : vector<2x32xf32>
    %cst_55 = arith.constant 1.000000e+00 : f32
    %150 = vector.broadcast %cst_55 : f32 to vector<2x32xf32>
    %151 = arith.addf %150, %149 : vector<2x32xf32>
    %152 = arith.divf %150, %151 : vector<2x32xf32>
    %153 = vector.extract_strided_slice %143 {offsets = [0, 32], sizes = [2, 32], strides = [1, 1]} : vector<2x96xf32> to vector<2x32xf32>
    %154 = vector.extract_strided_slice %144 {offsets = [0, 32], sizes = [2, 32], strides = [1, 1]} : vector<2x96xf32> to vector<2x32xf32>
    %155 = arith.addf %153, %154 : vector<2x32xf32>
    %156 = arith.negf %155 : vector<2x32xf32>
    %157 = math.exp %156 : vector<2x32xf32>
    %cst_56 = arith.constant 1.000000e+00 : f32
    %158 = vector.broadcast %cst_56 : f32 to vector<2x32xf32>
    %159 = arith.addf %158, %157 : vector<2x32xf32>
    %160 = arith.divf %158, %159 : vector<2x32xf32>
    %161 = vector.extract_strided_slice %143 {offsets = [0, 64], sizes = [2, 32], strides = [1, 1]} : vector<2x96xf32> to vector<2x32xf32>
    %162 = vector.extract_strided_slice %144 {offsets = [0, 64], sizes = [2, 32], strides = [1, 1]} : vector<2x96xf32> to vector<2x32xf32>
    %163 = arith.addf %162, %17 : vector<2x32xf32>
    %164 = arith.mulf %152, %163 : vector<2x32xf32>
    %165 = arith.addf %161, %164 : vector<2x32xf32>
    %166 = math.tanh %165 : vector<2x32xf32>
    %cst_57 = arith.constant 1.000000e+00 : f32
    %167 = vector.broadcast %cst_57 : f32 to vector<2x32xf32>
    %168 = arith.subf %167, %160 : vector<2x32xf32>
    %169 = arith.mulf %168, %166 : vector<2x32xf32>
    %170 = arith.mulf %160, %111 : vector<2x32xf32>
    %171 = arith.addf %169, %170 : vector<2x32xf32>
    %c4_58 = arith.constant 4 : index
    %c0_59 = arith.constant 0 : index
    %172 = vector.load %arg27[%c4_58, %c0_59] : memref<16x32xf32, #tpu.memory_space<vmem>>, vector<2x32xf32>
    tpu.vector_store %arg27[%c4_58, %c0_59], %171 {strides = array<i32>} : memref<16x32xf32, #tpu.memory_space<vmem>>, vector<2x32xf32>,
    %c10 = arith.constant 10 : index
    %c0_60 = arith.constant 0 : index
    %173 = vector.load %arg24[%c10, %c0_60] : memref<16x96xf32, #tpu.memory_space<vmem>>, vector<2x96xf32>
    %cst_61 = arith.constant dense<0.000000e+00> : vector<2x96xf32>
    %174 = tpu.matmul %141, %14, %cst_61 {dimension_numbers = #tpu.dot_dimension_numbers<[1], [0], [0], [1], [0, 0, 1, 1], [], []>} : vector<2x32xf32>, vector<32x96xf32>, vector<2x96xf32> -> vector<2x96xf32>
    %175 = vector.extract_strided_slice %173 {offsets = [0, 0], sizes = [2, 32], strides = [1, 1]} : vector<2x96xf32> to vector<2x32xf32>
    %176 = vector.extract_strided_slice %174 {offsets = [0, 0], sizes = [2, 32], strides = [1, 1]} : vector<2x96xf32> to vector<2x32xf32>
    %177 = arith.addf %175, %176 : vector<2x32xf32>
    %178 = arith.negf %177 : vector<2x32xf32>
    %179 = math.exp %178 : vector<2x32xf32>
    %cst_62 = arith.constant 1.000000e+00 : f32
    %180 = vector.broadcast %cst_62 : f32 to vector<2x32xf32>
    %181 = arith.addf %180, %179 : vector<2x32xf32>
    %182 = arith.divf %180, %181 : vector<2x32xf32>
    %183 = vector.extract_strided_slice %173 {offsets = [0, 32], sizes = [2, 32], strides = [1, 1]} : vector<2x96xf32> to vector<2x32xf32>
    %184 = vector.extract_strided_slice %174 {offsets = [0, 32], sizes = [2, 32], strides = [1, 1]} : vector<2x96xf32> to vector<2x32xf32>
    %185 = arith.addf %183, %184 : vector<2x32xf32>
    %186 = arith.negf %185 : vector<2x32xf32>
    %187 = math.exp %186 : vector<2x32xf32>
    %cst_63 = arith.constant 1.000000e+00 : f32
    %188 = vector.broadcast %cst_63 : f32 to vector<2x32xf32>
    %189 = arith.addf %188, %187 : vector<2x32xf32>
    %190 = arith.divf %188, %189 : vector<2x32xf32>
    %191 = vector.extract_strided_slice %173 {offsets = [0, 64], sizes = [2, 32], strides = [1, 1]} : vector<2x96xf32> to vector<2x32xf32>
    %192 = vector.extract_strided_slice %174 {offsets = [0, 64], sizes = [2, 32], strides = [1, 1]} : vector<2x96xf32> to vector<2x32xf32>
    %193 = arith.addf %192, %20 : vector<2x32xf32>
    %194 = arith.mulf %182, %193 : vector<2x32xf32>
    %195 = arith.addf %191, %194 : vector<2x32xf32>
    %196 = math.tanh %195 : vector<2x32xf32>
    %cst_64 = arith.constant 1.000000e+00 : f32
    %197 = vector.broadcast %cst_64 : f32 to vector<2x32xf32>
    %198 = arith.subf %197, %190 : vector<2x32xf32>
    %199 = arith.mulf %198, %196 : vector<2x32xf32>
    %200 = arith.mulf %190, %141 : vector<2x32xf32>
    %201 = arith.addf %199, %200 : vector<2x32xf32>
    %c10_65 = arith.constant 10 : index
    %c0_66 = arith.constant 0 : index
    %202 = vector.load %arg28[%c10_65, %c0_66] : memref<16x32xf32, #tpu.memory_space<vmem>>, vector<2x32xf32>
    tpu.vector_store %arg28[%c10_65, %c0_66], %201 {strides = array<i32>} : memref<16x32xf32, #tpu.memory_space<vmem>>, vector<2x32xf32>,
    %c6 = arith.constant 6 : index
    %c0_67 = arith.constant 0 : index
    %203 = vector.load %arg23[%c6, %c0_67] : memref<16x96xf32, #tpu.memory_space<vmem>>, vector<2x96xf32>
    %cst_68 = arith.constant dense<0.000000e+00> : vector<2x96xf32>
    %204 = tpu.matmul %171, %13, %cst_68 {dimension_numbers = #tpu.dot_dimension_numbers<[1], [0], [0], [1], [0, 0, 1, 1], [], []>} : vector<2x32xf32>, vector<32x96xf32>, vector<2x96xf32> -> vector<2x96xf32>
    %205 = vector.extract_strided_slice %203 {offsets = [0, 0], sizes = [2, 32], strides = [1, 1]} : vector<2x96xf32> to vector<2x32xf32>
    %206 = vector.extract_strided_slice %204 {offsets = [0, 0], sizes = [2, 32], strides = [1, 1]} : vector<2x96xf32> to vector<2x32xf32>
    %207 = arith.addf %205, %206 : vector<2x32xf32>
    %208 = arith.negf %207 : vector<2x32xf32>
    %209 = math.exp %208 : vector<2x32xf32>
    %cst_69 = arith.constant 1.000000e+00 : f32
    %210 = vector.broadcast %cst_69 : f32 to vector<2x32xf32>
    %211 = arith.addf %210, %209 : vector<2x32xf32>
    %212 = arith.divf %210, %211 : vector<2x32xf32>
    %213 = vector.extract_strided_slice %203 {offsets = [0, 32], sizes = [2, 32], strides = [1, 1]} : vector<2x96xf32> to vector<2x32xf32>
    %214 = vector.extract_strided_slice %204 {offsets = [0, 32], sizes = [2, 32], strides = [1, 1]} : vector<2x96xf32> to vector<2x32xf32>
    %215 = arith.addf %213, %214 : vector<2x32xf32>
    %216 = arith.negf %215 : vector<2x32xf32>
    %217 = math.exp %216 : vector<2x32xf32>
    %cst_70 = arith.constant 1.000000e+00 : f32
    %218 = vector.broadcast %cst_70 : f32 to vector<2x32xf32>
    %219 = arith.addf %218, %217 : vector<2x32xf32>
    %220 = arith.divf %218, %219 : vector<2x32xf32>
    %221 = vector.extract_strided_slice %203 {offsets = [0, 64], sizes = [2, 32], strides = [1, 1]} : vector<2x96xf32> to vector<2x32xf32>
    %222 = vector.extract_strided_slice %204 {offsets = [0, 64], sizes = [2, 32], strides = [1, 1]} : vector<2x96xf32> to vector<2x32xf32>
    %223 = arith.addf %222, %17 : vector<2x32xf32>
    %224 = arith.mulf %212, %223 : vector<2x32xf32>
    %225 = arith.addf %221, %224 : vector<2x32xf32>
    %226 = math.tanh %225 : vector<2x32xf32>
    %cst_71 = arith.constant 1.000000e+00 : f32
    %227 = vector.broadcast %cst_71 : f32 to vector<2x32xf32>
    %228 = arith.subf %227, %220 : vector<2x32xf32>
    %229 = arith.mulf %228, %226 : vector<2x32xf32>
    %230 = arith.mulf %220, %171 : vector<2x32xf32>
    %231 = arith.addf %229, %230 : vector<2x32xf32>
    %c6_72 = arith.constant 6 : index
    %c0_73 = arith.constant 0 : index
    %232 = vector.load %arg27[%c6_72, %c0_73] : memref<16x32xf32, #tpu.memory_space<vmem>>, vector<2x32xf32>
    tpu.vector_store %arg27[%c6_72, %c0_73], %231 {strides = array<i32>} : memref<16x32xf32, #tpu.memory_space<vmem>>, vector<2x32xf32>,
    %c8 = arith.constant 8 : index
    %c0_74 = arith.constant 0 : index
    %233 = vector.load %arg24[%c8, %c0_74] : memref<16x96xf32, #tpu.memory_space<vmem>>, vector<2x96xf32>
    %cst_75 = arith.constant dense<0.000000e+00> : vector<2x96xf32>
    %234 = tpu.matmul %201, %14, %cst_75 {dimension_numbers = #tpu.dot_dimension_numbers<[1], [0], [0], [1], [0, 0, 1, 1], [], []>} : vector<2x32xf32>, vector<32x96xf32>, vector<2x96xf32> -> vector<2x96xf32>
    %235 = vector.extract_strided_slice %233 {offsets = [0, 0], sizes = [2, 32], strides = [1, 1]} : vector<2x96xf32> to vector<2x32xf32>
    %236 = vector.extract_strided_slice %234 {offsets = [0, 0], sizes = [2, 32], strides = [1, 1]} : vector<2x96xf32> to vector<2x32xf32>
    %237 = arith.addf %235, %236 : vector<2x32xf32>
    %238 = arith.negf %237 : vector<2x32xf32>
    %239 = math.exp %238 : vector<2x32xf32>
    %cst_76 = arith.constant 1.000000e+00 : f32
    %240 = vector.broadcast %cst_76 : f32 to vector<2x32xf32>
    %241 = arith.addf %240, %239 : vector<2x32xf32>
    %242 = arith.divf %240, %241 : vector<2x32xf32>
    %243 = vector.extract_strided_slice %233 {offsets = [0, 32], sizes = [2, 32], strides = [1, 1]} : vector<2x96xf32> to vector<2x32xf32>
    %244 = vector.extract_strided_slice %234 {offsets = [0, 32], sizes = [2, 32], strides = [1, 1]} : vector<2x96xf32> to vector<2x32xf32>
    %245 = arith.addf %243, %244 : vector<2x32xf32>
    %246 = arith.negf %245 : vector<2x32xf32>
    %247 = math.exp %246 : vector<2x32xf32>
    %cst_77 = arith.constant 1.000000e+00 : f32
    %248 = vector.broadcast %cst_77 : f32 to vector<2x32xf32>
    %249 = arith.addf %248, %247 : vector<2x32xf32>
    %250 = arith.divf %248, %249 : vector<2x32xf32>
    %251 = vector.extract_strided_slice %233 {offsets = [0, 64], sizes = [2, 32], strides = [1, 1]} : vector<2x96xf32> to vector<2x32xf32>
    %252 = vector.extract_strided_slice %234 {offsets = [0, 64], sizes = [2, 32], strides = [1, 1]} : vector<2x96xf32> to vector<2x32xf32>
    %253 = arith.addf %252, %20 : vector<2x32xf32>
    %254 = arith.mulf %242, %253 : vector<2x32xf32>
    %255 = arith.addf %251, %254 : vector<2x32xf32>
    %256 = math.tanh %255 : vector<2x32xf32>
    %cst_78 = arith.constant 1.000000e+00 : f32
    %257 = vector.broadcast %cst_78 : f32 to vector<2x32xf32>
    %258 = arith.subf %257, %250 : vector<2x32xf32>
    %259 = arith.mulf %258, %256 : vector<2x32xf32>
    %260 = arith.mulf %250, %201 : vector<2x32xf32>
    %261 = arith.addf %259, %260 : vector<2x32xf32>
    %c8_79 = arith.constant 8 : index
    %c0_80 = arith.constant 0 : index
    %262 = vector.load %arg28[%c8_79, %c0_80] : memref<16x32xf32, #tpu.memory_space<vmem>>, vector<2x32xf32>
    tpu.vector_store %arg28[%c8_79, %c0_80], %261 {strides = array<i32>} : memref<16x32xf32, #tpu.memory_space<vmem>>, vector<2x32xf32>,
    %c8_81 = arith.constant 8 : index
    %c0_82 = arith.constant 0 : index
    %263 = vector.load %arg23[%c8_81, %c0_82] : memref<16x96xf32, #tpu.memory_space<vmem>>, vector<2x96xf32>
    %cst_83 = arith.constant dense<0.000000e+00> : vector<2x96xf32>
    %264 = tpu.matmul %231, %13, %cst_83 {dimension_numbers = #tpu.dot_dimension_numbers<[1], [0], [0], [1], [0, 0, 1, 1], [], []>} : vector<2x32xf32>, vector<32x96xf32>, vector<2x96xf32> -> vector<2x96xf32>
    %265 = vector.extract_strided_slice %263 {offsets = [0, 0], sizes = [2, 32], strides = [1, 1]} : vector<2x96xf32> to vector<2x32xf32>
    %266 = vector.extract_strided_slice %264 {offsets = [0, 0], sizes = [2, 32], strides = [1, 1]} : vector<2x96xf32> to vector<2x32xf32>
    %267 = arith.addf %265, %266 : vector<2x32xf32>
    %268 = arith.negf %267 : vector<2x32xf32>
    %269 = math.exp %268 : vector<2x32xf32>
    %cst_84 = arith.constant 1.000000e+00 : f32
    %270 = vector.broadcast %cst_84 : f32 to vector<2x32xf32>
    %271 = arith.addf %270, %269 : vector<2x32xf32>
    %272 = arith.divf %270, %271 : vector<2x32xf32>
    %273 = vector.extract_strided_slice %263 {offsets = [0, 32], sizes = [2, 32], strides = [1, 1]} : vector<2x96xf32> to vector<2x32xf32>
    %274 = vector.extract_strided_slice %264 {offsets = [0, 32], sizes = [2, 32], strides = [1, 1]} : vector<2x96xf32> to vector<2x32xf32>
    %275 = arith.addf %273, %274 : vector<2x32xf32>
    %276 = arith.negf %275 : vector<2x32xf32>
    %277 = math.exp %276 : vector<2x32xf32>
    %cst_85 = arith.constant 1.000000e+00 : f32
    %278 = vector.broadcast %cst_85 : f32 to vector<2x32xf32>
    %279 = arith.addf %278, %277 : vector<2x32xf32>
    %280 = arith.divf %278, %279 : vector<2x32xf32>
    %281 = vector.extract_strided_slice %263 {offsets = [0, 64], sizes = [2, 32], strides = [1, 1]} : vector<2x96xf32> to vector<2x32xf32>
    %282 = vector.extract_strided_slice %264 {offsets = [0, 64], sizes = [2, 32], strides = [1, 1]} : vector<2x96xf32> to vector<2x32xf32>
    %283 = arith.addf %282, %17 : vector<2x32xf32>
    %284 = arith.mulf %272, %283 : vector<2x32xf32>
    %285 = arith.addf %281, %284 : vector<2x32xf32>
    %286 = math.tanh %285 : vector<2x32xf32>
    %cst_86 = arith.constant 1.000000e+00 : f32
    %287 = vector.broadcast %cst_86 : f32 to vector<2x32xf32>
    %288 = arith.subf %287, %280 : vector<2x32xf32>
    %289 = arith.mulf %288, %286 : vector<2x32xf32>
    %290 = arith.mulf %280, %231 : vector<2x32xf32>
    %291 = arith.addf %289, %290 : vector<2x32xf32>
    %c8_87 = arith.constant 8 : index
    %c0_88 = arith.constant 0 : index
    %292 = vector.load %arg27[%c8_87, %c0_88] : memref<16x32xf32, #tpu.memory_space<vmem>>, vector<2x32xf32>
    tpu.vector_store %arg27[%c8_87, %c0_88], %291 {strides = array<i32>} : memref<16x32xf32, #tpu.memory_space<vmem>>, vector<2x32xf32>,
    %c6_89 = arith.constant 6 : index
    %c0_90 = arith.constant 0 : index
    %293 = vector.load %arg24[%c6_89, %c0_90] : memref<16x96xf32, #tpu.memory_space<vmem>>, vector<2x96xf32>
    %cst_91 = arith.constant dense<0.000000e+00> : vector<2x96xf32>
    %294 = tpu.matmul %261, %14, %cst_91 {dimension_numbers = #tpu.dot_dimension_numbers<[1], [0], [0], [1], [0, 0, 1, 1], [], []>} : vector<2x32xf32>, vector<32x96xf32>, vector<2x96xf32> -> vector<2x96xf32>
    %295 = vector.extract_strided_slice %293 {offsets = [0, 0], sizes = [2, 32], strides = [1, 1]} : vector<2x96xf32> to vector<2x32xf32>
    %296 = vector.extract_strided_slice %294 {offsets = [0, 0], sizes = [2, 32], strides = [1, 1]} : vector<2x96xf32> to vector<2x32xf32>
    %297 = arith.addf %295, %296 : vector<2x32xf32>
    %298 = arith.negf %297 : vector<2x32xf32>
    %299 = math.exp %298 : vector<2x32xf32>
    %cst_92 = arith.constant 1.000000e+00 : f32
    %300 = vector.broadcast %cst_92 : f32 to vector<2x32xf32>
    %301 = arith.addf %300, %299 : vector<2x32xf32>
    %302 = arith.divf %300, %301 : vector<2x32xf32>
    %303 = vector.extract_strided_slice %293 {offsets = [0, 32], sizes = [2, 32], strides = [1, 1]} : vector<2x96xf32> to vector<2x32xf32>
    %304 = vector.extract_strided_slice %294 {offsets = [0, 32], sizes = [2, 32], strides = [1, 1]} : vector<2x96xf32> to vector<2x32xf32>
    %305 = arith.addf %303, %304 : vector<2x32xf32>
    %306 = arith.negf %305 : vector<2x32xf32>
    %307 = math.exp %306 : vector<2x32xf32>
    %cst_93 = arith.constant 1.000000e+00 : f32
    %308 = vector.broadcast %cst_93 : f32 to vector<2x32xf32>
    %309 = arith.addf %308, %307 : vector<2x32xf32>
    %310 = arith.divf %308, %309 : vector<2x32xf32>
    %311 = vector.extract_strided_slice %293 {offsets = [0, 64], sizes = [2, 32], strides = [1, 1]} : vector<2x96xf32> to vector<2x32xf32>
    %312 = vector.extract_strided_slice %294 {offsets = [0, 64], sizes = [2, 32], strides = [1, 1]} : vector<2x96xf32> to vector<2x32xf32>
    %313 = arith.addf %312, %20 : vector<2x32xf32>
    %314 = arith.mulf %302, %313 : vector<2x32xf32>
    %315 = arith.addf %311, %314 : vector<2x32xf32>
    %316 = math.tanh %315 : vector<2x32xf32>
    %cst_94 = arith.constant 1.000000e+00 : f32
    %317 = vector.broadcast %cst_94 : f32 to vector<2x32xf32>
    %318 = arith.subf %317, %310 : vector<2x32xf32>
    %319 = arith.mulf %318, %316 : vector<2x32xf32>
    %320 = arith.mulf %310, %261 : vector<2x32xf32>
    %321 = arith.addf %319, %320 : vector<2x32xf32>
    %c6_95 = arith.constant 6 : index
    %c0_96 = arith.constant 0 : index
    %322 = vector.load %arg28[%c6_95, %c0_96] : memref<16x32xf32, #tpu.memory_space<vmem>>, vector<2x32xf32>
    tpu.vector_store %arg28[%c6_95, %c0_96], %321 {strides = array<i32>} : memref<16x32xf32, #tpu.memory_space<vmem>>, vector<2x32xf32>,
    %c10_97 = arith.constant 10 : index
    %c0_98 = arith.constant 0 : index
    %323 = vector.load %arg23[%c10_97, %c0_98] : memref<16x96xf32, #tpu.memory_space<vmem>>, vector<2x96xf32>
    %cst_99 = arith.constant dense<0.000000e+00> : vector<2x96xf32>
    %324 = tpu.matmul %291, %13, %cst_99 {dimension_numbers = #tpu.dot_dimension_numbers<[1], [0], [0], [1], [0, 0, 1, 1], [], []>} : vector<2x32xf32>, vector<32x96xf32>, vector<2x96xf32> -> vector<2x96xf32>
    %325 = vector.extract_strided_slice %323 {offsets = [0, 0], sizes = [2, 32], strides = [1, 1]} : vector<2x96xf32> to vector<2x32xf32>
    %326 = vector.extract_strided_slice %324 {offsets = [0, 0], sizes = [2, 32], strides = [1, 1]} : vector<2x96xf32> to vector<2x32xf32>
    %327 = arith.addf %325, %326 : vector<2x32xf32>
    %328 = arith.negf %327 : vector<2x32xf32>
    %329 = math.exp %328 : vector<2x32xf32>
    %cst_100 = arith.constant 1.000000e+00 : f32
    %330 = vector.broadcast %cst_100 : f32 to vector<2x32xf32>
    %331 = arith.addf %330, %329 : vector<2x32xf32>
    %332 = arith.divf %330, %331 : vector<2x32xf32>
    %333 = vector.extract_strided_slice %323 {offsets = [0, 32], sizes = [2, 32], strides = [1, 1]} : vector<2x96xf32> to vector<2x32xf32>
    %334 = vector.extract_strided_slice %324 {offsets = [0, 32], sizes = [2, 32], strides = [1, 1]} : vector<2x96xf32> to vector<2x32xf32>
    %335 = arith.addf %333, %334 : vector<2x32xf32>
    %336 = arith.negf %335 : vector<2x32xf32>
    %337 = math.exp %336 : vector<2x32xf32>
    %cst_101 = arith.constant 1.000000e+00 : f32
    %338 = vector.broadcast %cst_101 : f32 to vector<2x32xf32>
    %339 = arith.addf %338, %337 : vector<2x32xf32>
    %340 = arith.divf %338, %339 : vector<2x32xf32>
    %341 = vector.extract_strided_slice %323 {offsets = [0, 64], sizes = [2, 32], strides = [1, 1]} : vector<2x96xf32> to vector<2x32xf32>
    %342 = vector.extract_strided_slice %324 {offsets = [0, 64], sizes = [2, 32], strides = [1, 1]} : vector<2x96xf32> to vector<2x32xf32>
    %343 = arith.addf %342, %17 : vector<2x32xf32>
    %344 = arith.mulf %332, %343 : vector<2x32xf32>
    %345 = arith.addf %341, %344 : vector<2x32xf32>
    %346 = math.tanh %345 : vector<2x32xf32>
    %cst_102 = arith.constant 1.000000e+00 : f32
    %347 = vector.broadcast %cst_102 : f32 to vector<2x32xf32>
    %348 = arith.subf %347, %340 : vector<2x32xf32>
    %349 = arith.mulf %348, %346 : vector<2x32xf32>
    %350 = arith.mulf %340, %291 : vector<2x32xf32>
    %351 = arith.addf %349, %350 : vector<2x32xf32>
    %c10_103 = arith.constant 10 : index
    %c0_104 = arith.constant 0 : index
    %352 = vector.load %arg27[%c10_103, %c0_104] : memref<16x32xf32, #tpu.memory_space<vmem>>, vector<2x32xf32>
    tpu.vector_store %arg27[%c10_103, %c0_104], %351 {strides = array<i32>} : memref<16x32xf32, #tpu.memory_space<vmem>>, vector<2x32xf32>,
    %c4_105 = arith.constant 4 : index
    %c0_106 = arith.constant 0 : index
    %353 = vector.load %arg24[%c4_105, %c0_106] : memref<16x96xf32, #tpu.memory_space<vmem>>, vector<2x96xf32>
    %cst_107 = arith.constant dense<0.000000e+00> : vector<2x96xf32>
    %354 = tpu.matmul %321, %14, %cst_107 {dimension_numbers = #tpu.dot_dimension_numbers<[1], [0], [0], [1], [0, 0, 1, 1], [], []>} : vector<2x32xf32>, vector<32x96xf32>, vector<2x96xf32> -> vector<2x96xf32>
    %355 = vector.extract_strided_slice %353 {offsets = [0, 0], sizes = [2, 32], strides = [1, 1]} : vector<2x96xf32> to vector<2x32xf32>
    %356 = vector.extract_strided_slice %354 {offsets = [0, 0], sizes = [2, 32], strides = [1, 1]} : vector<2x96xf32> to vector<2x32xf32>
    %357 = arith.addf %355, %356 : vector<2x32xf32>
    %358 = arith.negf %357 : vector<2x32xf32>
    %359 = math.exp %358 : vector<2x32xf32>
    %cst_108 = arith.constant 1.000000e+00 : f32
    %360 = vector.broadcast %cst_108 : f32 to vector<2x32xf32>
    %361 = arith.addf %360, %359 : vector<2x32xf32>
    %362 = arith.divf %360, %361 : vector<2x32xf32>
    %363 = vector.extract_strided_slice %353 {offsets = [0, 32], sizes = [2, 32], strides = [1, 1]} : vector<2x96xf32> to vector<2x32xf32>
    %364 = vector.extract_strided_slice %354 {offsets = [0, 32], sizes = [2, 32], strides = [1, 1]} : vector<2x96xf32> to vector<2x32xf32>
    %365 = arith.addf %363, %364 : vector<2x32xf32>
    %366 = arith.negf %365 : vector<2x32xf32>
    %367 = math.exp %366 : vector<2x32xf32>
    %cst_109 = arith.constant 1.000000e+00 : f32
    %368 = vector.broadcast %cst_109 : f32 to vector<2x32xf32>
    %369 = arith.addf %368, %367 : vector<2x32xf32>
    %370 = arith.divf %368, %369 : vector<2x32xf32>
    %371 = vector.extract_strided_slice %353 {offsets = [0, 64], sizes = [2, 32], strides = [1, 1]} : vector<2x96xf32> to vector<2x32xf32>
    %372 = vector.extract_strided_slice %354 {offsets = [0, 64], sizes = [2, 32], strides = [1, 1]} : vector<2x96xf32> to vector<2x32xf32>
    %373 = arith.addf %372, %20 : vector<2x32xf32>
    %374 = arith.mulf %362, %373 : vector<2x32xf32>
    %375 = arith.addf %371, %374 : vector<2x32xf32>
    %376 = math.tanh %375 : vector<2x32xf32>
    %cst_110 = arith.constant 1.000000e+00 : f32
    %377 = vector.broadcast %cst_110 : f32 to vector<2x32xf32>
    %378 = arith.subf %377, %370 : vector<2x32xf32>
    %379 = arith.mulf %378, %376 : vector<2x32xf32>
    %380 = arith.mulf %370, %321 : vector<2x32xf32>
    %381 = arith.addf %379, %380 : vector<2x32xf32>
    %c4_111 = arith.constant 4 : index
    %c0_112 = arith.constant 0 : index
    %382 = vector.load %arg28[%c4_111, %c0_112] : memref<16x32xf32, #tpu.memory_space<vmem>>, vector<2x32xf32>
    tpu.vector_store %arg28[%c4_111, %c0_112], %381 {strides = array<i32>} : memref<16x32xf32, #tpu.memory_space<vmem>>, vector<2x32xf32>,
    %c12_113 = arith.constant 12 : index
    %c0_114 = arith.constant 0 : index
    %383 = vector.load %arg23[%c12_113, %c0_114] : memref<16x96xf32, #tpu.memory_space<vmem>>, vector<2x96xf32>
    %cst_115 = arith.constant dense<0.000000e+00> : vector<2x96xf32>
    %384 = tpu.matmul %351, %13, %cst_115 {dimension_numbers = #tpu.dot_dimension_numbers<[1], [0], [0], [1], [0, 0, 1, 1], [], []>} : vector<2x32xf32>, vector<32x96xf32>, vector<2x96xf32> -> vector<2x96xf32>
    %385 = vector.extract_strided_slice %383 {offsets = [0, 0], sizes = [2, 32], strides = [1, 1]} : vector<2x96xf32> to vector<2x32xf32>
    %386 = vector.extract_strided_slice %384 {offsets = [0, 0], sizes = [2, 32], strides = [1, 1]} : vector<2x96xf32> to vector<2x32xf32>
    %387 = arith.addf %385, %386 : vector<2x32xf32>
    %388 = arith.negf %387 : vector<2x32xf32>
    %389 = math.exp %388 : vector<2x32xf32>
    %cst_116 = arith.constant 1.000000e+00 : f32
    %390 = vector.broadcast %cst_116 : f32 to vector<2x32xf32>
    %391 = arith.addf %390, %389 : vector<2x32xf32>
    %392 = arith.divf %390, %391 : vector<2x32xf32>
    %393 = vector.extract_strided_slice %383 {offsets = [0, 32], sizes = [2, 32], strides = [1, 1]} : vector<2x96xf32> to vector<2x32xf32>
    %394 = vector.extract_strided_slice %384 {offsets = [0, 32], sizes = [2, 32], strides = [1, 1]} : vector<2x96xf32> to vector<2x32xf32>
    %395 = arith.addf %393, %394 : vector<2x32xf32>
    %396 = arith.negf %395 : vector<2x32xf32>
    %397 = math.exp %396 : vector<2x32xf32>
    %cst_117 = arith.constant 1.000000e+00 : f32
    %398 = vector.broadcast %cst_117 : f32 to vector<2x32xf32>
    %399 = arith.addf %398, %397 : vector<2x32xf32>
    %400 = arith.divf %398, %399 : vector<2x32xf32>
    %401 = vector.extract_strided_slice %383 {offsets = [0, 64], sizes = [2, 32], strides = [1, 1]} : vector<2x96xf32> to vector<2x32xf32>
    %402 = vector.extract_strided_slice %384 {offsets = [0, 64], sizes = [2, 32], strides = [1, 1]} : vector<2x96xf32> to vector<2x32xf32>
    %403 = arith.addf %402, %17 : vector<2x32xf32>
    %404 = arith.mulf %392, %403 : vector<2x32xf32>
    %405 = arith.addf %401, %404 : vector<2x32xf32>
    %406 = math.tanh %405 : vector<2x32xf32>
    %cst_118 = arith.constant 1.000000e+00 : f32
    %407 = vector.broadcast %cst_118 : f32 to vector<2x32xf32>
    %408 = arith.subf %407, %400 : vector<2x32xf32>
    %409 = arith.mulf %408, %406 : vector<2x32xf32>
    %410 = arith.mulf %400, %351 : vector<2x32xf32>
    %411 = arith.addf %409, %410 : vector<2x32xf32>
    %c12_119 = arith.constant 12 : index
    %c0_120 = arith.constant 0 : index
    %412 = vector.load %arg27[%c12_119, %c0_120] : memref<16x32xf32, #tpu.memory_space<vmem>>, vector<2x32xf32>
    tpu.vector_store %arg27[%c12_119, %c0_120], %411 {strides = array<i32>} : memref<16x32xf32, #tpu.memory_space<vmem>>, vector<2x32xf32>,
    %c2_121 = arith.constant 2 : index
    %c0_122 = arith.constant 0 : index
    %413 = vector.load %arg24[%c2_121, %c0_122] : memref<16x96xf32, #tpu.memory_space<vmem>>, vector<2x96xf32>
    %cst_123 = arith.constant dense<0.000000e+00> : vector<2x96xf32>
    %414 = tpu.matmul %381, %14, %cst_123 {dimension_numbers = #tpu.dot_dimension_numbers<[1], [0], [0], [1], [0, 0, 1, 1], [], []>} : vector<2x32xf32>, vector<32x96xf32>, vector<2x96xf32> -> vector<2x96xf32>
    %415 = vector.extract_strided_slice %413 {offsets = [0, 0], sizes = [2, 32], strides = [1, 1]} : vector<2x96xf32> to vector<2x32xf32>
    %416 = vector.extract_strided_slice %414 {offsets = [0, 0], sizes = [2, 32], strides = [1, 1]} : vector<2x96xf32> to vector<2x32xf32>
    %417 = arith.addf %415, %416 : vector<2x32xf32>
    %418 = arith.negf %417 : vector<2x32xf32>
    %419 = math.exp %418 : vector<2x32xf32>
    %cst_124 = arith.constant 1.000000e+00 : f32
    %420 = vector.broadcast %cst_124 : f32 to vector<2x32xf32>
    %421 = arith.addf %420, %419 : vector<2x32xf32>
    %422 = arith.divf %420, %421 : vector<2x32xf32>
    %423 = vector.extract_strided_slice %413 {offsets = [0, 32], sizes = [2, 32], strides = [1, 1]} : vector<2x96xf32> to vector<2x32xf32>
    %424 = vector.extract_strided_slice %414 {offsets = [0, 32], sizes = [2, 32], strides = [1, 1]} : vector<2x96xf32> to vector<2x32xf32>
    %425 = arith.addf %423, %424 : vector<2x32xf32>
    %426 = arith.negf %425 : vector<2x32xf32>
    %427 = math.exp %426 : vector<2x32xf32>
    %cst_125 = arith.constant 1.000000e+00 : f32
    %428 = vector.broadcast %cst_125 : f32 to vector<2x32xf32>
    %429 = arith.addf %428, %427 : vector<2x32xf32>
    %430 = arith.divf %428, %429 : vector<2x32xf32>
    %431 = vector.extract_strided_slice %413 {offsets = [0, 64], sizes = [2, 32], strides = [1, 1]} : vector<2x96xf32> to vector<2x32xf32>
    %432 = vector.extract_strided_slice %414 {offsets = [0, 64], sizes = [2, 32], strides = [1, 1]} : vector<2x96xf32> to vector<2x32xf32>
    %433 = arith.addf %432, %20 : vector<2x32xf32>
    %434 = arith.mulf %422, %433 : vector<2x32xf32>
    %435 = arith.addf %431, %434 : vector<2x32xf32>
    %436 = math.tanh %435 : vector<2x32xf32>
    %cst_126 = arith.constant 1.000000e+00 : f32
    %437 = vector.broadcast %cst_126 : f32 to vector<2x32xf32>
    %438 = arith.subf %437, %430 : vector<2x32xf32>
    %439 = arith.mulf %438, %436 : vector<2x32xf32>
    %440 = arith.mulf %430, %381 : vector<2x32xf32>
    %441 = arith.addf %439, %440 : vector<2x32xf32>
    %c2_127 = arith.constant 2 : index
    %c0_128 = arith.constant 0 : index
    %442 = vector.load %arg28[%c2_127, %c0_128] : memref<16x32xf32, #tpu.memory_space<vmem>>, vector<2x32xf32>
    tpu.vector_store %arg28[%c2_127, %c0_128], %441 {strides = array<i32>} : memref<16x32xf32, #tpu.memory_space<vmem>>, vector<2x32xf32>,
    %c14_129 = arith.constant 14 : index
    %c0_130 = arith.constant 0 : index
    %443 = vector.load %arg23[%c14_129, %c0_130] : memref<16x96xf32, #tpu.memory_space<vmem>>, vector<2x96xf32>
    %cst_131 = arith.constant dense<0.000000e+00> : vector<2x96xf32>
    %444 = tpu.matmul %411, %13, %cst_131 {dimension_numbers = #tpu.dot_dimension_numbers<[1], [0], [0], [1], [0, 0, 1, 1], [], []>} : vector<2x32xf32>, vector<32x96xf32>, vector<2x96xf32> -> vector<2x96xf32>
    %445 = vector.extract_strided_slice %443 {offsets = [0, 0], sizes = [2, 32], strides = [1, 1]} : vector<2x96xf32> to vector<2x32xf32>
    %446 = vector.extract_strided_slice %444 {offsets = [0, 0], sizes = [2, 32], strides = [1, 1]} : vector<2x96xf32> to vector<2x32xf32>
    %447 = arith.addf %445, %446 : vector<2x32xf32>
    %448 = arith.negf %447 : vector<2x32xf32>
    %449 = math.exp %448 : vector<2x32xf32>
    %cst_132 = arith.constant 1.000000e+00 : f32
    %450 = vector.broadcast %cst_132 : f32 to vector<2x32xf32>
    %451 = arith.addf %450, %449 : vector<2x32xf32>
    %452 = arith.divf %450, %451 : vector<2x32xf32>
    %453 = vector.extract_strided_slice %443 {offsets = [0, 32], sizes = [2, 32], strides = [1, 1]} : vector<2x96xf32> to vector<2x32xf32>
    %454 = vector.extract_strided_slice %444 {offsets = [0, 32], sizes = [2, 32], strides = [1, 1]} : vector<2x96xf32> to vector<2x32xf32>
    %455 = arith.addf %453, %454 : vector<2x32xf32>
    %456 = arith.negf %455 : vector<2x32xf32>
    %457 = math.exp %456 : vector<2x32xf32>
    %cst_133 = arith.constant 1.000000e+00 : f32
    %458 = vector.broadcast %cst_133 : f32 to vector<2x32xf32>
    %459 = arith.addf %458, %457 : vector<2x32xf32>
    %460 = arith.divf %458, %459 : vector<2x32xf32>
    %461 = vector.extract_strided_slice %443 {offsets = [0, 64], sizes = [2, 32], strides = [1, 1]} : vector<2x96xf32> to vector<2x32xf32>
    %462 = vector.extract_strided_slice %444 {offsets = [0, 64], sizes = [2, 32], strides = [1, 1]} : vector<2x96xf32> to vector<2x32xf32>
    %463 = arith.addf %462, %17 : vector<2x32xf32>
    %464 = arith.mulf %452, %463 : vector<2x32xf32>
    %465 = arith.addf %461, %464 : vector<2x32xf32>
    %466 = math.tanh %465 : vector<2x32xf32>
    %cst_134 = arith.constant 1.000000e+00 : f32
    %467 = vector.broadcast %cst_134 : f32 to vector<2x32xf32>
    %468 = arith.subf %467, %460 : vector<2x32xf32>
    %469 = arith.mulf %468, %466 : vector<2x32xf32>
    %470 = arith.mulf %460, %411 : vector<2x32xf32>
    %471 = arith.addf %469, %470 : vector<2x32xf32>
    %c14_135 = arith.constant 14 : index
    %c0_136 = arith.constant 0 : index
    %472 = vector.load %arg27[%c14_135, %c0_136] : memref<16x32xf32, #tpu.memory_space<vmem>>, vector<2x32xf32>
    tpu.vector_store %arg27[%c14_135, %c0_136], %471 {strides = array<i32>} : memref<16x32xf32, #tpu.memory_space<vmem>>, vector<2x32xf32>,
    %c0_137 = arith.constant 0 : index
    %c0_138 = arith.constant 0 : index
    %473 = vector.load %arg24[%c0_137, %c0_138] : memref<16x96xf32, #tpu.memory_space<vmem>>, vector<2x96xf32>
    %cst_139 = arith.constant dense<0.000000e+00> : vector<2x96xf32>
    %474 = tpu.matmul %441, %14, %cst_139 {dimension_numbers = #tpu.dot_dimension_numbers<[1], [0], [0], [1], [0, 0, 1, 1], [], []>} : vector<2x32xf32>, vector<32x96xf32>, vector<2x96xf32> -> vector<2x96xf32>
    %475 = vector.extract_strided_slice %473 {offsets = [0, 0], sizes = [2, 32], strides = [1, 1]} : vector<2x96xf32> to vector<2x32xf32>
    %476 = vector.extract_strided_slice %474 {offsets = [0, 0], sizes = [2, 32], strides = [1, 1]} : vector<2x96xf32> to vector<2x32xf32>
    %477 = arith.addf %475, %476 : vector<2x32xf32>
    %478 = arith.negf %477 : vector<2x32xf32>
    %479 = math.exp %478 : vector<2x32xf32>
    %cst_140 = arith.constant 1.000000e+00 : f32
    %480 = vector.broadcast %cst_140 : f32 to vector<2x32xf32>
    %481 = arith.addf %480, %479 : vector<2x32xf32>
    %482 = arith.divf %480, %481 : vector<2x32xf32>
    %483 = vector.extract_strided_slice %473 {offsets = [0, 32], sizes = [2, 32], strides = [1, 1]} : vector<2x96xf32> to vector<2x32xf32>
    %484 = vector.extract_strided_slice %474 {offsets = [0, 32], sizes = [2, 32], strides = [1, 1]} : vector<2x96xf32> to vector<2x32xf32>
    %485 = arith.addf %483, %484 : vector<2x32xf32>
    %486 = arith.negf %485 : vector<2x32xf32>
    %487 = math.exp %486 : vector<2x32xf32>
    %cst_141 = arith.constant 1.000000e+00 : f32
    %488 = vector.broadcast %cst_141 : f32 to vector<2x32xf32>
    %489 = arith.addf %488, %487 : vector<2x32xf32>
    %490 = arith.divf %488, %489 : vector<2x32xf32>
    %491 = vector.extract_strided_slice %473 {offsets = [0, 64], sizes = [2, 32], strides = [1, 1]} : vector<2x96xf32> to vector<2x32xf32>
    %492 = vector.extract_strided_slice %474 {offsets = [0, 64], sizes = [2, 32], strides = [1, 1]} : vector<2x96xf32> to vector<2x32xf32>
    %493 = arith.addf %492, %20 : vector<2x32xf32>
    %494 = arith.mulf %482, %493 : vector<2x32xf32>
    %495 = arith.addf %491, %494 : vector<2x32xf32>
    %496 = math.tanh %495 : vector<2x32xf32>
    %cst_142 = arith.constant 1.000000e+00 : f32
    %497 = vector.broadcast %cst_142 : f32 to vector<2x32xf32>
    %498 = arith.subf %497, %490 : vector<2x32xf32>
    %499 = arith.mulf %498, %496 : vector<2x32xf32>
    %500 = arith.mulf %490, %441 : vector<2x32xf32>
    %501 = arith.addf %499, %500 : vector<2x32xf32>
    %c0_143 = arith.constant 0 : index
    %c0_144 = arith.constant 0 : index
    %502 = vector.load %arg28[%c0_143, %c0_144] : memref<16x32xf32, #tpu.memory_space<vmem>>, vector<2x32xf32>
    tpu.vector_store %arg28[%c0_143, %c0_144], %501 {strides = array<i32>} : memref<16x32xf32, #tpu.memory_space<vmem>>, vector<2x32xf32>,
    %c0_145 = arith.constant 0 : index
    %c0_146 = arith.constant 0 : index
    %503 = vector.load %arg27[%c0_145, %c0_146] : memref<16x32xf32, #tpu.memory_space<vmem>>, vector<16x32xf32>
    %c0_147 = arith.constant 0 : index
    %c0_148 = arith.constant 0 : index
    %504 = vector.load %arg28[%c0_147, %c0_148] : memref<16x32xf32, #tpu.memory_space<vmem>>, vector<16x32xf32>
    %c0_149 = arith.constant 0 : index
    %c0_150 = arith.constant 0 : index
    %505 = vector.load %arg9[%c0_149, %c0_150] : memref<32x96xf32, #tpu.memory_space<vmem>>, vector<32x96xf32>
    %cst_151 = arith.constant dense<0.000000e+00> : vector<16x96xf32>
    %506 = tpu.matmul %503, %505, %cst_151 {dimension_numbers = #tpu.dot_dimension_numbers<[1], [0], [0], [1], [0, 0, 1, 1], [], []>} : vector<16x32xf32>, vector<32x96xf32>, vector<16x96xf32> -> vector<16x96xf32>
    %c0_152 = arith.constant 0 : index
    %c0_153 = arith.constant 0 : index
    %507 = vector.load %arg10[%c0_152, %c0_153] : memref<32x96xf32, #tpu.memory_space<vmem>>, vector<32x96xf32>
    %cst_154 = arith.constant dense<0.000000e+00> : vector<16x96xf32>
    %508 = tpu.matmul %504, %507, %cst_154 {dimension_numbers = #tpu.dot_dimension_numbers<[1], [0], [0], [1], [0, 0, 1, 1], [], []>} : vector<16x32xf32>, vector<32x96xf32>, vector<16x96xf32> -> vector<16x96xf32>
    %509 = arith.addf %506, %508 : vector<16x96xf32>
    %c0_155 = arith.constant 0 : index
    %c0_156 = arith.constant 0 : index
    %510 = vector.load %arg12[%c0_155, %c0_156] : memref<1x96xf32, #tpu.memory_space<vmem>>, vector<1x96xf32>
    %511 = vector.broadcast %510 : vector<1x96xf32> to vector<16x96xf32>
    %512 = arith.addf %509, %511 : vector<16x96xf32>
    %c0_157 = arith.constant 0 : index
    %c0_158 = arith.constant 0 : index
    %513 = vector.load %arg25[%c0_157, %c0_158] : memref<16x96xf32, #tpu.memory_space<vmem>>, vector<16x96xf32>
    tpu.vector_store %arg25[%c0_157, %c0_158], %512 {strides = array<i32>} : memref<16x96xf32, #tpu.memory_space<vmem>>, vector<16x96xf32>,
    %c0_159 = arith.constant 0 : index
    %c0_160 = arith.constant 0 : index
    %514 = vector.load %arg14[%c0_159, %c0_160] : memref<32x96xf32, #tpu.memory_space<vmem>>, vector<32x96xf32>
    %cst_161 = arith.constant dense<0.000000e+00> : vector<16x96xf32>
    %515 = tpu.matmul %503, %514, %cst_161 {dimension_numbers = #tpu.dot_dimension_numbers<[1], [0], [0], [1], [0, 0, 1, 1], [], []>} : vector<16x32xf32>, vector<32x96xf32>, vector<16x96xf32> -> vector<16x96xf32>
    %c0_162 = arith.constant 0 : index
    %c0_163 = arith.constant 0 : index
    %516 = vector.load %arg15[%c0_162, %c0_163] : memref<32x96xf32, #tpu.memory_space<vmem>>, vector<32x96xf32>
    %cst_164 = arith.constant dense<0.000000e+00> : vector<16x96xf32>
    %517 = tpu.matmul %504, %516, %cst_164 {dimension_numbers = #tpu.dot_dimension_numbers<[1], [0], [0], [1], [0, 0, 1, 1], [], []>} : vector<16x32xf32>, vector<32x96xf32>, vector<16x96xf32> -> vector<16x96xf32>
    %518 = arith.addf %515, %517 : vector<16x96xf32>
    %c0_165 = arith.constant 0 : index
    %c0_166 = arith.constant 0 : index
    %519 = vector.load %arg17[%c0_165, %c0_166] : memref<1x96xf32, #tpu.memory_space<vmem>>, vector<1x96xf32>
    %520 = vector.broadcast %519 : vector<1x96xf32> to vector<16x96xf32>
    %521 = arith.addf %518, %520 : vector<16x96xf32>
    %c0_167 = arith.constant 0 : index
    %c0_168 = arith.constant 0 : index
    %522 = vector.load %arg26[%c0_167, %c0_168] : memref<16x96xf32, #tpu.memory_space<vmem>>, vector<16x96xf32>
    tpu.vector_store %arg26[%c0_167, %c0_168], %521 {strides = array<i32>} : memref<16x96xf32, #tpu.memory_space<vmem>>, vector<16x96xf32>,
    %c0_169 = arith.constant 0 : index
    %c0_170 = arith.constant 0 : index
    %523 = vector.load %arg11[%c0_169, %c0_170] : memref<32x96xf32, #tpu.memory_space<vmem>>, vector<32x96xf32>
    %c0_171 = arith.constant 0 : index
    %c0_172 = arith.constant 0 : index
    %524 = vector.load %arg16[%c0_171, %c0_172] : memref<32x96xf32, #tpu.memory_space<vmem>>, vector<32x96xf32>
    %c0_173 = arith.constant 0 : index
    %c0_174 = arith.constant 0 : index
    %525 = vector.load %arg13[%c0_173, %c0_174] : memref<1x32xf32, #tpu.memory_space<vmem>>, vector<1x32xf32>
    %526 = vector.shape_cast %525 : vector<1x32xf32> to vector<1x32xf32>
    %527 = vector.broadcast %526 : vector<1x32xf32> to vector<2x32xf32>
    %c0_175 = arith.constant 0 : index
    %c0_176 = arith.constant 0 : index
    %528 = vector.load %arg18[%c0_175, %c0_176] : memref<1x32xf32, #tpu.memory_space<vmem>>, vector<1x32xf32>
    %529 = vector.shape_cast %528 : vector<1x32xf32> to vector<1x32xf32>
    %530 = vector.broadcast %529 : vector<1x32xf32> to vector<2x32xf32>
    %cst_177 = arith.constant 0.000000e+00 : f32
    %531 = vector.broadcast %cst_177 : f32 to vector<2x32xf32>
    %cst_178 = arith.constant 0.000000e+00 : f32
    %532 = vector.broadcast %cst_178 : f32 to vector<2x32xf32>
    %c0_179 = arith.constant 0 : index
    %c0_180 = arith.constant 0 : index
    %533 = vector.load %arg25[%c0_179, %c0_180] : memref<16x96xf32, #tpu.memory_space<vmem>>, vector<2x96xf32>
    %cst_181 = arith.constant dense<0.000000e+00> : vector<2x96xf32>
    %534 = tpu.matmul %531, %523, %cst_181 {dimension_numbers = #tpu.dot_dimension_numbers<[1], [0], [0], [1], [0, 0, 1, 1], [], []>} : vector<2x32xf32>, vector<32x96xf32>, vector<2x96xf32> -> vector<2x96xf32>
    %535 = vector.extract_strided_slice %533 {offsets = [0, 0], sizes = [2, 32], strides = [1, 1]} : vector<2x96xf32> to vector<2x32xf32>
    %536 = vector.extract_strided_slice %534 {offsets = [0, 0], sizes = [2, 32], strides = [1, 1]} : vector<2x96xf32> to vector<2x32xf32>
    %537 = arith.addf %535, %536 : vector<2x32xf32>
    %538 = arith.negf %537 : vector<2x32xf32>
    %539 = math.exp %538 : vector<2x32xf32>
    %cst_182 = arith.constant 1.000000e+00 : f32
    %540 = vector.broadcast %cst_182 : f32 to vector<2x32xf32>
    %541 = arith.addf %540, %539 : vector<2x32xf32>
    %542 = arith.divf %540, %541 : vector<2x32xf32>
    %543 = vector.extract_strided_slice %533 {offsets = [0, 32], sizes = [2, 32], strides = [1, 1]} : vector<2x96xf32> to vector<2x32xf32>
    %544 = vector.extract_strided_slice %534 {offsets = [0, 32], sizes = [2, 32], strides = [1, 1]} : vector<2x96xf32> to vector<2x32xf32>
    %545 = arith.addf %543, %544 : vector<2x32xf32>
    %546 = arith.negf %545 : vector<2x32xf32>
    %547 = math.exp %546 : vector<2x32xf32>
    %cst_183 = arith.constant 1.000000e+00 : f32
    %548 = vector.broadcast %cst_183 : f32 to vector<2x32xf32>
    %549 = arith.addf %548, %547 : vector<2x32xf32>
    %550 = arith.divf %548, %549 : vector<2x32xf32>
    %551 = vector.extract_strided_slice %533 {offsets = [0, 64], sizes = [2, 32], strides = [1, 1]} : vector<2x96xf32> to vector<2x32xf32>
    %552 = vector.extract_strided_slice %534 {offsets = [0, 64], sizes = [2, 32], strides = [1, 1]} : vector<2x96xf32> to vector<2x32xf32>
    %553 = arith.addf %552, %527 : vector<2x32xf32>
    %554 = arith.mulf %542, %553 : vector<2x32xf32>
    %555 = arith.addf %551, %554 : vector<2x32xf32>
    %556 = math.tanh %555 : vector<2x32xf32>
    %cst_184 = arith.constant 1.000000e+00 : f32
    %557 = vector.broadcast %cst_184 : f32 to vector<2x32xf32>
    %558 = arith.subf %557, %550 : vector<2x32xf32>
    %559 = arith.mulf %558, %556 : vector<2x32xf32>
    %560 = arith.mulf %550, %531 : vector<2x32xf32>
    %561 = arith.addf %559, %560 : vector<2x32xf32>
    %c0_185 = arith.constant 0 : index
    %c0_186 = arith.constant 0 : index
    %562 = vector.load %arg29[%c0_185, %c0_186] : memref<16x32xf32, #tpu.memory_space<vmem>>, vector<2x32xf32>
    tpu.vector_store %arg29[%c0_185, %c0_186], %561 {strides = array<i32>} : memref<16x32xf32, #tpu.memory_space<vmem>>, vector<2x32xf32>,
    %c14_187 = arith.constant 14 : index
    %c0_188 = arith.constant 0 : index
    %563 = vector.load %arg26[%c14_187, %c0_188] : memref<16x96xf32, #tpu.memory_space<vmem>>, vector<2x96xf32>
    %cst_189 = arith.constant dense<0.000000e+00> : vector<2x96xf32>
    %564 = tpu.matmul %532, %524, %cst_189 {dimension_numbers = #tpu.dot_dimension_numbers<[1], [0], [0], [1], [0, 0, 1, 1], [], []>} : vector<2x32xf32>, vector<32x96xf32>, vector<2x96xf32> -> vector<2x96xf32>
    %565 = vector.extract_strided_slice %563 {offsets = [0, 0], sizes = [2, 32], strides = [1, 1]} : vector<2x96xf32> to vector<2x32xf32>
    %566 = vector.extract_strided_slice %564 {offsets = [0, 0], sizes = [2, 32], strides = [1, 1]} : vector<2x96xf32> to vector<2x32xf32>
    %567 = arith.addf %565, %566 : vector<2x32xf32>
    %568 = arith.negf %567 : vector<2x32xf32>
    %569 = math.exp %568 : vector<2x32xf32>
    %cst_190 = arith.constant 1.000000e+00 : f32
    %570 = vector.broadcast %cst_190 : f32 to vector<2x32xf32>
    %571 = arith.addf %570, %569 : vector<2x32xf32>
    %572 = arith.divf %570, %571 : vector<2x32xf32>
    %573 = vector.extract_strided_slice %563 {offsets = [0, 32], sizes = [2, 32], strides = [1, 1]} : vector<2x96xf32> to vector<2x32xf32>
    %574 = vector.extract_strided_slice %564 {offsets = [0, 32], sizes = [2, 32], strides = [1, 1]} : vector<2x96xf32> to vector<2x32xf32>
    %575 = arith.addf %573, %574 : vector<2x32xf32>
    %576 = arith.negf %575 : vector<2x32xf32>
    %577 = math.exp %576 : vector<2x32xf32>
    %cst_191 = arith.constant 1.000000e+00 : f32
    %578 = vector.broadcast %cst_191 : f32 to vector<2x32xf32>
    %579 = arith.addf %578, %577 : vector<2x32xf32>
    %580 = arith.divf %578, %579 : vector<2x32xf32>
    %581 = vector.extract_strided_slice %563 {offsets = [0, 64], sizes = [2, 32], strides = [1, 1]} : vector<2x96xf32> to vector<2x32xf32>
    %582 = vector.extract_strided_slice %564 {offsets = [0, 64], sizes = [2, 32], strides = [1, 1]} : vector<2x96xf32> to vector<2x32xf32>
    %583 = arith.addf %582, %530 : vector<2x32xf32>
    %584 = arith.mulf %572, %583 : vector<2x32xf32>
    %585 = arith.addf %581, %584 : vector<2x32xf32>
    %586 = math.tanh %585 : vector<2x32xf32>
    %cst_192 = arith.constant 1.000000e+00 : f32
    %587 = vector.broadcast %cst_192 : f32 to vector<2x32xf32>
    %588 = arith.subf %587, %580 : vector<2x32xf32>
    %589 = arith.mulf %588, %586 : vector<2x32xf32>
    %590 = arith.mulf %580, %532 : vector<2x32xf32>
    %591 = arith.addf %589, %590 : vector<2x32xf32>
    %c14_193 = arith.constant 14 : index
    %c0_194 = arith.constant 0 : index
    %592 = vector.load %arg30[%c14_193, %c0_194] : memref<16x32xf32, #tpu.memory_space<vmem>>, vector<2x32xf32>
    tpu.vector_store %arg30[%c14_193, %c0_194], %591 {strides = array<i32>} : memref<16x32xf32, #tpu.memory_space<vmem>>, vector<2x32xf32>,
    %c2_195 = arith.constant 2 : index
    %c0_196 = arith.constant 0 : index
    %593 = vector.load %arg25[%c2_195, %c0_196] : memref<16x96xf32, #tpu.memory_space<vmem>>, vector<2x96xf32>
    %cst_197 = arith.constant dense<0.000000e+00> : vector<2x96xf32>
    %594 = tpu.matmul %561, %523, %cst_197 {dimension_numbers = #tpu.dot_dimension_numbers<[1], [0], [0], [1], [0, 0, 1, 1], [], []>} : vector<2x32xf32>, vector<32x96xf32>, vector<2x96xf32> -> vector<2x96xf32>
    %595 = vector.extract_strided_slice %593 {offsets = [0, 0], sizes = [2, 32], strides = [1, 1]} : vector<2x96xf32> to vector<2x32xf32>
    %596 = vector.extract_strided_slice %594 {offsets = [0, 0], sizes = [2, 32], strides = [1, 1]} : vector<2x96xf32> to vector<2x32xf32>
    %597 = arith.addf %595, %596 : vector<2x32xf32>
    %598 = arith.negf %597 : vector<2x32xf32>
    %599 = math.exp %598 : vector<2x32xf32>
    %cst_198 = arith.constant 1.000000e+00 : f32
    %600 = vector.broadcast %cst_198 : f32 to vector<2x32xf32>
    %601 = arith.addf %600, %599 : vector<2x32xf32>
    %602 = arith.divf %600, %601 : vector<2x32xf32>
    %603 = vector.extract_strided_slice %593 {offsets = [0, 32], sizes = [2, 32], strides = [1, 1]} : vector<2x96xf32> to vector<2x32xf32>
    %604 = vector.extract_strided_slice %594 {offsets = [0, 32], sizes = [2, 32], strides = [1, 1]} : vector<2x96xf32> to vector<2x32xf32>
    %605 = arith.addf %603, %604 : vector<2x32xf32>
    %606 = arith.negf %605 : vector<2x32xf32>
    %607 = math.exp %606 : vector<2x32xf32>
    %cst_199 = arith.constant 1.000000e+00 : f32
    %608 = vector.broadcast %cst_199 : f32 to vector<2x32xf32>
    %609 = arith.addf %608, %607 : vector<2x32xf32>
    %610 = arith.divf %608, %609 : vector<2x32xf32>
    %611 = vector.extract_strided_slice %593 {offsets = [0, 64], sizes = [2, 32], strides = [1, 1]} : vector<2x96xf32> to vector<2x32xf32>
    %612 = vector.extract_strided_slice %594 {offsets = [0, 64], sizes = [2, 32], strides = [1, 1]} : vector<2x96xf32> to vector<2x32xf32>
    %613 = arith.addf %612, %527 : vector<2x32xf32>
    %614 = arith.mulf %602, %613 : vector<2x32xf32>
    %615 = arith.addf %611, %614 : vector<2x32xf32>
    %616 = math.tanh %615 : vector<2x32xf32>
    %cst_200 = arith.constant 1.000000e+00 : f32
    %617 = vector.broadcast %cst_200 : f32 to vector<2x32xf32>
    %618 = arith.subf %617, %610 : vector<2x32xf32>
    %619 = arith.mulf %618, %616 : vector<2x32xf32>
    %620 = arith.mulf %610, %561 : vector<2x32xf32>
    %621 = arith.addf %619, %620 : vector<2x32xf32>
    %c2_201 = arith.constant 2 : index
    %c0_202 = arith.constant 0 : index
    %622 = vector.load %arg29[%c2_201, %c0_202] : memref<16x32xf32, #tpu.memory_space<vmem>>, vector<2x32xf32>
    tpu.vector_store %arg29[%c2_201, %c0_202], %621 {strides = array<i32>} : memref<16x32xf32, #tpu.memory_space<vmem>>, vector<2x32xf32>,
    %c12_203 = arith.constant 12 : index
    %c0_204 = arith.constant 0 : index
    %623 = vector.load %arg26[%c12_203, %c0_204] : memref<16x96xf32, #tpu.memory_space<vmem>>, vector<2x96xf32>
    %cst_205 = arith.constant dense<0.000000e+00> : vector<2x96xf32>
    %624 = tpu.matmul %591, %524, %cst_205 {dimension_numbers = #tpu.dot_dimension_numbers<[1], [0], [0], [1], [0, 0, 1, 1], [], []>} : vector<2x32xf32>, vector<32x96xf32>, vector<2x96xf32> -> vector<2x96xf32>
    %625 = vector.extract_strided_slice %623 {offsets = [0, 0], sizes = [2, 32], strides = [1, 1]} : vector<2x96xf32> to vector<2x32xf32>
    %626 = vector.extract_strided_slice %624 {offsets = [0, 0], sizes = [2, 32], strides = [1, 1]} : vector<2x96xf32> to vector<2x32xf32>
    %627 = arith.addf %625, %626 : vector<2x32xf32>
    %628 = arith.negf %627 : vector<2x32xf32>
    %629 = math.exp %628 : vector<2x32xf32>
    %cst_206 = arith.constant 1.000000e+00 : f32
    %630 = vector.broadcast %cst_206 : f32 to vector<2x32xf32>
    %631 = arith.addf %630, %629 : vector<2x32xf32>
    %632 = arith.divf %630, %631 : vector<2x32xf32>
    %633 = vector.extract_strided_slice %623 {offsets = [0, 32], sizes = [2, 32], strides = [1, 1]} : vector<2x96xf32> to vector<2x32xf32>
    %634 = vector.extract_strided_slice %624 {offsets = [0, 32], sizes = [2, 32], strides = [1, 1]} : vector<2x96xf32> to vector<2x32xf32>
    %635 = arith.addf %633, %634 : vector<2x32xf32>
    %636 = arith.negf %635 : vector<2x32xf32>
    %637 = math.exp %636 : vector<2x32xf32>
    %cst_207 = arith.constant 1.000000e+00 : f32
    %638 = vector.broadcast %cst_207 : f32 to vector<2x32xf32>
    %639 = arith.addf %638, %637 : vector<2x32xf32>
    %640 = arith.divf %638, %639 : vector<2x32xf32>
    %641 = vector.extract_strided_slice %623 {offsets = [0, 64], sizes = [2, 32], strides = [1, 1]} : vector<2x96xf32> to vector<2x32xf32>
    %642 = vector.extract_strided_slice %624 {offsets = [0, 64], sizes = [2, 32], strides = [1, 1]} : vector<2x96xf32> to vector<2x32xf32>
    %643 = arith.addf %642, %530 : vector<2x32xf32>
    %644 = arith.mulf %632, %643 : vector<2x32xf32>
    %645 = arith.addf %641, %644 : vector<2x32xf32>
    %646 = math.tanh %645 : vector<2x32xf32>
    %cst_208 = arith.constant 1.000000e+00 : f32
    %647 = vector.broadcast %cst_208 : f32 to vector<2x32xf32>
    %648 = arith.subf %647, %640 : vector<2x32xf32>
    %649 = arith.mulf %648, %646 : vector<2x32xf32>
    %650 = arith.mulf %640, %591 : vector<2x32xf32>
    %651 = arith.addf %649, %650 : vector<2x32xf32>
    %c12_209 = arith.constant 12 : index
    %c0_210 = arith.constant 0 : index
    %652 = vector.load %arg30[%c12_209, %c0_210] : memref<16x32xf32, #tpu.memory_space<vmem>>, vector<2x32xf32>
    tpu.vector_store %arg30[%c12_209, %c0_210], %651 {strides = array<i32>} : memref<16x32xf32, #tpu.memory_space<vmem>>, vector<2x32xf32>,
    %c4_211 = arith.constant 4 : index
    %c0_212 = arith.constant 0 : index
    %653 = vector.load %arg25[%c4_211, %c0_212] : memref<16x96xf32, #tpu.memory_space<vmem>>, vector<2x96xf32>
    %cst_213 = arith.constant dense<0.000000e+00> : vector<2x96xf32>
    %654 = tpu.matmul %621, %523, %cst_213 {dimension_numbers = #tpu.dot_dimension_numbers<[1], [0], [0], [1], [0, 0, 1, 1], [], []>} : vector<2x32xf32>, vector<32x96xf32>, vector<2x96xf32> -> vector<2x96xf32>
    %655 = vector.extract_strided_slice %653 {offsets = [0, 0], sizes = [2, 32], strides = [1, 1]} : vector<2x96xf32> to vector<2x32xf32>
    %656 = vector.extract_strided_slice %654 {offsets = [0, 0], sizes = [2, 32], strides = [1, 1]} : vector<2x96xf32> to vector<2x32xf32>
    %657 = arith.addf %655, %656 : vector<2x32xf32>
    %658 = arith.negf %657 : vector<2x32xf32>
    %659 = math.exp %658 : vector<2x32xf32>
    %cst_214 = arith.constant 1.000000e+00 : f32
    %660 = vector.broadcast %cst_214 : f32 to vector<2x32xf32>
    %661 = arith.addf %660, %659 : vector<2x32xf32>
    %662 = arith.divf %660, %661 : vector<2x32xf32>
    %663 = vector.extract_strided_slice %653 {offsets = [0, 32], sizes = [2, 32], strides = [1, 1]} : vector<2x96xf32> to vector<2x32xf32>
    %664 = vector.extract_strided_slice %654 {offsets = [0, 32], sizes = [2, 32], strides = [1, 1]} : vector<2x96xf32> to vector<2x32xf32>
    %665 = arith.addf %663, %664 : vector<2x32xf32>
    %666 = arith.negf %665 : vector<2x32xf32>
    %667 = math.exp %666 : vector<2x32xf32>
    %cst_215 = arith.constant 1.000000e+00 : f32
    %668 = vector.broadcast %cst_215 : f32 to vector<2x32xf32>
    %669 = arith.addf %668, %667 : vector<2x32xf32>
    %670 = arith.divf %668, %669 : vector<2x32xf32>
    %671 = vector.extract_strided_slice %653 {offsets = [0, 64], sizes = [2, 32], strides = [1, 1]} : vector<2x96xf32> to vector<2x32xf32>
    %672 = vector.extract_strided_slice %654 {offsets = [0, 64], sizes = [2, 32], strides = [1, 1]} : vector<2x96xf32> to vector<2x32xf32>
    %673 = arith.addf %672, %527 : vector<2x32xf32>
    %674 = arith.mulf %662, %673 : vector<2x32xf32>
    %675 = arith.addf %671, %674 : vector<2x32xf32>
    %676 = math.tanh %675 : vector<2x32xf32>
    %cst_216 = arith.constant 1.000000e+00 : f32
    %677 = vector.broadcast %cst_216 : f32 to vector<2x32xf32>
    %678 = arith.subf %677, %670 : vector<2x32xf32>
    %679 = arith.mulf %678, %676 : vector<2x32xf32>
    %680 = arith.mulf %670, %621 : vector<2x32xf32>
    %681 = arith.addf %679, %680 : vector<2x32xf32>
    %c4_217 = arith.constant 4 : index
    %c0_218 = arith.constant 0 : index
    %682 = vector.load %arg29[%c4_217, %c0_218] : memref<16x32xf32, #tpu.memory_space<vmem>>, vector<2x32xf32>
    tpu.vector_store %arg29[%c4_217, %c0_218], %681 {strides = array<i32>} : memref<16x32xf32, #tpu.memory_space<vmem>>, vector<2x32xf32>,
    %c10_219 = arith.constant 10 : index
    %c0_220 = arith.constant 0 : index
    %683 = vector.load %arg26[%c10_219, %c0_220] : memref<16x96xf32, #tpu.memory_space<vmem>>, vector<2x96xf32>
    %cst_221 = arith.constant dense<0.000000e+00> : vector<2x96xf32>
    %684 = tpu.matmul %651, %524, %cst_221 {dimension_numbers = #tpu.dot_dimension_numbers<[1], [0], [0], [1], [0, 0, 1, 1], [], []>} : vector<2x32xf32>, vector<32x96xf32>, vector<2x96xf32> -> vector<2x96xf32>
    %685 = vector.extract_strided_slice %683 {offsets = [0, 0], sizes = [2, 32], strides = [1, 1]} : vector<2x96xf32> to vector<2x32xf32>
    %686 = vector.extract_strided_slice %684 {offsets = [0, 0], sizes = [2, 32], strides = [1, 1]} : vector<2x96xf32> to vector<2x32xf32>
    %687 = arith.addf %685, %686 : vector<2x32xf32>
    %688 = arith.negf %687 : vector<2x32xf32>
    %689 = math.exp %688 : vector<2x32xf32>
    %cst_222 = arith.constant 1.000000e+00 : f32
    %690 = vector.broadcast %cst_222 : f32 to vector<2x32xf32>
    %691 = arith.addf %690, %689 : vector<2x32xf32>
    %692 = arith.divf %690, %691 : vector<2x32xf32>
    %693 = vector.extract_strided_slice %683 {offsets = [0, 32], sizes = [2, 32], strides = [1, 1]} : vector<2x96xf32> to vector<2x32xf32>
    %694 = vector.extract_strided_slice %684 {offsets = [0, 32], sizes = [2, 32], strides = [1, 1]} : vector<2x96xf32> to vector<2x32xf32>
    %695 = arith.addf %693, %694 : vector<2x32xf32>
    %696 = arith.negf %695 : vector<2x32xf32>
    %697 = math.exp %696 : vector<2x32xf32>
    %cst_223 = arith.constant 1.000000e+00 : f32
    %698 = vector.broadcast %cst_223 : f32 to vector<2x32xf32>
    %699 = arith.addf %698, %697 : vector<2x32xf32>
    %700 = arith.divf %698, %699 : vector<2x32xf32>
    %701 = vector.extract_strided_slice %683 {offsets = [0, 64], sizes = [2, 32], strides = [1, 1]} : vector<2x96xf32> to vector<2x32xf32>
    %702 = vector.extract_strided_slice %684 {offsets = [0, 64], sizes = [2, 32], strides = [1, 1]} : vector<2x96xf32> to vector<2x32xf32>
    %703 = arith.addf %702, %530 : vector<2x32xf32>
    %704 = arith.mulf %692, %703 : vector<2x32xf32>
    %705 = arith.addf %701, %704 : vector<2x32xf32>
    %706 = math.tanh %705 : vector<2x32xf32>
    %cst_224 = arith.constant 1.000000e+00 : f32
    %707 = vector.broadcast %cst_224 : f32 to vector<2x32xf32>
    %708 = arith.subf %707, %700 : vector<2x32xf32>
    %709 = arith.mulf %708, %706 : vector<2x32xf32>
    %710 = arith.mulf %700, %651 : vector<2x32xf32>
    %711 = arith.addf %709, %710 : vector<2x32xf32>
    %c10_225 = arith.constant 10 : index
    %c0_226 = arith.constant 0 : index
    %712 = vector.load %arg30[%c10_225, %c0_226] : memref<16x32xf32, #tpu.memory_space<vmem>>, vector<2x32xf32>
    tpu.vector_store %arg30[%c10_225, %c0_226], %711 {strides = array<i32>} : memref<16x32xf32, #tpu.memory_space<vmem>>, vector<2x32xf32>,
    %c6_227 = arith.constant 6 : index
    %c0_228 = arith.constant 0 : index
    %713 = vector.load %arg25[%c6_227, %c0_228] : memref<16x96xf32, #tpu.memory_space<vmem>>, vector<2x96xf32>
    %cst_229 = arith.constant dense<0.000000e+00> : vector<2x96xf32>
    %714 = tpu.matmul %681, %523, %cst_229 {dimension_numbers = #tpu.dot_dimension_numbers<[1], [0], [0], [1], [0, 0, 1, 1], [], []>} : vector<2x32xf32>, vector<32x96xf32>, vector<2x96xf32> -> vector<2x96xf32>
    %715 = vector.extract_strided_slice %713 {offsets = [0, 0], sizes = [2, 32], strides = [1, 1]} : vector<2x96xf32> to vector<2x32xf32>
    %716 = vector.extract_strided_slice %714 {offsets = [0, 0], sizes = [2, 32], strides = [1, 1]} : vector<2x96xf32> to vector<2x32xf32>
    %717 = arith.addf %715, %716 : vector<2x32xf32>
    %718 = arith.negf %717 : vector<2x32xf32>
    %719 = math.exp %718 : vector<2x32xf32>
    %cst_230 = arith.constant 1.000000e+00 : f32
    %720 = vector.broadcast %cst_230 : f32 to vector<2x32xf32>
    %721 = arith.addf %720, %719 : vector<2x32xf32>
    %722 = arith.divf %720, %721 : vector<2x32xf32>
    %723 = vector.extract_strided_slice %713 {offsets = [0, 32], sizes = [2, 32], strides = [1, 1]} : vector<2x96xf32> to vector<2x32xf32>
    %724 = vector.extract_strided_slice %714 {offsets = [0, 32], sizes = [2, 32], strides = [1, 1]} : vector<2x96xf32> to vector<2x32xf32>
    %725 = arith.addf %723, %724 : vector<2x32xf32>
    %726 = arith.negf %725 : vector<2x32xf32>
    %727 = math.exp %726 : vector<2x32xf32>
    %cst_231 = arith.constant 1.000000e+00 : f32
    %728 = vector.broadcast %cst_231 : f32 to vector<2x32xf32>
    %729 = arith.addf %728, %727 : vector<2x32xf32>
    %730 = arith.divf %728, %729 : vector<2x32xf32>
    %731 = vector.extract_strided_slice %713 {offsets = [0, 64], sizes = [2, 32], strides = [1, 1]} : vector<2x96xf32> to vector<2x32xf32>
    %732 = vector.extract_strided_slice %714 {offsets = [0, 64], sizes = [2, 32], strides = [1, 1]} : vector<2x96xf32> to vector<2x32xf32>
    %733 = arith.addf %732, %527 : vector<2x32xf32>
    %734 = arith.mulf %722, %733 : vector<2x32xf32>
    %735 = arith.addf %731, %734 : vector<2x32xf32>
    %736 = math.tanh %735 : vector<2x32xf32>
    %cst_232 = arith.constant 1.000000e+00 : f32
    %737 = vector.broadcast %cst_232 : f32 to vector<2x32xf32>
    %738 = arith.subf %737, %730 : vector<2x32xf32>
    %739 = arith.mulf %738, %736 : vector<2x32xf32>
    %740 = arith.mulf %730, %681 : vector<2x32xf32>
    %741 = arith.addf %739, %740 : vector<2x32xf32>
    %c6_233 = arith.constant 6 : index
    %c0_234 = arith.constant 0 : index
    %742 = vector.load %arg29[%c6_233, %c0_234] : memref<16x32xf32, #tpu.memory_space<vmem>>, vector<2x32xf32>
    tpu.vector_store %arg29[%c6_233, %c0_234], %741 {strides = array<i32>} : memref<16x32xf32, #tpu.memory_space<vmem>>, vector<2x32xf32>,
    %c8_235 = arith.constant 8 : index
    %c0_236 = arith.constant 0 : index
    %743 = vector.load %arg26[%c8_235, %c0_236] : memref<16x96xf32, #tpu.memory_space<vmem>>, vector<2x96xf32>
    %cst_237 = arith.constant dense<0.000000e+00> : vector<2x96xf32>
    %744 = tpu.matmul %711, %524, %cst_237 {dimension_numbers = #tpu.dot_dimension_numbers<[1], [0], [0], [1], [0, 0, 1, 1], [], []>} : vector<2x32xf32>, vector<32x96xf32>, vector<2x96xf32> -> vector<2x96xf32>
    %745 = vector.extract_strided_slice %743 {offsets = [0, 0], sizes = [2, 32], strides = [1, 1]} : vector<2x96xf32> to vector<2x32xf32>
    %746 = vector.extract_strided_slice %744 {offsets = [0, 0], sizes = [2, 32], strides = [1, 1]} : vector<2x96xf32> to vector<2x32xf32>
    %747 = arith.addf %745, %746 : vector<2x32xf32>
    %748 = arith.negf %747 : vector<2x32xf32>
    %749 = math.exp %748 : vector<2x32xf32>
    %cst_238 = arith.constant 1.000000e+00 : f32
    %750 = vector.broadcast %cst_238 : f32 to vector<2x32xf32>
    %751 = arith.addf %750, %749 : vector<2x32xf32>
    %752 = arith.divf %750, %751 : vector<2x32xf32>
    %753 = vector.extract_strided_slice %743 {offsets = [0, 32], sizes = [2, 32], strides = [1, 1]} : vector<2x96xf32> to vector<2x32xf32>
    %754 = vector.extract_strided_slice %744 {offsets = [0, 32], sizes = [2, 32], strides = [1, 1]} : vector<2x96xf32> to vector<2x32xf32>
    %755 = arith.addf %753, %754 : vector<2x32xf32>
    %756 = arith.negf %755 : vector<2x32xf32>
    %757 = math.exp %756 : vector<2x32xf32>
    %cst_239 = arith.constant 1.000000e+00 : f32
    %758 = vector.broadcast %cst_239 : f32 to vector<2x32xf32>
    %759 = arith.addf %758, %757 : vector<2x32xf32>
    %760 = arith.divf %758, %759 : vector<2x32xf32>
    %761 = vector.extract_strided_slice %743 {offsets = [0, 64], sizes = [2, 32], strides = [1, 1]} : vector<2x96xf32> to vector<2x32xf32>
    %762 = vector.extract_strided_slice %744 {offsets = [0, 64], sizes = [2, 32], strides = [1, 1]} : vector<2x96xf32> to vector<2x32xf32>
    %763 = arith.addf %762, %530 : vector<2x32xf32>
    %764 = arith.mulf %752, %763 : vector<2x32xf32>
    %765 = arith.addf %761, %764 : vector<2x32xf32>
    %766 = math.tanh %765 : vector<2x32xf32>
    %cst_240 = arith.constant 1.000000e+00 : f32
    %767 = vector.broadcast %cst_240 : f32 to vector<2x32xf32>
    %768 = arith.subf %767, %760 : vector<2x32xf32>
    %769 = arith.mulf %768, %766 : vector<2x32xf32>
    %770 = arith.mulf %760, %711 : vector<2x32xf32>
    %771 = arith.addf %769, %770 : vector<2x32xf32>
    %c8_241 = arith.constant 8 : index
    %c0_242 = arith.constant 0 : index
    %772 = vector.load %arg30[%c8_241, %c0_242] : memref<16x32xf32, #tpu.memory_space<vmem>>, vector<2x32xf32>
    tpu.vector_store %arg30[%c8_241, %c0_242], %771 {strides = array<i32>} : memref<16x32xf32, #tpu.memory_space<vmem>>, vector<2x32xf32>,
    %c8_243 = arith.constant 8 : index
    %c0_244 = arith.constant 0 : index
    %773 = vector.load %arg25[%c8_243, %c0_244] : memref<16x96xf32, #tpu.memory_space<vmem>>, vector<2x96xf32>
    %cst_245 = arith.constant dense<0.000000e+00> : vector<2x96xf32>
    %774 = tpu.matmul %741, %523, %cst_245 {dimension_numbers = #tpu.dot_dimension_numbers<[1], [0], [0], [1], [0, 0, 1, 1], [], []>} : vector<2x32xf32>, vector<32x96xf32>, vector<2x96xf32> -> vector<2x96xf32>
    %775 = vector.extract_strided_slice %773 {offsets = [0, 0], sizes = [2, 32], strides = [1, 1]} : vector<2x96xf32> to vector<2x32xf32>
    %776 = vector.extract_strided_slice %774 {offsets = [0, 0], sizes = [2, 32], strides = [1, 1]} : vector<2x96xf32> to vector<2x32xf32>
    %777 = arith.addf %775, %776 : vector<2x32xf32>
    %778 = arith.negf %777 : vector<2x32xf32>
    %779 = math.exp %778 : vector<2x32xf32>
    %cst_246 = arith.constant 1.000000e+00 : f32
    %780 = vector.broadcast %cst_246 : f32 to vector<2x32xf32>
    %781 = arith.addf %780, %779 : vector<2x32xf32>
    %782 = arith.divf %780, %781 : vector<2x32xf32>
    %783 = vector.extract_strided_slice %773 {offsets = [0, 32], sizes = [2, 32], strides = [1, 1]} : vector<2x96xf32> to vector<2x32xf32>
    %784 = vector.extract_strided_slice %774 {offsets = [0, 32], sizes = [2, 32], strides = [1, 1]} : vector<2x96xf32> to vector<2x32xf32>
    %785 = arith.addf %783, %784 : vector<2x32xf32>
    %786 = arith.negf %785 : vector<2x32xf32>
    %787 = math.exp %786 : vector<2x32xf32>
    %cst_247 = arith.constant 1.000000e+00 : f32
    %788 = vector.broadcast %cst_247 : f32 to vector<2x32xf32>
    %789 = arith.addf %788, %787 : vector<2x32xf32>
    %790 = arith.divf %788, %789 : vector<2x32xf32>
    %791 = vector.extract_strided_slice %773 {offsets = [0, 64], sizes = [2, 32], strides = [1, 1]} : vector<2x96xf32> to vector<2x32xf32>
    %792 = vector.extract_strided_slice %774 {offsets = [0, 64], sizes = [2, 32], strides = [1, 1]} : vector<2x96xf32> to vector<2x32xf32>
    %793 = arith.addf %792, %527 : vector<2x32xf32>
    %794 = arith.mulf %782, %793 : vector<2x32xf32>
    %795 = arith.addf %791, %794 : vector<2x32xf32>
    %796 = math.tanh %795 : vector<2x32xf32>
    %cst_248 = arith.constant 1.000000e+00 : f32
    %797 = vector.broadcast %cst_248 : f32 to vector<2x32xf32>
    %798 = arith.subf %797, %790 : vector<2x32xf32>
    %799 = arith.mulf %798, %796 : vector<2x32xf32>
    %800 = arith.mulf %790, %741 : vector<2x32xf32>
    %801 = arith.addf %799, %800 : vector<2x32xf32>
    %c8_249 = arith.constant 8 : index
    %c0_250 = arith.constant 0 : index
    %802 = vector.load %arg29[%c8_249, %c0_250] : memref<16x32xf32, #tpu.memory_space<vmem>>, vector<2x32xf32>
    tpu.vector_store %arg29[%c8_249, %c0_250], %801 {strides = array<i32>} : memref<16x32xf32, #tpu.memory_space<vmem>>, vector<2x32xf32>,
    %c6_251 = arith.constant 6 : index
    %c0_252 = arith.constant 0 : index
    %803 = vector.load %arg26[%c6_251, %c0_252] : memref<16x96xf32, #tpu.memory_space<vmem>>, vector<2x96xf32>
    %cst_253 = arith.constant dense<0.000000e+00> : vector<2x96xf32>
    %804 = tpu.matmul %771, %524, %cst_253 {dimension_numbers = #tpu.dot_dimension_numbers<[1], [0], [0], [1], [0, 0, 1, 1], [], []>} : vector<2x32xf32>, vector<32x96xf32>, vector<2x96xf32> -> vector<2x96xf32>
    %805 = vector.extract_strided_slice %803 {offsets = [0, 0], sizes = [2, 32], strides = [1, 1]} : vector<2x96xf32> to vector<2x32xf32>
    %806 = vector.extract_strided_slice %804 {offsets = [0, 0], sizes = [2, 32], strides = [1, 1]} : vector<2x96xf32> to vector<2x32xf32>
    %807 = arith.addf %805, %806 : vector<2x32xf32>
    %808 = arith.negf %807 : vector<2x32xf32>
    %809 = math.exp %808 : vector<2x32xf32>
    %cst_254 = arith.constant 1.000000e+00 : f32
    %810 = vector.broadcast %cst_254 : f32 to vector<2x32xf32>
    %811 = arith.addf %810, %809 : vector<2x32xf32>
    %812 = arith.divf %810, %811 : vector<2x32xf32>
    %813 = vector.extract_strided_slice %803 {offsets = [0, 32], sizes = [2, 32], strides = [1, 1]} : vector<2x96xf32> to vector<2x32xf32>
    %814 = vector.extract_strided_slice %804 {offsets = [0, 32], sizes = [2, 32], strides = [1, 1]} : vector<2x96xf32> to vector<2x32xf32>
    %815 = arith.addf %813, %814 : vector<2x32xf32>
    %816 = arith.negf %815 : vector<2x32xf32>
    %817 = math.exp %816 : vector<2x32xf32>
    %cst_255 = arith.constant 1.000000e+00 : f32
    %818 = vector.broadcast %cst_255 : f32 to vector<2x32xf32>
    %819 = arith.addf %818, %817 : vector<2x32xf32>
    %820 = arith.divf %818, %819 : vector<2x32xf32>
    %821 = vector.extract_strided_slice %803 {offsets = [0, 64], sizes = [2, 32], strides = [1, 1]} : vector<2x96xf32> to vector<2x32xf32>
    %822 = vector.extract_strided_slice %804 {offsets = [0, 64], sizes = [2, 32], strides = [1, 1]} : vector<2x96xf32> to vector<2x32xf32>
    %823 = arith.addf %822, %530 : vector<2x32xf32>
    %824 = arith.mulf %812, %823 : vector<2x32xf32>
    %825 = arith.addf %821, %824 : vector<2x32xf32>
    %826 = math.tanh %825 : vector<2x32xf32>
    %cst_256 = arith.constant 1.000000e+00 : f32
    %827 = vector.broadcast %cst_256 : f32 to vector<2x32xf32>
    %828 = arith.subf %827, %820 : vector<2x32xf32>
    %829 = arith.mulf %828, %826 : vector<2x32xf32>
    %830 = arith.mulf %820, %771 : vector<2x32xf32>
    %831 = arith.addf %829, %830 : vector<2x32xf32>
    %c6_257 = arith.constant 6 : index
    %c0_258 = arith.constant 0 : index
    %832 = vector.load %arg30[%c6_257, %c0_258] : memref<16x32xf32, #tpu.memory_space<vmem>>, vector<2x32xf32>
    tpu.vector_store %arg30[%c6_257, %c0_258], %831 {strides = array<i32>} : memref<16x32xf32, #tpu.memory_space<vmem>>, vector<2x32xf32>,
    %c10_259 = arith.constant 10 : index
    %c0_260 = arith.constant 0 : index
    %833 = vector.load %arg25[%c10_259, %c0_260] : memref<16x96xf32, #tpu.memory_space<vmem>>, vector<2x96xf32>
    %cst_261 = arith.constant dense<0.000000e+00> : vector<2x96xf32>
    %834 = tpu.matmul %801, %523, %cst_261 {dimension_numbers = #tpu.dot_dimension_numbers<[1], [0], [0], [1], [0, 0, 1, 1], [], []>} : vector<2x32xf32>, vector<32x96xf32>, vector<2x96xf32> -> vector<2x96xf32>
    %835 = vector.extract_strided_slice %833 {offsets = [0, 0], sizes = [2, 32], strides = [1, 1]} : vector<2x96xf32> to vector<2x32xf32>
    %836 = vector.extract_strided_slice %834 {offsets = [0, 0], sizes = [2, 32], strides = [1, 1]} : vector<2x96xf32> to vector<2x32xf32>
    %837 = arith.addf %835, %836 : vector<2x32xf32>
    %838 = arith.negf %837 : vector<2x32xf32>
    %839 = math.exp %838 : vector<2x32xf32>
    %cst_262 = arith.constant 1.000000e+00 : f32
    %840 = vector.broadcast %cst_262 : f32 to vector<2x32xf32>
    %841 = arith.addf %840, %839 : vector<2x32xf32>
    %842 = arith.divf %840, %841 : vector<2x32xf32>
    %843 = vector.extract_strided_slice %833 {offsets = [0, 32], sizes = [2, 32], strides = [1, 1]} : vector<2x96xf32> to vector<2x32xf32>
    %844 = vector.extract_strided_slice %834 {offsets = [0, 32], sizes = [2, 32], strides = [1, 1]} : vector<2x96xf32> to vector<2x32xf32>
    %845 = arith.addf %843, %844 : vector<2x32xf32>
    %846 = arith.negf %845 : vector<2x32xf32>
    %847 = math.exp %846 : vector<2x32xf32>
    %cst_263 = arith.constant 1.000000e+00 : f32
    %848 = vector.broadcast %cst_263 : f32 to vector<2x32xf32>
    %849 = arith.addf %848, %847 : vector<2x32xf32>
    %850 = arith.divf %848, %849 : vector<2x32xf32>
    %851 = vector.extract_strided_slice %833 {offsets = [0, 64], sizes = [2, 32], strides = [1, 1]} : vector<2x96xf32> to vector<2x32xf32>
    %852 = vector.extract_strided_slice %834 {offsets = [0, 64], sizes = [2, 32], strides = [1, 1]} : vector<2x96xf32> to vector<2x32xf32>
    %853 = arith.addf %852, %527 : vector<2x32xf32>
    %854 = arith.mulf %842, %853 : vector<2x32xf32>
    %855 = arith.addf %851, %854 : vector<2x32xf32>
    %856 = math.tanh %855 : vector<2x32xf32>
    %cst_264 = arith.constant 1.000000e+00 : f32
    %857 = vector.broadcast %cst_264 : f32 to vector<2x32xf32>
    %858 = arith.subf %857, %850 : vector<2x32xf32>
    %859 = arith.mulf %858, %856 : vector<2x32xf32>
    %860 = arith.mulf %850, %801 : vector<2x32xf32>
    %861 = arith.addf %859, %860 : vector<2x32xf32>
    %c10_265 = arith.constant 10 : index
    %c0_266 = arith.constant 0 : index
    %862 = vector.load %arg29[%c10_265, %c0_266] : memref<16x32xf32, #tpu.memory_space<vmem>>, vector<2x32xf32>
    tpu.vector_store %arg29[%c10_265, %c0_266], %861 {strides = array<i32>} : memref<16x32xf32, #tpu.memory_space<vmem>>, vector<2x32xf32>,
    %c4_267 = arith.constant 4 : index
    %c0_268 = arith.constant 0 : index
    %863 = vector.load %arg26[%c4_267, %c0_268] : memref<16x96xf32, #tpu.memory_space<vmem>>, vector<2x96xf32>
    %cst_269 = arith.constant dense<0.000000e+00> : vector<2x96xf32>
    %864 = tpu.matmul %831, %524, %cst_269 {dimension_numbers = #tpu.dot_dimension_numbers<[1], [0], [0], [1], [0, 0, 1, 1], [], []>} : vector<2x32xf32>, vector<32x96xf32>, vector<2x96xf32> -> vector<2x96xf32>
    %865 = vector.extract_strided_slice %863 {offsets = [0, 0], sizes = [2, 32], strides = [1, 1]} : vector<2x96xf32> to vector<2x32xf32>
    %866 = vector.extract_strided_slice %864 {offsets = [0, 0], sizes = [2, 32], strides = [1, 1]} : vector<2x96xf32> to vector<2x32xf32>
    %867 = arith.addf %865, %866 : vector<2x32xf32>
    %868 = arith.negf %867 : vector<2x32xf32>
    %869 = math.exp %868 : vector<2x32xf32>
    %cst_270 = arith.constant 1.000000e+00 : f32
    %870 = vector.broadcast %cst_270 : f32 to vector<2x32xf32>
    %871 = arith.addf %870, %869 : vector<2x32xf32>
    %872 = arith.divf %870, %871 : vector<2x32xf32>
    %873 = vector.extract_strided_slice %863 {offsets = [0, 32], sizes = [2, 32], strides = [1, 1]} : vector<2x96xf32> to vector<2x32xf32>
    %874 = vector.extract_strided_slice %864 {offsets = [0, 32], sizes = [2, 32], strides = [1, 1]} : vector<2x96xf32> to vector<2x32xf32>
    %875 = arith.addf %873, %874 : vector<2x32xf32>
    %876 = arith.negf %875 : vector<2x32xf32>
    %877 = math.exp %876 : vector<2x32xf32>
    %cst_271 = arith.constant 1.000000e+00 : f32
    %878 = vector.broadcast %cst_271 : f32 to vector<2x32xf32>
    %879 = arith.addf %878, %877 : vector<2x32xf32>
    %880 = arith.divf %878, %879 : vector<2x32xf32>
    %881 = vector.extract_strided_slice %863 {offsets = [0, 64], sizes = [2, 32], strides = [1, 1]} : vector<2x96xf32> to vector<2x32xf32>
    %882 = vector.extract_strided_slice %864 {offsets = [0, 64], sizes = [2, 32], strides = [1, 1]} : vector<2x96xf32> to vector<2x32xf32>
    %883 = arith.addf %882, %530 : vector<2x32xf32>
    %884 = arith.mulf %872, %883 : vector<2x32xf32>
    %885 = arith.addf %881, %884 : vector<2x32xf32>
    %886 = math.tanh %885 : vector<2x32xf32>
    %cst_272 = arith.constant 1.000000e+00 : f32
    %887 = vector.broadcast %cst_272 : f32 to vector<2x32xf32>
    %888 = arith.subf %887, %880 : vector<2x32xf32>
    %889 = arith.mulf %888, %886 : vector<2x32xf32>
    %890 = arith.mulf %880, %831 : vector<2x32xf32>
    %891 = arith.addf %889, %890 : vector<2x32xf32>
    %c4_273 = arith.constant 4 : index
    %c0_274 = arith.constant 0 : index
    %892 = vector.load %arg30[%c4_273, %c0_274] : memref<16x32xf32, #tpu.memory_space<vmem>>, vector<2x32xf32>
    tpu.vector_store %arg30[%c4_273, %c0_274], %891 {strides = array<i32>} : memref<16x32xf32, #tpu.memory_space<vmem>>, vector<2x32xf32>,
    %c12_275 = arith.constant 12 : index
    %c0_276 = arith.constant 0 : index
    %893 = vector.load %arg25[%c12_275, %c0_276] : memref<16x96xf32, #tpu.memory_space<vmem>>, vector<2x96xf32>
    %cst_277 = arith.constant dense<0.000000e+00> : vector<2x96xf32>
    %894 = tpu.matmul %861, %523, %cst_277 {dimension_numbers = #tpu.dot_dimension_numbers<[1], [0], [0], [1], [0, 0, 1, 1], [], []>} : vector<2x32xf32>, vector<32x96xf32>, vector<2x96xf32> -> vector<2x96xf32>
    %895 = vector.extract_strided_slice %893 {offsets = [0, 0], sizes = [2, 32], strides = [1, 1]} : vector<2x96xf32> to vector<2x32xf32>
    %896 = vector.extract_strided_slice %894 {offsets = [0, 0], sizes = [2, 32], strides = [1, 1]} : vector<2x96xf32> to vector<2x32xf32>
    %897 = arith.addf %895, %896 : vector<2x32xf32>
    %898 = arith.negf %897 : vector<2x32xf32>
    %899 = math.exp %898 : vector<2x32xf32>
    %cst_278 = arith.constant 1.000000e+00 : f32
    %900 = vector.broadcast %cst_278 : f32 to vector<2x32xf32>
    %901 = arith.addf %900, %899 : vector<2x32xf32>
    %902 = arith.divf %900, %901 : vector<2x32xf32>
    %903 = vector.extract_strided_slice %893 {offsets = [0, 32], sizes = [2, 32], strides = [1, 1]} : vector<2x96xf32> to vector<2x32xf32>
    %904 = vector.extract_strided_slice %894 {offsets = [0, 32], sizes = [2, 32], strides = [1, 1]} : vector<2x96xf32> to vector<2x32xf32>
    %905 = arith.addf %903, %904 : vector<2x32xf32>
    %906 = arith.negf %905 : vector<2x32xf32>
    %907 = math.exp %906 : vector<2x32xf32>
    %cst_279 = arith.constant 1.000000e+00 : f32
    %908 = vector.broadcast %cst_279 : f32 to vector<2x32xf32>
    %909 = arith.addf %908, %907 : vector<2x32xf32>
    %910 = arith.divf %908, %909 : vector<2x32xf32>
    %911 = vector.extract_strided_slice %893 {offsets = [0, 64], sizes = [2, 32], strides = [1, 1]} : vector<2x96xf32> to vector<2x32xf32>
    %912 = vector.extract_strided_slice %894 {offsets = [0, 64], sizes = [2, 32], strides = [1, 1]} : vector<2x96xf32> to vector<2x32xf32>
    %913 = arith.addf %912, %527 : vector<2x32xf32>
    %914 = arith.mulf %902, %913 : vector<2x32xf32>
    %915 = arith.addf %911, %914 : vector<2x32xf32>
    %916 = math.tanh %915 : vector<2x32xf32>
    %cst_280 = arith.constant 1.000000e+00 : f32
    %917 = vector.broadcast %cst_280 : f32 to vector<2x32xf32>
    %918 = arith.subf %917, %910 : vector<2x32xf32>
    %919 = arith.mulf %918, %916 : vector<2x32xf32>
    %920 = arith.mulf %910, %861 : vector<2x32xf32>
    %921 = arith.addf %919, %920 : vector<2x32xf32>
    %c12_281 = arith.constant 12 : index
    %c0_282 = arith.constant 0 : index
    %922 = vector.load %arg29[%c12_281, %c0_282] : memref<16x32xf32, #tpu.memory_space<vmem>>, vector<2x32xf32>
    tpu.vector_store %arg29[%c12_281, %c0_282], %921 {strides = array<i32>} : memref<16x32xf32, #tpu.memory_space<vmem>>, vector<2x32xf32>,
    %c2_283 = arith.constant 2 : index
    %c0_284 = arith.constant 0 : index
    %923 = vector.load %arg26[%c2_283, %c0_284] : memref<16x96xf32, #tpu.memory_space<vmem>>, vector<2x96xf32>
    %cst_285 = arith.constant dense<0.000000e+00> : vector<2x96xf32>
    %924 = tpu.matmul %891, %524, %cst_285 {dimension_numbers = #tpu.dot_dimension_numbers<[1], [0], [0], [1], [0, 0, 1, 1], [], []>} : vector<2x32xf32>, vector<32x96xf32>, vector<2x96xf32> -> vector<2x96xf32>
    %925 = vector.extract_strided_slice %923 {offsets = [0, 0], sizes = [2, 32], strides = [1, 1]} : vector<2x96xf32> to vector<2x32xf32>
    %926 = vector.extract_strided_slice %924 {offsets = [0, 0], sizes = [2, 32], strides = [1, 1]} : vector<2x96xf32> to vector<2x32xf32>
    %927 = arith.addf %925, %926 : vector<2x32xf32>
    %928 = arith.negf %927 : vector<2x32xf32>
    %929 = math.exp %928 : vector<2x32xf32>
    %cst_286 = arith.constant 1.000000e+00 : f32
    %930 = vector.broadcast %cst_286 : f32 to vector<2x32xf32>
    %931 = arith.addf %930, %929 : vector<2x32xf32>
    %932 = arith.divf %930, %931 : vector<2x32xf32>
    %933 = vector.extract_strided_slice %923 {offsets = [0, 32], sizes = [2, 32], strides = [1, 1]} : vector<2x96xf32> to vector<2x32xf32>
    %934 = vector.extract_strided_slice %924 {offsets = [0, 32], sizes = [2, 32], strides = [1, 1]} : vector<2x96xf32> to vector<2x32xf32>
    %935 = arith.addf %933, %934 : vector<2x32xf32>
    %936 = arith.negf %935 : vector<2x32xf32>
    %937 = math.exp %936 : vector<2x32xf32>
    %cst_287 = arith.constant 1.000000e+00 : f32
    %938 = vector.broadcast %cst_287 : f32 to vector<2x32xf32>
    %939 = arith.addf %938, %937 : vector<2x32xf32>
    %940 = arith.divf %938, %939 : vector<2x32xf32>
    %941 = vector.extract_strided_slice %923 {offsets = [0, 64], sizes = [2, 32], strides = [1, 1]} : vector<2x96xf32> to vector<2x32xf32>
    %942 = vector.extract_strided_slice %924 {offsets = [0, 64], sizes = [2, 32], strides = [1, 1]} : vector<2x96xf32> to vector<2x32xf32>
    %943 = arith.addf %942, %530 : vector<2x32xf32>
    %944 = arith.mulf %932, %943 : vector<2x32xf32>
    %945 = arith.addf %941, %944 : vector<2x32xf32>
    %946 = math.tanh %945 : vector<2x32xf32>
    %cst_288 = arith.constant 1.000000e+00 : f32
    %947 = vector.broadcast %cst_288 : f32 to vector<2x32xf32>
    %948 = arith.subf %947, %940 : vector<2x32xf32>
    %949 = arith.mulf %948, %946 : vector<2x32xf32>
    %950 = arith.mulf %940, %891 : vector<2x32xf32>
    %951 = arith.addf %949, %950 : vector<2x32xf32>
    %c2_289 = arith.constant 2 : index
    %c0_290 = arith.constant 0 : index
    %952 = vector.load %arg30[%c2_289, %c0_290] : memref<16x32xf32, #tpu.memory_space<vmem>>, vector<2x32xf32>
    tpu.vector_store %arg30[%c2_289, %c0_290], %951 {strides = array<i32>} : memref<16x32xf32, #tpu.memory_space<vmem>>, vector<2x32xf32>,
    %c14_291 = arith.constant 14 : index
    %c0_292 = arith.constant 0 : index
    %953 = vector.load %arg25[%c14_291, %c0_292] : memref<16x96xf32, #tpu.memory_space<vmem>>, vector<2x96xf32>
    %cst_293 = arith.constant dense<0.000000e+00> : vector<2x96xf32>
    %954 = tpu.matmul %921, %523, %cst_293 {dimension_numbers = #tpu.dot_dimension_numbers<[1], [0], [0], [1], [0, 0, 1, 1], [], []>} : vector<2x32xf32>, vector<32x96xf32>, vector<2x96xf32> -> vector<2x96xf32>
    %955 = vector.extract_strided_slice %953 {offsets = [0, 0], sizes = [2, 32], strides = [1, 1]} : vector<2x96xf32> to vector<2x32xf32>
    %956 = vector.extract_strided_slice %954 {offsets = [0, 0], sizes = [2, 32], strides = [1, 1]} : vector<2x96xf32> to vector<2x32xf32>
    %957 = arith.addf %955, %956 : vector<2x32xf32>
    %958 = arith.negf %957 : vector<2x32xf32>
    %959 = math.exp %958 : vector<2x32xf32>
    %cst_294 = arith.constant 1.000000e+00 : f32
    %960 = vector.broadcast %cst_294 : f32 to vector<2x32xf32>
    %961 = arith.addf %960, %959 : vector<2x32xf32>
    %962 = arith.divf %960, %961 : vector<2x32xf32>
    %963 = vector.extract_strided_slice %953 {offsets = [0, 32], sizes = [2, 32], strides = [1, 1]} : vector<2x96xf32> to vector<2x32xf32>
    %964 = vector.extract_strided_slice %954 {offsets = [0, 32], sizes = [2, 32], strides = [1, 1]} : vector<2x96xf32> to vector<2x32xf32>
    %965 = arith.addf %963, %964 : vector<2x32xf32>
    %966 = arith.negf %965 : vector<2x32xf32>
    %967 = math.exp %966 : vector<2x32xf32>
    %cst_295 = arith.constant 1.000000e+00 : f32
    %968 = vector.broadcast %cst_295 : f32 to vector<2x32xf32>
    %969 = arith.addf %968, %967 : vector<2x32xf32>
    %970 = arith.divf %968, %969 : vector<2x32xf32>
    %971 = vector.extract_strided_slice %953 {offsets = [0, 64], sizes = [2, 32], strides = [1, 1]} : vector<2x96xf32> to vector<2x32xf32>
    %972 = vector.extract_strided_slice %954 {offsets = [0, 64], sizes = [2, 32], strides = [1, 1]} : vector<2x96xf32> to vector<2x32xf32>
    %973 = arith.addf %972, %527 : vector<2x32xf32>
    %974 = arith.mulf %962, %973 : vector<2x32xf32>
    %975 = arith.addf %971, %974 : vector<2x32xf32>
    %976 = math.tanh %975 : vector<2x32xf32>
    %cst_296 = arith.constant 1.000000e+00 : f32
    %977 = vector.broadcast %cst_296 : f32 to vector<2x32xf32>
    %978 = arith.subf %977, %970 : vector<2x32xf32>
    %979 = arith.mulf %978, %976 : vector<2x32xf32>
    %980 = arith.mulf %970, %921 : vector<2x32xf32>
    %981 = arith.addf %979, %980 : vector<2x32xf32>
    %c14_297 = arith.constant 14 : index
    %c0_298 = arith.constant 0 : index
    %982 = vector.load %arg29[%c14_297, %c0_298] : memref<16x32xf32, #tpu.memory_space<vmem>>, vector<2x32xf32>
    tpu.vector_store %arg29[%c14_297, %c0_298], %981 {strides = array<i32>} : memref<16x32xf32, #tpu.memory_space<vmem>>, vector<2x32xf32>,
    %c0_299 = arith.constant 0 : index
    %c0_300 = arith.constant 0 : index
    %983 = vector.load %arg26[%c0_299, %c0_300] : memref<16x96xf32, #tpu.memory_space<vmem>>, vector<2x96xf32>
    %cst_301 = arith.constant dense<0.000000e+00> : vector<2x96xf32>
    %984 = tpu.matmul %951, %524, %cst_301 {dimension_numbers = #tpu.dot_dimension_numbers<[1], [0], [0], [1], [0, 0, 1, 1], [], []>} : vector<2x32xf32>, vector<32x96xf32>, vector<2x96xf32> -> vector<2x96xf32>
    %985 = vector.extract_strided_slice %983 {offsets = [0, 0], sizes = [2, 32], strides = [1, 1]} : vector<2x96xf32> to vector<2x32xf32>
    %986 = vector.extract_strided_slice %984 {offsets = [0, 0], sizes = [2, 32], strides = [1, 1]} : vector<2x96xf32> to vector<2x32xf32>
    %987 = arith.addf %985, %986 : vector<2x32xf32>
    %988 = arith.negf %987 : vector<2x32xf32>
    %989 = math.exp %988 : vector<2x32xf32>
    %cst_302 = arith.constant 1.000000e+00 : f32
    %990 = vector.broadcast %cst_302 : f32 to vector<2x32xf32>
    %991 = arith.addf %990, %989 : vector<2x32xf32>
    %992 = arith.divf %990, %991 : vector<2x32xf32>
    %993 = vector.extract_strided_slice %983 {offsets = [0, 32], sizes = [2, 32], strides = [1, 1]} : vector<2x96xf32> to vector<2x32xf32>
    %994 = vector.extract_strided_slice %984 {offsets = [0, 32], sizes = [2, 32], strides = [1, 1]} : vector<2x96xf32> to vector<2x32xf32>
    %995 = arith.addf %993, %994 : vector<2x32xf32>
    %996 = arith.negf %995 : vector<2x32xf32>
    %997 = math.exp %996 : vector<2x32xf32>
    %cst_303 = arith.constant 1.000000e+00 : f32
    %998 = vector.broadcast %cst_303 : f32 to vector<2x32xf32>
    %999 = arith.addf %998, %997 : vector<2x32xf32>
    %1000 = arith.divf %998, %999 : vector<2x32xf32>
    %1001 = vector.extract_strided_slice %983 {offsets = [0, 64], sizes = [2, 32], strides = [1, 1]} : vector<2x96xf32> to vector<2x32xf32>
    %1002 = vector.extract_strided_slice %984 {offsets = [0, 64], sizes = [2, 32], strides = [1, 1]} : vector<2x96xf32> to vector<2x32xf32>
    %1003 = arith.addf %1002, %530 : vector<2x32xf32>
    %1004 = arith.mulf %992, %1003 : vector<2x32xf32>
    %1005 = arith.addf %1001, %1004 : vector<2x32xf32>
    %1006 = math.tanh %1005 : vector<2x32xf32>
    %cst_304 = arith.constant 1.000000e+00 : f32
    %1007 = vector.broadcast %cst_304 : f32 to vector<2x32xf32>
    %1008 = arith.subf %1007, %1000 : vector<2x32xf32>
    %1009 = arith.mulf %1008, %1006 : vector<2x32xf32>
    %1010 = arith.mulf %1000, %951 : vector<2x32xf32>
    %1011 = arith.addf %1009, %1010 : vector<2x32xf32>
    %c0_305 = arith.constant 0 : index
    %c0_306 = arith.constant 0 : index
    %1012 = vector.load %arg30[%c0_305, %c0_306] : memref<16x32xf32, #tpu.memory_space<vmem>>, vector<2x32xf32>
    tpu.vector_store %arg30[%c0_305, %c0_306], %1011 {strides = array<i32>} : memref<16x32xf32, #tpu.memory_space<vmem>>, vector<2x32xf32>,
    %c0_307 = arith.constant 0 : index
    %c0_308 = arith.constant 0 : index
    %1013 = vector.load %arg29[%c0_307, %c0_308] : memref<16x32xf32, #tpu.memory_space<vmem>>, vector<16x32xf32>
    %c0_309 = arith.constant 0 : index
    %c0_310 = arith.constant 0 : index
    %1014 = vector.load %arg30[%c0_309, %c0_310] : memref<16x32xf32, #tpu.memory_space<vmem>>, vector<16x32xf32>
    %c0_311 = arith.constant 0 : index
    %c0_312 = arith.constant 0 : index
    %1015 = vector.load %arg19[%c0_311, %c0_312] : memref<32x16xf32, #tpu.memory_space<vmem>>, vector<32x16xf32>
    %cst_313 = arith.constant dense<0.000000e+00> : vector<16x16xf32>
    %1016 = tpu.matmul %1013, %1015, %cst_313 {dimension_numbers = #tpu.dot_dimension_numbers<[1], [0], [0], [1], [0, 0, 1, 1], [], []>} : vector<16x32xf32>, vector<32x16xf32>, vector<16x16xf32> -> vector<16x16xf32>
    %c0_314 = arith.constant 0 : index
    %c0_315 = arith.constant 0 : index
    %1017 = vector.load %arg20[%c0_314, %c0_315] : memref<32x16xf32, #tpu.memory_space<vmem>>, vector<32x16xf32>
    %cst_316 = arith.constant dense<0.000000e+00> : vector<16x16xf32>
    %1018 = tpu.matmul %1014, %1017, %cst_316 {dimension_numbers = #tpu.dot_dimension_numbers<[1], [0], [0], [1], [0, 0, 1, 1], [], []>} : vector<16x32xf32>, vector<32x16xf32>, vector<16x16xf32> -> vector<16x16xf32>
    %1019 = arith.addf %1016, %1018 : vector<16x16xf32>
    %c0_317 = arith.constant 0 : index
    %c0_318 = arith.constant 0 : index
    %1020 = vector.load %arg21[%c0_317, %c0_318] : memref<1x16xf32, #tpu.memory_space<vmem>>, vector<1x16xf32>
    %1021 = vector.broadcast %1020 : vector<1x16xf32> to vector<16x16xf32>
    %1022 = arith.addf %1019, %1021 : vector<16x16xf32>
    %1023 = math.tanh %1022 : vector<16x16xf32>
    %c0_319 = arith.constant 0 : index
    %c0_320 = arith.constant 0 : index
    %1024 = vector.load %arg22[%c0_319, %c0_320] : memref<16x16xf32, #tpu.memory_space<vmem>>, vector<16x16xf32>
    tpu.vector_store %arg22[%c0_319, %c0_320], %1023 {strides = array<i32>} : memref<16x16xf32, #tpu.memory_space<vmem>>, vector<16x16xf32>,
    return
  }
}

</mosaic_0001>

<bundles_post_ra>
// kernel: tpu_custom_call.1
= control target key start
LH: loop header
LB: loop body
LE: loop exit
PB: predicated region body
PF: predicated region fallthrough
CT: control target
= control target key end

     0   :  { %s6751_s0 = inlined_call_operand.hbm [shape: f32[16,16], index: 0, kind: input, shape index: {}]   ;;  %s6752_s1 = inlined_call_operand.hbm [shape: f32[16,96], index: 1, kind: input, shape index: {}]   ;;  %s6753_s2 = inlined_call_operand.vmem [shape: f32[32,96], index: 2, kind: input, shape index: {}]   ;;  %s6754_s3 = inlined_call_operand.hbm [shape: f32[1,96], index: 3, kind: input, shape index: {}]   ;;  %s6755_s4 = inlined_call_operand.hbm [shape: f32[1,32], index: 4, kind: input, shape index: {}]   ;;  %s6756_s5 = inlined_call_operand.hbm [shape: f32[16,96], index: 5, kind: input, shape index: {}]   ;;  %s6757_s6 = inlined_call_operand.vmem [shape: f32[32,96], index: 6, kind: input, shape index: {}]   ;;  %s6758_s7 = inlined_call_operand.hbm [shape: f32[1,96], index: 7, kind: input, shape index: {}]   ;;  %s6759_s8 = inlined_call_operand.hbm [shape: f32[1,32], index: 8, kind: input, shape index: {}]   ;;  %s6760_s9 = inlined_call_operand.vmem [shape: f32[32,96], index: 9, kind: input, shape index: {}]   ;;  %s6761_s10 = inlined_call_operand.hbm [shape: f32[32,96], index: 10, kind: input, shape index: {}]   ;;  %s6762_s11 = inlined_call_operand.hbm [shape: f32[32,96], index: 11, kind: input, shape index: {}]   ;;  %s6763_s12 = inlined_call_operand.hbm [shape: f32[1,96], index: 12, kind: input, shape index: {}]   ;;  %s6764_s13 = inlined_call_operand.hbm [shape: f32[1,32], index: 13, kind: input, shape index: {}]   ;;  %s6765_s14 = inlined_call_operand.hbm [shape: f32[32,96], index: 14, kind: input, shape index: {}]   ;;  %s6766_s15 = inlined_call_operand.hbm [shape: f32[32,96], index: 15, kind: input, shape index: {}]   ;;  %s6767_s16 = inlined_call_operand.hbm [shape: f32[32,96], index: 16, kind: input, shape index: {}]   ;;  %s6768_s17 = inlined_call_operand.hbm [shape: f32[1,96], index: 17, kind: input, shape index: {}]   ;;  %s6769_s18 = inlined_call_operand.hbm [shape: f32[1,32], index: 18, kind: input, shape index: {}]   ;;  %s6770_s19 = inlined_call_operand.vmem [shape: f32[32,16], index: 19, kind: input, shape index: {}]   ;;  %s6771_s20 = inlined_call_operand.vmem [shape: f32[32,16], index: 20, kind: input, shape index: {}]   ;;  %s6772_s21 = inlined_call_operand.vmem [shape: f32[1,16], index: 21, kind: input, shape index: {}]   ;;  %s6773_s22 = inlined_call_operand.hbm [shape: f32[16,16], index: 22, kind: output, shape index: {}]  }
   0x1   :  { %6776 = sst [smem:[#allocation47_spill]] %s6751_s0 }
   0x2   :  { %6777 = sst [smem:[#allocation48_spill]] %s6752_s1 }
   0x3   :  { %6778 = sst [smem:[#allocation49_spill]] %s6753_s2 }
   0x4   :  { %6779 = sst [smem:[#allocation50_spill]] %s6754_s3 }
   0x5   :  { %6780 = sst [smem:[#allocation51_spill]] %s6755_s4 }
   0x6   :  { %6781 = sst [smem:[#allocation52_spill]] %s6756_s5 }
   0x7   :  { %6782 = sst [smem:[#allocation53_spill]] %s6757_s6 }
   0x8   :  { %6783 = sst [smem:[#allocation54_spill]] %s6773_s22 }
   0x9   :  { %27 = vsyncpa [#allocation11], 0 }
   0xa   :  { %28 = vsyncpa [#allocation14], 0 }
   0xb   :  { %29 = vsyncpa [#allocation17], 0 }
   0xc   :  { %30 = vsyncpa [#allocation20], 0 }
   0xd   :  { %31 = vsyncpa [#allocation23], 0 }
   0xe   :  { %32 = vsyncpa [#allocation26], 0 }
   0xf   :  { %33 = vsyncpa [#allocation29], 0 }
  0x10   :  { %34 = vsyncpa [#allocation32], 0 }
  0x11   :  { %35 = vsyncpa [#allocation35], 0 }
  0x12   :  { %36 = vsyncpa [#allocation12], 0  ;;  %s5736_s3 = smov [#allocation13]   ;;  %s5737_s29 = smov [#allocation16]  }
  0x13   :  { %s54_s28 = sshll.u32 %s5736_s3, 4  ;;  %s79_s30 = sshll.u32 %s5737_s29, 4  ;;  %s55_s28 = int_to_ptr.vmem [resolvable:$true] %s54_s28  ;;  %s80_s30 = int_to_ptr.vmem [resolvable:$true] %s79_s30 }
  0x14   :  { %s5384_s4 = scalar_lea.vmem %s55_s28, 256  ;;  %p5389_p1 = scmp.lt.s32.totalorder %s55_s28, %s55_s28 }
  0x15   :  { %p5385_p0 = scmp.ne.s32.totalorder %s55_s28, %s5384_s4  ;;  %p5390_p2 = scmp.lt.s32.totalorder %s5384_s4, %s5384_s4 }
  0x17   :  { %p5391_p3 = por %p5390_p2, %p5389_p1 }
  0x19   :  { %p5392_p4 = pnand %p5391_p3, %p5385_p0 }
  0x1b   :  { %5395 = shalt.err (!%p5392_p4)
}
  0x1c   :  { %s5738_s0 = smov 128   ;;  %s5739_s23 = smov 8  }
  0x1d   :  { %s6784_s24 = sld [smem:[#allocation48_spill]]  ;;  %s5404_s6 = scalar_lea.vmem %s80_s30, 16 }
  0x1e   :  { %p5405_p5 = scmp.ne.s32.totalorder %s80_s30, %s5404_s6  ;;  %s5408_s25 = scalar_lea.vmem %s80_s30, 32 }
  0x1f   :  { %p5409_p6 = scmp.lt.s32.totalorder %s80_s30, %s80_s30  ;;  %p5410_p7 = scmp.lt.s32.totalorder %s5408_s25, %s5404_s6 }
  0x21   :  { %p5411_p8 = por %p5410_p7, %p5409_p6 }
  0x23   :  { %60 = dma.hbm_to_vmem [thread:$0]  %s6784_s24, 256, %s55_s28, [#allocation14], %s5738_s0, %s5738_s0, %s5739_s23  }
  0x24   :  { %p5412_p9 = pnand %p5411_p8, %p5405_p5 }
  0x26   :  { %5415 = shalt.err (!%p5412_p9)
}
  0x27   :  { %s6785_s27 = sld [smem:[#allocation51_spill]]  ;;  %s5740_s3 = smov [#allocation19]  }
  0x28   :  { %s103_s29 = sshll.u32 %s5740_s3, 4  ;;  %s5741_s4 = smov [#allocation22]   ;;  %s104_s29 = int_to_ptr.vmem [resolvable:$true] %s103_s29 }
  0x29   :  { %s124_s22 = sshll.u32 %s5741_s4, 4  ;;  %s5424_s1 = scalar_lea.vmem %s104_s29, 16  ;;  %s125_s22 = int_to_ptr.vmem [resolvable:$true] %s124_s22 }
  0x2a   :  { %p5425_p10 = scmp.ne.s32.totalorder %s104_s29, %s5424_s1  ;;  %s5428_s28 = scalar_lea.vmem %s104_s29, 32 }
  0x2b   :  { %p5429_p11 = scmp.lt.s32.totalorder %s104_s29, %s104_s29  ;;  %p5430_p12 = scmp.lt.s32.totalorder %s5428_s28, %s5424_s1 }
  0x2d   :  { %82 = dma.hbm_to_vmem [thread:$0]  %s6785_s27, 16, %s80_s30, [#allocation17]  }
  0x2e   :  { %p5431_p13 = por %p5430_p12, %p5429_p11 }
  0x30   :  { %p5432_p0 = pnand %p5431_p13, %p5425_p10 }
  0x32   :  { %5435 = shalt.err (!%p5432_p0)
}
  0x33   :  { %106 = dma.hbm_to_vmem [thread:$0]  %s6758_s7, 16, %s104_s29, [#allocation20]  }
  0x34   :  { %s5444_s6 = scalar_lea.vmem %s125_s22, 512  ;;  %p5449_p2 = scmp.lt.s32.totalorder %s125_s22, %s125_s22 }
  0x35   :  { %p5445_p1 = scmp.ne.s32.totalorder %s125_s22, %s5444_s6  ;;  %p5450_p3 = scmp.lt.s32.totalorder %s5444_s6, %s5444_s6 }
  0x37   :  { %p5451_p4 = por %p5450_p3, %p5449_p2 }
  0x39   :  { %p5452_p5 = pnand %p5451_p4, %p5445_p1 }
  0x3b   :  { %5455 = shalt.err (!%p5452_p5)
}
  0x3c   :  { %130 = dma.hbm_to_vmem [thread:$0]  %s6761_s10, 512, %s125_s22, [#allocation23], %s5738_s0, %s5738_s0, %s5739_s23  }
  0x3d   :  { %s5742_s26 = smov [#allocation25]   ;;  %s5743_s27 = smov [#allocation28]  }
  0x3e   :  { %s149_s2 = sshll.u32 %s5742_s26, 4  ;;  %s168_s3 = sshll.u32 %s5743_s27, 4  ;;  %s150_s2 = int_to_ptr.vmem [resolvable:$true] %s149_s2  ;;  %s169_s3 = int_to_ptr.vmem [resolvable:$true] %s168_s3 }
  0x3f   :  { %s5464_s7 = scalar_lea.vmem %s150_s2, 16  ;;  %s5468_s29 = scalar_lea.vmem %s150_s2, 32 }
  0x40   :  { %p5465_p6 = scmp.ne.s32.totalorder %s150_s2, %s5464_s7  ;;  %p5469_p7 = scmp.lt.s32.totalorder %s150_s2, %s150_s2 }
  0x41   :  { %p5470_p8 = scmp.lt.s32.totalorder %s5468_s29, %s5464_s7 }
  0x43   :  { %p5471_p9 = por %p5470_p8, %p5469_p7 }
  0x45   :  { %p5472_p10 = pnand %p5471_p9, %p5465_p6 }
  0x47   :  { %5475 = shalt.err (!%p5472_p10)
}
  0x48   :  { %152 = dma.hbm_to_vmem [thread:$0]  %s6763_s12, 16, %s150_s2, [#allocation26]  }
  0x49   :  { %s5484_s28 = scalar_lea.vmem %s169_s3, 512  ;;  %p5489_p12 = scmp.lt.s32.totalorder %s169_s3, %s169_s3 }
  0x4a   :  { %p5485_p11 = scmp.ne.s32.totalorder %s169_s3, %s5484_s28  ;;  %p5490_p13 = scmp.lt.s32.totalorder %s5484_s28, %s5484_s28 }
  0x4c   :  { %p5491_p0 = por %p5490_p13, %p5489_p12 }
  0x4e   :  { %p5492_p1 = pnand %p5491_p0, %p5485_p11 }
  0x50   :  { %5495 = shalt.err (!%p5492_p1)
}
  0x51   :  { %174 = dma.hbm_to_vmem [thread:$0]  %s6765_s14, 512, %s169_s3, [#allocation29], %s5738_s0, %s5738_s0, %s5739_s23  }
  0x52   :  { %s5744_s5 = smov [#allocation31]   ;;  %s5745_s6 = smov [#allocation10]  }
  0x53   :  { %s192_s24 = sshll.u32 %s5744_s5, 4  ;;  %s42_s30 = sshll.u32 %s5745_s6, 4  ;;  %s193_s24 = int_to_ptr.vmem [resolvable:$true] %s192_s24  ;;  %s43_s30 = int_to_ptr.vmem [resolvable:$true] %s42_s30 }
  0x54   :  { %s5504_s12 = scalar_lea.vmem %s193_s24, 512  ;;  %p5509_p3 = scmp.lt.s32.totalorder %s193_s24, %s193_s24 }
  0x55   :  { %p5505_p2 = scmp.ne.s32.totalorder %s193_s24, %s5504_s12  ;;  %p5510_p4 = scmp.lt.s32.totalorder %s5504_s12, %s5504_s12 }
  0x57   :  { %p5511_p5 = por %p5510_p4, %p5509_p3 }
  0x59   :  { %p5512_p6 = pnand %p5511_p5, %p5505_p2 }
  0x5b   :  { %5515 = shalt.err (!%p5512_p6)
}
  0x5c   :  { %198 = dma.hbm_to_vmem [thread:$0]  %s6767_s16, 512, %s193_s24, [#allocation32], %s5738_s0, %s5738_s0, %s5739_s23  }
  0x5d   :  { %s5524_s14 = scalar_lea.vmem %s43_s30, 256  ;;  %p5529_p8 = scmp.lt.s32.totalorder %s43_s30, %s43_s30 }
  0x5e   :  { %p5525_p7 = scmp.ne.s32.totalorder %s43_s30, %s5524_s14  ;;  %p5530_p9 = scmp.lt.s32.totalorder %s5524_s14, %s5524_s14 }
  0x60   :  { %p5531_p10 = por %p5530_p9, %p5529_p8 }
  0x62   :  { %p5532_p11 = pnand %p5531_p10, %p5525_p7 }
  0x64   :  { %5535 = shalt.err (!%p5532_p11)
}
  0x65   :  { %s6786_s3 = sld [smem:[#allocation47_spill]]  ;;  %s5746_s7 = smov [#allocation15]  }
  0x66   :  { %s69_s29 = sshll.u32 %s5746_s7, 4  ;;  %s5747_s4 = smov [#allocation18]   ;;  %s70_s29 = int_to_ptr.vmem [resolvable:$true] %s69_s29 }
  0x67   :  { %s88_s1 = sshll.u32 %s5747_s4, 4  ;;  %s5544_s16 = scalar_lea.vmem %s70_s29, 16  ;;  %s89_s1 = int_to_ptr.vmem [resolvable:$true] %s88_s1 }
  0x68   :  { %p5545_p12 = scmp.ne.s32.totalorder %s70_s29, %s5544_s16  ;;  %s5548_s28 = scalar_lea.vmem %s70_s29, 32 }
  0x69   :  { %p5549_p13 = scmp.lt.s32.totalorder %s70_s29, %s70_s29  ;;  %p5550_p0 = scmp.lt.s32.totalorder %s5548_s28, %s5544_s16 }
  0x6b   :  { %48 = dma.hbm_to_vmem [thread:$0]  %s6786_s3, 256, %s43_s30, [#allocation11], %s5738_s0, %s5738_s0, %s5739_s23  }
  0x6c   :  { %p5551_p1 = por %p5550_p0, %p5549_p13 }
  0x6e   :  { %p5552_p2 = pnand %p5551_p1, %p5545_p12 }
  0x70   :  { %5555 = shalt.err (!%p5552_p2)
}
  0x71   :  { %s6787_s5 = sld [smem:[#allocation50_spill]]  ;;  %s5564_s24 = scalar_lea.vmem %s89_s1, 256 }
  0x72   :  { %p5565_p3 = scmp.ne.s32.totalorder %s89_s1, %s5564_s24  ;;  %p5569_p4 = scmp.lt.s32.totalorder %s89_s1, %s89_s1 }
  0x73   :  { %p5570_p5 = scmp.lt.s32.totalorder %s5564_s24, %s5564_s24 }
  0x75   :  { %p5571_p6 = por %p5570_p5, %p5569_p4 }
  0x77   :  { %72 = dma.hbm_to_vmem [thread:$0]  %s6787_s5, 16, %s70_s29, [#allocation14]  }
  0x78   :  { %p5572_p7 = pnand %p5571_p6, %p5565_p3 }
  0x7a   :  { %5575 = shalt.err (!%p5572_p7)
}
  0x7b   :  { %s6788_s12 = sld [smem:[#allocation52_spill]]  ;;  %s5748_s25 = smov [#allocation21]  }
  0x7c   :  { %s113_s26 = sshll.u32 %s5748_s25, 4  ;;  %s5749_s14 = smov [#allocation24]   ;;  %s114_s26 = int_to_ptr.vmem [resolvable:$true] %s113_s26 }
  0x7d   :  { %s136_s2 = sshll.u32 %s5749_s14, 4  ;;  %s5584_s27 = scalar_lea.vmem %s114_s26, 16  ;;  %s137_s2 = int_to_ptr.vmem [resolvable:$true] %s136_s2 }
  0x7e   :  { %p5585_p8 = scmp.ne.s32.totalorder %s114_s26, %s5584_s27  ;;  %s5588_s3 = scalar_lea.vmem %s114_s26, 32 }
  0x7f   :  { %p5589_p9 = scmp.lt.s32.totalorder %s114_s26, %s114_s26  ;;  %p5590_p10 = scmp.lt.s32.totalorder %s5588_s3, %s5584_s27 }
  0x81   :  { %94 = dma.hbm_to_vmem [thread:$0]  %s6788_s12, 256, %s89_s1, [#allocation17], %s5738_s0, %s5738_s0, %s5739_s23  }
  0x82   :  { %p5591_p11 = por %p5590_p10, %p5589_p9 }
  0x84   :  { %p5592_p12 = pnand %p5591_p11, %p5585_p8 }
  0x86   :  { %5595 = shalt.err (!%p5592_p12)
}
  0x87   :  { %116 = dma.hbm_to_vmem [thread:$0]  %s6759_s8, 16, %s114_s26, [#allocation20]  }
  0x88   :  { %s5604_s4 = scalar_lea.vmem %s137_s2, 512  ;;  %p5609_p0 = scmp.lt.s32.totalorder %s137_s2, %s137_s2 }
  0x89   :  { %p5605_p13 = scmp.ne.s32.totalorder %s137_s2, %s5604_s4  ;;  %p5610_p1 = scmp.lt.s32.totalorder %s5604_s4, %s5604_s4 }
  0x8b   :  { %p5611_p2 = por %p5610_p1, %p5609_p0 }
  0x8d   :  { %p5612_p3 = pnand %p5611_p2, %p5605_p13 }
  0x8f   :  { %5615 = shalt.err (!%p5612_p3)
}
  0x90   :  { %142 = dma.hbm_to_vmem [thread:$0]  %s6762_s11, 512, %s137_s2, [#allocation23], %s5738_s0, %s5738_s0, %s5739_s23  }
  0x91   :  { %s5750_s28 = smov [#allocation27]   ;;  %s5751_s22 = smov [#allocation30]  }
  0x92   :  { %s159_s10 = sshll.u32 %s5750_s28, 4  ;;  %s180_s5 = sshll.u32 %s5751_s22, 4  ;;  %s160_s10 = int_to_ptr.vmem [resolvable:$true] %s159_s10  ;;  %s181_s5 = int_to_ptr.vmem [resolvable:$true] %s180_s5 }
  0x93   :  { %s5624_s8 = scalar_lea.vmem %s160_s10, 16  ;;  %s5628_s24 = scalar_lea.vmem %s160_s10, 32 }
  0x94   :  { %p5625_p4 = scmp.ne.s32.totalorder %s160_s10, %s5624_s8  ;;  %p5629_p5 = scmp.lt.s32.totalorder %s160_s10, %s160_s10 }
  0x95   :  { %p5630_p6 = scmp.lt.s32.totalorder %s5628_s24, %s5624_s8 }
  0x97   :  { %p5631_p7 = por %p5630_p6, %p5629_p5 }
  0x99   :  { %p5632_p8 = pnand %p5631_p7, %p5625_p4 }
  0x9b   :  { %5635 = shalt.err (!%p5632_p8)
}
  0x9c   :  { %162 = dma.hbm_to_vmem [thread:$0]  %s6764_s13, 16, %s160_s10, [#allocation26]  }
  0x9d   :  { %s5644_s12 = scalar_lea.vmem %s181_s5, 512  ;;  %p5649_p10 = scmp.lt.s32.totalorder %s181_s5, %s181_s5 }
  0x9e   :  { %p5645_p9 = scmp.ne.s32.totalorder %s181_s5, %s5644_s12  ;;  %p5650_p11 = scmp.lt.s32.totalorder %s5644_s12, %s5644_s12 }
  0xa0   :  { %p5651_p12 = por %p5650_p11, %p5649_p10 }
  0xa2   :  { %p5652_p13 = pnand %p5651_p12, %p5645_p9 }
  0xa4   :  { %5655 = shalt.err (!%p5652_p13)
}
  0xa5   :  { %186 = dma.hbm_to_vmem [thread:$0]  %s6766_s15, 512, %s181_s5, [#allocation29], %s5738_s0, %s5738_s0, %s5739_s23  }
  0xa6   :  { %s5752_s26 = smov [#allocation33]   ;;  %s5753_s2 = smov [#allocation34]  }
  0xa7   :  { %s205_s14 = sshll.u32 %s5752_s26, 4  ;;  %s215_s27 = sshll.u32 %s5753_s2, 4  ;;  %s206_s14 = int_to_ptr.vmem [resolvable:$true] %s205_s14  ;;  %s216_s27 = int_to_ptr.vmem [resolvable:$true] %s215_s27 }
  0xa8   :  { %s5664_s13 = scalar_lea.vmem %s206_s14, 16  ;;  %s5668_s3 = scalar_lea.vmem %s206_s14, 32 }
  0xa9   :  { %p5665_p0 = scmp.ne.s32.totalorder %s206_s14, %s5664_s13  ;;  %p5669_p1 = scmp.lt.s32.totalorder %s206_s14, %s206_s14 }
  0xaa   :  { %p5670_p2 = scmp.lt.s32.totalorder %s5668_s3, %s5664_s13 }
  0xac   :  { %p5671_p3 = por %p5670_p2, %p5669_p1 }
  0xae   :  { %p5672_p4 = pnand %p5671_p3, %p5665_p0 }
  0xb0   :  { %5675 = shalt.err (!%p5672_p4)
}
  0xb1   :  { %208 = dma.hbm_to_vmem [thread:$0]  %s6768_s17, 16, %s206_s14, [#allocation32]  }
  0xb2   :  { %s5684_s4 = scalar_lea.vmem %s216_s27, 16  ;;  %s5688_s15 = scalar_lea.vmem %s216_s27, 32 }
  0xb3   :  { %p5685_p5 = scmp.ne.s32.totalorder %s216_s27, %s5684_s4  ;;  %p5689_p6 = scmp.lt.s32.totalorder %s216_s27, %s216_s27 }
  0xb4   :  { %p5690_p7 = scmp.lt.s32.totalorder %s5688_s15, %s5684_s4 }
  0xb6   :  { %p5691_p8 = por %p5690_p7, %p5689_p6 }
  0xb8   :  { %p5692_p9 = pnand %p5691_p8, %p5685_p5 }
  0xba   :  { %5695 = shalt.err (!%p5692_p9)
}
  0xbb   :  { %218 = dma.hbm_to_vmem [thread:$0]  %s6769_s18, 16, %s216_s27, [#allocation35]  }
  0xbc   :  { %5716 = dma.done.wait [#allocation11], 256  }
  0xbd   :  { %5717 = vsyncadd [#allocation11], 4294967040 }
  0xbe   :  { %5718 = dma.done.wait [#allocation14], 272  }
  0xbf   :  { %5719 = vsyncadd [#allocation14], 4294967024 }
  0xc0   :  { %5720 = dma.done.wait [#allocation17], 272  }
  0xc1   :  { %5721 = vsyncadd [#allocation17], 4294967024 }
  0xc2   :  { %5722 = dma.done.wait [#allocation20], 32  }
  0xc3   :  { %5723 = vsyncadd [#allocation20], 4294967264 }
  0xc4   :  { %5724 = dma.done.wait [#allocation23], 1024  }
  0xc5   :  { %5725 = vsyncadd [#allocation23], 4294966272 }
  0xc6   :  { %5726 = dma.done.wait [#allocation26], 32  }
  0xc7   :  { %5727 = vsyncadd [#allocation26], 4294967264 }
  0xc8   :  { %5728 = dma.done.wait [#allocation29], 1024  }
  0xc9   :  { %5729 = vsyncadd [#allocation29], 4294966272 }
  0xca   :  { %5730 = dma.done.wait [#allocation32], 528  }
  0xcb   :  { %5731 = vsyncadd [#allocation32], 4294966768 }
  0xcc   :  { %5732 = dma.done.wait [#allocation35], 16  }
  0xcd   :  { %5733 = vsyncadd [#allocation35], 4294967280  ;;  %vm284_vm0 = vcmask 130048   ;;  %v276_v0 = vld [vmem:[#allocation13 + $0x8] sm:$0xff]  ;;  %v275_v1 = vld [vmem:[#allocation13] sm:$0xff]  ;;  %s6789_s28 = sld [smem:[#allocation49_spill]] }
  0xce   :  { %v370_v2 = vld [vmem:[#allocation18 + $0x8] sm:$0xff]  ;;  %4719 = vmatprep.subr.mxu0 %v276_v0  ;;  %v273_v3 = vld [vmem:[#allocation10] sm:$0xff]  ;;  %v5754_v7 = vmov 0.0   ;;  %s6790_s24 = sld [smem:[#allocation53_spill]]  ;;  %vm5755_vm1 = vmmov 0   ;;  %s5756_s3 = smov 64  }
  0xcf   :  { %4726 = vmatprep.subr.mxu1 %v370_v2  ;;  %v369_v4 = vld [vmem:[#allocation18] sm:$0xff]  ;;  %4720 = vmatpush3.msra.mxu0 %v276_v0  ;;  %v4436_v15 = vld [vmem:[#allocation16] ss:$0 sm:$0xff]  ;;  %v4437_v16 = vld [vmem:[#allocation21] ss:$0 sm:$0xff]  ;;  %vm366_vm2 = vcmask 785408  }
  0xd0   :  { %4723 = vmatprep.mubr.msk.f32.mxu0 %vm284_vm0, %v273_v3  ;;  %v274_v5 = vld [vmem:[#allocation10 + $0x8] sm:$0xff]  ;;  %4721 = vmatprep.subr.mxu0 %v275_v1  ;;  %v4430_v17 = vld [vmem:[#allocation15] ss:$0 sm:$0xff]  ;;  %v4433_v19 = vld [vmem:[#allocation19] ss:$0 sm:$0xff]  ;;  %s5757_s7 = smov 96  }
  0xd1   :  { %4727 = vmatpush3.msra.mxu1 %v370_v2  ;;  %4722 = vmatpush3.msra.mxu0 %v275_v1  ;;  %vm584_vm3 = vcmask 254976   ;;  %vm476_vm4 = vcmask 261120  }
  0xd2   :  { %4728 = vmatprep.subr.mxu1 %v369_v4  ;;  %4724 = vmatmul.mubr.msk.f32.vlgmr.msra.gmra.mxu0 %vm284_vm0, %v274_v5 }
  0xd3   :  { %v5950_v6 = vld [vmem:[%s6789_s28 + $0x18] sm:$0xff]  ;;  %4733 = vmatprep.subr.mxu0 %v5754_v7  ;;  %4729 = vmatpush3.msra.mxu1 %v369_v4  ;;  %v5958_v8 = vld [vmem:[%s6789_s28 + $0x10] sm:$0xff]  ;;  %v5972_v10 = vld [vmem:[%s6789_s28 + $0x8] sm:$0xff] }
  0xd4   :  { %4730 = vmatprep.mubr.msk.f32.mxu1 %vm284_vm0, %v273_v3  ;;  %v5963_v9 = vld [vmem:[%s6790_s24 + $0x18] sm:$0xff]  ;;  %4734 = vmatpush3.msra.mxu0 %v5950_v6  ;;  %v5977_v11 = vld [vmem:[%s6790_s24 + $0x10] sm:$0xff]  ;;  %v5986_v12 = vld [vmem:[%s6789_s28] sm:$0xff] }
  0xd5   :  { %4731 = vmatmul.mubr.msk.f32.vlgmr.msra.gmra.mxu1 %vm284_vm0, %v274_v5  ;;  %4735 = vmatprep.subr.mxu0 %v5754_v7  ;;  %v5993_v13 = vld [vmem:[%s6790_s24 + $0x8] sm:$0xff]  ;;  %v6003_v14 = vld [vmem:[%s6790_s24] sm:$0xff] }
  0xd6   :  { %4744 = vmatprep.subr.mxu1 %v5754_v7  ;;  %4736 = vmatpush3.msra.mxu0 %v5958_v8 }
  0xd7   :  { %4745 = vmatpush3.msra.mxu1 %v5963_v9  ;;  %4737 = vmatprep.subr.mxu0 %v5754_v7 }
  0xd8   :  { %4746 = vmatprep.subr.mxu1 %v5754_v7  ;;  %4738 = vmatpush3.msra.mxu0 %v5972_v10 }
  0xd9   :  { %4747 = vmatpush3.msra.mxu1 %v5977_v11  ;;  %4739 = vmatprep.subr.mxu0 %v5754_v7 }
  0xda   :  { %4748 = vmatprep.subr.mxu1 %v5754_v7  ;;  %4740 = vmatpush3.msra.mxu0 %v5986_v12 }
  0xdb   :  { %4741 = vmatprep.mubr.msk.f32.mxu0 %vm5755_vm1, %v5754_v7  ;;  %4749 = vmatpush3.msra.mxu1 %v5993_v13 }
  0xdc   :  { %4742 = vmatmul.mubr.f32.vlgmr.msra.gmra.mxu0 %v5754_v7  ;;  %4750 = vmatprep.subr.mxu1 %v5754_v7 }
  0xdd   :  { %4752 = vmatprep.mubr.msk.f32.mxu1 %vm5755_vm1, %v5754_v7  ;;  %4751 = vmatpush3.msra.mxu1 %v6003_v14 }
  0xde   :  { %557 = vrot.lane.b32.xlu0 %v4436_v15, %s5756_s3  ;;  %4753 = vmatmul.mubr.f32.vlgmr.msra.gmra.mxu1 %v5754_v7 }
  0xdf   :  { %4755 = vmatprep.subr.mxu0 %v5754_v7  ;;  %4766 = vmatprep.subr.mxu1 %v5754_v7 }
  0xe0   :  { %4756 = vmatpush3.msra.mxu0 %v5950_v6  ;;  %4767 = vmatpush3.msra.mxu1 %v5963_v9 }
  0xe1   :  { %4757 = vmatprep.subr.mxu0 %v5754_v7  ;;  %4768 = vmatprep.subr.mxu1 %v5754_v7 }
  0xe2   :  { %664 = vrot.lane.b32.xlu0 %v4437_v16, %s5756_s3  ;;  %4758 = vmatpush3.msra.mxu0 %v5958_v8 }
  0xe3   :  { %4759 = vmatprep.subr.mxu0 %v5754_v7  ;;  %4763 = vmatprep.mubr.msk.f32.mxu0 %vm5755_vm1, %v5754_v7 }
  0xe4   :  { %4760 = vmatpush3.msra.mxu0 %v5972_v10  ;;  %4769 = vmatpush3.msra.mxu1 %v5977_v11 }
  0xe5   :  { %4761 = vmatprep.subr.mxu0 %v5754_v7  ;;  %4770 = vmatprep.subr.mxu1 %v5754_v7 }
  0xe6   :  { %4762 = vmatpush3.msra.mxu0 %v5986_v12  ;;  %4771 = vmatpush3.msra.mxu1 %v5993_v13 }
  0xe7   :  { %4774 = vmatprep.mubr.msk.f32.mxu1 %vm5755_vm1, %v5754_v7  ;;  %4772 = vmatprep.subr.mxu1 %v5754_v7 }
  0xe8   :  { %4777 = vmatprep.subr.mxu0 %v5754_v7  ;;  %4773 = vmatpush3.msra.mxu1 %v6003_v14 }
  0xe9   :  { %4788 = vmatprep.subr.mxu1 %v5754_v7 }
 0x150   :  { %v6037_v26 = vpop.permute.xlu0 %557 }
 0x154   :  { %v6043_v30 = vpop.permute.xlu0 %664 }
 0x192   :  { %v4725_v18 = vpop.f32.mrf.mxu0 }
 0x193   :  { %v363_v20 = vadd.f32 %v4725_v18, %v4430_v17 }
 0x194   :  { %v357_v21 = vpop.f32.mrf.mxu0 }
 0x195   :  { %v4732_v22 = vpop.f32.mrf.mxu1  ;;  %368 = vst.msk [vmem:[#allocation2 + $0x8] sm:$0xff] %vm366_vm2, %v363_v20  ;;  %v358_v23 = vadd.f32 %v4430_v17, %v357_v21 }
 0x196   :  { %v450_v24 = vadd.f32 %v4732_v22, %v4433_v19 }
 0x197   :  { %v444_v25 = vpop.f32.mrf.mxu1  ;;  %367 = vst.msk [vmem:[#allocation2] sm:$0xff] %vm366_vm2, %v358_v23 }
 0x198   :  { %454 = vst.msk [vmem:[#allocation3 + $0x8] sm:$0xff] %vm366_vm2, %v450_v24  ;;  %v445_v27 = vadd.f32 %v4433_v19, %v444_v25 }
 0x19a   :  { %453 = vst.msk [vmem:[#allocation3] sm:$0xff] %vm366_vm2, %v445_v27 }
 0x19c   :  { %v546_v28 = vpop.f32.mrf.mxu0 }
 0x19d   :  { %v560_v29 = vadd.f32 %v6037_v26, %v546_v28 }
 0x19e   :  { %v4743_v31 = vpop.f32.mrf.mxu0  ;;  %v653_v32 = vpop.f32.mrf.mxu1  ;;  %v475_v35 = vld [vmem:[#allocation2] sm:$0x3]  ;;  %v692_v20 = vld [vmem:[#allocation2 + $0x2] sm:$0x3] }
 0x19f   :  { %562 = vrot.lane.b32.xlu1 %v560_v29, %s5756_s3  ;;  %v667_v33 = vadd.f32 %v6043_v30, %v653_v32  ;;  %v550_v36 = vadd.f32 %v546_v28, %v475_v35  ;;  %v586_v37 = vld [vmem:[#allocation3 + $0xe] sm:$0x3]  ;;  %v797_v22 = vld [vmem:[#allocation3 + $0xc] sm:$0x3] }
 0x1a0   :  { %v4754_v34 = vpop.f32.mrf.mxu1  ;;  %v657_v39 = vadd.f32 %v653_v32, %v586_v37 }
 0x1a1   :  { %v4438_v38 = vmul.f32 -1.442695, %v550_v36 }
 0x1a2   :  { %v4439_v40 = vmul.f32 -1.442695, %v657_v39 }
 0x1a3   :  { %669 = vrot.lane.b32.xlu1 %v667_v33, %s5756_s3  ;;  %5174 = vpow2.f32 %v4438_v38 }
 0x1a4   :  { %5176 = vpow2.f32 %v4439_v40 }
 0x1b0   :  { %v5175_v41 = vpop.eup %5174 }
 0x1b1   :  { %v554_v42 = vadd.f32 1.0, %v5175_v41  ;;  %v5177_v43 = vpop.eup %5176 }
 0x1b2   :  { %v661_v44 = vadd.f32 1.0, %v5177_v43 }
 0x1b3   :  { %5178 = vrcp.f32 %v554_v42 }
 0x1b4   :  { %5180 = vrcp.f32 %v661_v44 }
 0x1c0   :  { %v5179_v45 = vpop.eup %5178 }
 0x1c1   :  { %v5181_v48 = vpop.eup %5180  ;;  %v572_v57 = vsub.f32 1.0, %v5179_v45  ;;  %v578_v59 = vmul.f32 0.0, %v5179_v45 }
 0x1c2   :  { %v679_v62 = vsub.f32 1.0, %v5181_v48  ;;  %v685_v0 = vmul.f32 0.0, %v5181_v48 }
 0x211   :  { %v563_v46 = vpop.permute.xlu1 %562 }
 0x212   :  { %v565_v47 = vmul.f32 %v5179_v45, %v563_v46 }
 0x214   :  { %567 = vrot.lane.b32.xlu0 %v565_v47, %s5756_s3 }
 0x215   :  { %v670_v49 = vpop.permute.xlu1 %669 }
 0x216   :  { %v672_v50 = vmul.f32 %v5181_v48, %v670_v49 }
 0x218   :  { %674 = vrot.lane.b32.xlu1 %v672_v50, %s5756_s3 }
 0x286   :  { %v568_v51 = vpop.permute.xlu0 %567 }
 0x287   :  { %v570_v52 = vadd.f32 %v568_v51, %v475_v35 }
 0x289   :  { %5182 = vtanh.f32 %v570_v52 }
 0x28a   :  { %v675_v53 = vpop.permute.xlu1 %674 }
 0x28b   :  { %v677_v54 = vadd.f32 %v675_v53, %v586_v37 }
 0x28d   :  { %5184 = vtanh.f32 %v677_v54 }
 0x296   :  { %v5183_v55 = vpop.eup %5182 }
 0x297   :  { %574 = vrot.lane.b32.xlu0 %v5183_v55, %s5757_s7 }
 0x29a   :  { %v5185_v56 = vpop.eup %5184 }
 0x29b   :  { %681 = vrot.lane.b32.xlu1 %v5185_v56, %s5757_s7 }
 0x309   :  { %v575_v58 = vpop.permute.xlu0 %574 }
 0x30a   :  { %v577_v60 = vmul.f32 %v575_v58, %v572_v57 }
 0x30c   :  { %v6052_v61 = vadd.f32 %v578_v59, %v577_v60 }
 0x30d   :  { %v682_v63 = vpop.permute.xlu1 %681 }
 0x30e   :  { %v684_v1 = vmul.f32 %v682_v63, %v679_v62  ;;  %581 = vrot.lane.b32.xlu0 %v6052_v61, %s5757_s7  ;;  %v902_v62 = vld [vmem:[#allocation2 + $0x4] sm:$0x3] }
 0x310   :  { %v6056_v2 = vadd.f32 %v685_v0, %v684_v1  ;;  %v1007_v0 = vld [vmem:[#allocation3 + $0xa] sm:$0x3] }
 0x312   :  { %688 = vrot.lane.b32.xlu1 %v6056_v2, %s5757_s7 }
 0x380   :  { %v582_v3 = vpop.permute.xlu0 %581 }
 0x381   :  { %585 = vst.msk [vmem:[#allocation6] sm:$0x3] %vm584_vm3, %v582_v3  ;;  %4764 = vmatmul.mubr.msk.f32.vlgmr.msra.gmra.mxu0 %vm476_vm4, %v582_v3 }
 0x382   :  { %4778 = vmatpush3.msra.mxu0 %v5950_v6  ;;  %4785 = vmatprep.mubr.msk.f32.mxu0 %vm5755_vm1, %v5754_v7 }
 0x383   :  { %4779 = vmatprep.subr.mxu0 %v5754_v7 }
 0x384   :  { %v689_v4 = vpop.permute.xlu1 %688  ;;  %4780 = vmatpush3.msra.mxu0 %v5958_v8 }
 0x385   :  { %691 = vst.msk [vmem:[#allocation7 + $0xe] sm:$0x3] %vm584_vm3, %v689_v4  ;;  %4775 = vmatmul.mubr.msk.f32.vlgmr.msra.gmra.mxu1 %vm476_vm4, %v689_v4  ;;  %4781 = vmatprep.subr.mxu0 %v5754_v7 }
 0x386   :  { %4782 = vmatpush3.msra.mxu0 %v5972_v10  ;;  %4789 = vmatpush3.msra.mxu1 %v5963_v9 }
 0x387   :  { %4783 = vmatprep.subr.mxu0 %v5754_v7  ;;  %4790 = vmatprep.subr.mxu1 %v5754_v7 }
 0x388   :  { %4784 = vmatpush3.msra.mxu0 %v5986_v12  ;;  %4791 = vmatpush3.msra.mxu1 %v5977_v11 }
 0x389   :  { %4792 = vmatprep.subr.mxu1 %v5754_v7  ;;  %4796 = vmatprep.mubr.msk.f32.mxu1 %vm5755_vm1, %v5754_v7 }
 0x38a   :  { %4793 = vmatpush3.msra.mxu1 %v5993_v13  ;;  %4799 = vmatprep.subr.mxu0 %v5754_v7 }
 0x38b   :  { %4794 = vmatprep.subr.mxu1 %v5754_v7 }
 0x38c   :  { %4795 = vmatpush3.msra.mxu1 %v6003_v14 }
 0x38d   :  { %4810 = vmatprep.subr.mxu1 %v5754_v7 }
 0x441   :  { %v761_v5 = vpop.f32.mrf.mxu0 }
 0x442   :  { %v772_v15 = vadd.f32 %v761_v5, %v6037_v26  ;;  %v765_v21 = vadd.f32 %v761_v5, %v692_v20 }
 0x443   :  { %v4765_v16 = vpop.f32.mrf.mxu0 }
 0x444   :  { %774 = vrot.lane.b32.xlu0 %v772_v15, %s5756_s3  ;;  %v4441_v23 = vmul.f32 -1.442695, %v765_v21 }
 0x445   :  { %v866_v17 = vpop.f32.mrf.mxu1 }
 0x446   :  { %v877_v18 = vadd.f32 %v866_v17, %v6043_v30  ;;  %v870_v24 = vadd.f32 %v866_v17, %v797_v22  ;;  %5186 = vpow2.f32 %v4441_v23 }
 0x447   :  { %v4776_v19 = vpop.f32.mrf.mxu1 }
 0x448   :  { %879 = vrot.lane.b32.xlu1 %v877_v18, %s5756_s3  ;;  %v4443_v25 = vmul.f32 -1.442695, %v870_v24 }
 0x44a   :  { %5188 = vpow2.f32 %v4443_v25 }
 0x453   :  { %v5187_v27 = vpop.eup %5186 }
 0x454   :  { %v769_v28 = vadd.f32 1.0, %v5187_v27 }
 0x456   :  { %5190 = vrcp.f32 %v769_v28 }
 0x457   :  { %v5189_v29 = vpop.eup %5188 }
 0x458   :  { %v874_v31 = vadd.f32 1.0, %v5189_v29 }
 0x45a   :  { %5192 = vrcp.f32 %v874_v31 }
 0x463   :  { %v5191_v32 = vpop.eup %5190 }
 0x464   :  { %v784_v44 = vsub.f32 1.0, %v5191_v32  ;;  %v790_v46 = vmul.f32 %v5191_v32, %v6052_v61 }
 0x467   :  { %v5193_v35 = vpop.eup %5192 }
 0x468   :  { %v889_v49 = vsub.f32 1.0, %v5193_v35  ;;  %v895_v51 = vmul.f32 %v5193_v35, %v6056_v2 }
 0x4b6   :  { %v775_v33 = vpop.permute.xlu0 %774 }
 0x4b7   :  { %v777_v34 = vmul.f32 %v5191_v32, %v775_v33 }
 0x4b9   :  { %779 = vrot.lane.b32.xlu0 %v777_v34, %s5756_s3 }
 0x4ba   :  { %v880_v36 = vpop.permute.xlu1 %879 }
 0x4bb   :  { %v882_v37 = vmul.f32 %v5193_v35, %v880_v36 }
 0x4bd   :  { %884 = vrot.lane.b32.xlu1 %v882_v37, %s5756_s3 }
 0x52b   :  { %v780_v38 = vpop.permute.xlu0 %779 }
 0x52c   :  { %v782_v39 = vadd.f32 %v780_v38, %v692_v20 }
 0x52e   :  { %5194 = vtanh.f32 %v782_v39 }
 0x52f   :  { %v885_v40 = vpop.permute.xlu1 %884 }
 0x530   :  { %v887_v41 = vadd.f32 %v885_v40, %v797_v22 }
 0x532   :  { %5196 = vtanh.f32 %v887_v41 }
 0x53b   :  { %v5195_v42 = vpop.eup %5194 }
 0x53c   :  { %786 = vrot.lane.b32.xlu0 %v5195_v42, %s5757_s7 }
 0x53f   :  { %v5197_v43 = vpop.eup %5196 }
 0x540   :  { %891 = vrot.lane.b32.xlu1 %v5197_v43, %s5757_s7 }
 0x5ae   :  { %v787_v45 = vpop.permute.xlu0 %786 }
 0x5af   :  { %v789_v47 = vmul.f32 %v787_v45, %v784_v44 }
 0x5b1   :  { %v6093_v48 = vadd.f32 %v790_v46, %v789_v47 }
 0x5b2   :  { %v892_v50 = vpop.permute.xlu1 %891 }
 0x5b3   :  { %v894_v52 = vmul.f32 %v892_v50, %v889_v49  ;;  %793 = vrot.lane.b32.xlu0 %v6093_v48, %s5757_s7  ;;  %v1112_v49 = vld [vmem:[#allocation2 + $0x6] sm:$0x3] }
 0x5b5   :  { %v6098_v53 = vadd.f32 %v895_v51, %v894_v52  ;;  %v1217_v51 = vld [vmem:[#allocation3 + $0x8] sm:$0x3] }
 0x5b7   :  { %898 = vrot.lane.b32.xlu1 %v6098_v53, %s5757_s7 }
 0x625   :  { %v794_v54 = vpop.permute.xlu0 %793 }
 0x626   :  { %796 = vst.msk [vmem:[#allocation6 + $0x2] sm:$0x3] %vm584_vm3, %v794_v54  ;;  %4786 = vmatmul.mubr.msk.f32.vlgmr.msra.gmra.mxu0 %vm476_vm4, %v794_v54 }
 0x627   :  { %4800 = vmatpush3.msra.mxu0 %v5950_v6  ;;  %4807 = vmatprep.mubr.msk.f32.mxu0 %vm5755_vm1, %v5754_v7 }
 0x628   :  { %4801 = vmatprep.subr.mxu0 %v5754_v7 }
 0x629   :  { %v899_v55 = vpop.permute.xlu1 %898  ;;  %4802 = vmatpush3.msra.mxu0 %v5958_v8 }
 0x62a   :  { %901 = vst.msk [vmem:[#allocation7 + $0xc] sm:$0x3] %vm584_vm3, %v899_v55  ;;  %4797 = vmatmul.mubr.msk.f32.vlgmr.msra.gmra.mxu1 %vm476_vm4, %v899_v55  ;;  %4803 = vmatprep.subr.mxu0 %v5754_v7 }
 0x62b   :  { %4804 = vmatpush3.msra.mxu0 %v5972_v10  ;;  %4811 = vmatpush3.msra.mxu1 %v5963_v9 }
 0x62c   :  { %4805 = vmatprep.subr.mxu0 %v5754_v7  ;;  %4812 = vmatprep.subr.mxu1 %v5754_v7 }
 0x62d   :  { %4806 = vmatpush3.msra.mxu0 %v5986_v12  ;;  %4813 = vmatpush3.msra.mxu1 %v5977_v11 }
 0x62e   :  { %4814 = vmatprep.subr.mxu1 %v5754_v7  ;;  %4818 = vmatprep.mubr.msk.f32.mxu1 %vm5755_vm1, %v5754_v7 }
 0x62f   :  { %4815 = vmatpush3.msra.mxu1 %v5993_v13  ;;  %4821 = vmatprep.subr.mxu0 %v5754_v7 }
 0x630   :  { %4816 = vmatprep.subr.mxu1 %v5754_v7 }
 0x631   :  { %4817 = vmatpush3.msra.mxu1 %v6003_v14 }
 0x632   :  { %4832 = vmatprep.subr.mxu1 %v5754_v7 }
 0x6e6   :  { %v971_v56 = vpop.f32.mrf.mxu0 }
 0x6e7   :  { %v982_v57 = vadd.f32 %v971_v56, %v6037_v26  ;;  %v975_v63 = vadd.f32 %v971_v56, %v902_v62 }
 0x6e8   :  { %v4787_v58 = vpop.f32.mrf.mxu0 }
 0x6e9   :  { %984 = vrot.lane.b32.xlu0 %v982_v57, %s5756_s3  ;;  %v4445_v1 = vmul.f32 -1.442695, %v975_v63 }
 0x6ea   :  { %v1076_v59 = vpop.f32.mrf.mxu1 }
 0x6eb   :  { %v1087_v60 = vadd.f32 %v1076_v59, %v6043_v30  ;;  %v1080_v2 = vadd.f32 %v1076_v59, %v1007_v0  ;;  %5198 = vpow2.f32 %v4445_v1 }
 0x6ec   :  { %v4798_v61 = vpop.f32.mrf.mxu1 }
 0x6ed   :  { %1089 = vrot.lane.b32.xlu1 %v1087_v60, %s5756_s3  ;;  %v4447_v3 = vmul.f32 -1.442695, %v1080_v2 }
 0x6ef   :  { %5200 = vpow2.f32 %v4447_v3 }
 0x6f8   :  { %v5199_v4 = vpop.eup %5198 }
 0x6f9   :  { %v979_v5 = vadd.f32 1.0, %v5199_v4 }
 0x6fb   :  { %5202 = vrcp.f32 %v979_v5 }
 0x6fc   :  { %v5201_v15 = vpop.eup %5200 }
 0x6fd   :  { %v1084_v16 = vadd.f32 1.0, %v5201_v15 }
 0x6ff   :  { %5204 = vrcp.f32 %v1084_v16 }
 0x708   :  { %v5203_v17 = vpop.eup %5202 }
 0x709   :  { %v994_v31 = vsub.f32 1.0, %v5203_v17  ;;  %v1000_v33 = vmul.f32 %v5203_v17, %v6093_v48 }
 0x70c   :  { %v5205_v20 = vpop.eup %5204 }
 0x70d   :  { %v1099_v36 = vsub.f32 1.0, %v5205_v20  ;;  %v1105_v38 = vmul.f32 %v5205_v20, %v6098_v53 }
 0x75b   :  { %v985_v18 = vpop.permute.xlu0 %984 }
 0x75c   :  { %v987_v19 = vmul.f32 %v5203_v17, %v985_v18 }
 0x75e   :  { %989 = vrot.lane.b32.xlu0 %v987_v19, %s5756_s3 }
 0x75f   :  { %v1090_v21 = vpop.permute.xlu1 %1089 }
 0x760   :  { %v1092_v22 = vmul.f32 %v5205_v20, %v1090_v21 }
 0x762   :  { %1094 = vrot.lane.b32.xlu1 %v1092_v22, %s5756_s3 }
 0x7d0   :  { %v990_v23 = vpop.permute.xlu0 %989 }
 0x7d1   :  { %v992_v24 = vadd.f32 %v990_v23, %v902_v62 }
 0x7d3   :  { %5206 = vtanh.f32 %v992_v24 }
 0x7d4   :  { %v1095_v25 = vpop.permute.xlu1 %1094 }
 0x7d5   :  { %v1097_v27 = vadd.f32 %v1095_v25, %v1007_v0 }
 0x7d7   :  { %5208 = vtanh.f32 %v1097_v27 }
 0x7e0   :  { %v5207_v28 = vpop.eup %5206 }
 0x7e1   :  { %996 = vrot.lane.b32.xlu0 %v5207_v28, %s5757_s7 }
 0x7e4   :  { %v5209_v29 = vpop.eup %5208 }
 0x7e5   :  { %1101 = vrot.lane.b32.xlu1 %v5209_v29, %s5757_s7 }
 0x853   :  { %v997_v32 = vpop.permute.xlu0 %996 }
 0x854   :  { %v999_v34 = vmul.f32 %v997_v32, %v994_v31 }
 0x856   :  { %v6135_v35 = vadd.f32 %v1000_v33, %v999_v34 }
 0x857   :  { %v1102_v37 = vpop.permute.xlu1 %1101 }
 0x858   :  { %v1104_v39 = vmul.f32 %v1102_v37, %v1099_v36  ;;  %1003 = vrot.lane.b32.xlu0 %v6135_v35, %s5757_s7  ;;  %v1322_v36 = vld [vmem:[#allocation2 + $0x8] sm:$0x3] }
 0x85a   :  { %v6140_v40 = vadd.f32 %v1105_v38, %v1104_v39  ;;  %v1427_v38 = vld [vmem:[#allocation3 + $0x6] sm:$0x3] }
 0x85c   :  { %1108 = vrot.lane.b32.xlu1 %v6140_v40, %s5757_s7 }
 0x8ca   :  { %v1004_v41 = vpop.permute.xlu0 %1003 }
 0x8cb   :  { %1006 = vst.msk [vmem:[#allocation6 + $0x4] sm:$0x3] %vm584_vm3, %v1004_v41  ;;  %4808 = vmatmul.mubr.msk.f32.vlgmr.msra.gmra.mxu0 %vm476_vm4, %v1004_v41 }
 0x8cc   :  { %4822 = vmatpush3.msra.mxu0 %v5950_v6  ;;  %4829 = vmatprep.mubr.msk.f32.mxu0 %vm5755_vm1, %v5754_v7 }
 0x8cd   :  { %4823 = vmatprep.subr.mxu0 %v5754_v7 }
 0x8ce   :  { %v1109_v42 = vpop.permute.xlu1 %1108  ;;  %4824 = vmatpush3.msra.mxu0 %v5958_v8 }
 0x8cf   :  { %1111 = vst.msk [vmem:[#allocation7 + $0xa] sm:$0x3] %vm584_vm3, %v1109_v42  ;;  %4819 = vmatmul.mubr.msk.f32.vlgmr.msra.gmra.mxu1 %vm476_vm4, %v1109_v42  ;;  %4825 = vmatprep.subr.mxu0 %v5754_v7 }
 0x8d0   :  { %4826 = vmatpush3.msra.mxu0 %v5972_v10  ;;  %4833 = vmatpush3.msra.mxu1 %v5963_v9 }
 0x8d1   :  { %4827 = vmatprep.subr.mxu0 %v5754_v7  ;;  %4834 = vmatprep.subr.mxu1 %v5754_v7 }
 0x8d2   :  { %4828 = vmatpush3.msra.mxu0 %v5986_v12  ;;  %4835 = vmatpush3.msra.mxu1 %v5977_v11 }
 0x8d3   :  { %4836 = vmatprep.subr.mxu1 %v5754_v7  ;;  %4840 = vmatprep.mubr.msk.f32.mxu1 %vm5755_vm1, %v5754_v7 }
 0x8d4   :  { %4837 = vmatpush3.msra.mxu1 %v5993_v13  ;;  %4843 = vmatprep.subr.mxu0 %v5754_v7 }
 0x8d5   :  { %4838 = vmatprep.subr.mxu1 %v5754_v7 }
 0x8d6   :  { %4839 = vmatpush3.msra.mxu1 %v6003_v14 }
 0x8d7   :  { %4854 = vmatprep.subr.mxu1 %v5754_v7 }
 0x98b   :  { %v1181_v43 = vpop.f32.mrf.mxu0 }
 0x98c   :  { %v1192_v44 = vadd.f32 %v1181_v43, %v6037_v26  ;;  %v1185_v50 = vadd.f32 %v1181_v43, %v1112_v49 }
 0x98d   :  { %v4809_v45 = vpop.f32.mrf.mxu0 }
 0x98e   :  { %1194 = vrot.lane.b32.xlu0 %v1192_v44, %s5756_s3  ;;  %v4449_v52 = vmul.f32 -1.442695, %v1185_v50 }
 0x98f   :  { %v1286_v46 = vpop.f32.mrf.mxu1 }
 0x990   :  { %v1297_v47 = vadd.f32 %v1286_v46, %v6043_v30  ;;  %v1290_v53 = vadd.f32 %v1286_v46, %v1217_v51  ;;  %5210 = vpow2.f32 %v4449_v52 }
 0x991   :  { %v4820_v48 = vpop.f32.mrf.mxu1 }
 0x992   :  { %1299 = vrot.lane.b32.xlu1 %v1297_v47, %s5756_s3  ;;  %v4451_v54 = vmul.f32 -1.442695, %v1290_v53 }
 0x994   :  { %5212 = vpow2.f32 %v4451_v54 }
 0x99d   :  { %v5211_v55 = vpop.eup %5210 }
 0x99e   :  { %v1189_v56 = vadd.f32 1.0, %v5211_v55 }
 0x9a0   :  { %5214 = vrcp.f32 %v1189_v56 }
 0x9a1   :  { %v5213_v57 = vpop.eup %5212 }
 0x9a2   :  { %v1294_v58 = vadd.f32 1.0, %v5213_v57 }
 0x9a4   :  { %5216 = vrcp.f32 %v1294_v58 }
 0x9ad   :  { %v5215_v59 = vpop.eup %5214 }
 0x9ae   :  { %v1204_v16 = vsub.f32 1.0, %v5215_v59  ;;  %v1210_v18 = vmul.f32 %v5215_v59, %v6135_v35 }
 0x9b1   :  { %v5217_v62 = vpop.eup %5216 }
 0x9b2   :  { %v1309_v21 = vsub.f32 1.0, %v5217_v62  ;;  %v1315_v23 = vmul.f32 %v5217_v62, %v6140_v40 }
 0xa00   :  { %v1195_v60 = vpop.permute.xlu0 %1194 }
 0xa01   :  { %v1197_v61 = vmul.f32 %v5215_v59, %v1195_v60 }
 0xa03   :  { %1199 = vrot.lane.b32.xlu0 %v1197_v61, %s5756_s3 }
 0xa04   :  { %v1300_v63 = vpop.permute.xlu1 %1299 }
 0xa05   :  { %v1302_v0 = vmul.f32 %v5217_v62, %v1300_v63 }
 0xa07   :  { %1304 = vrot.lane.b32.xlu1 %v1302_v0, %s5756_s3 }
 0xa75   :  { %v1200_v1 = vpop.permute.xlu0 %1199 }
 0xa76   :  { %v1202_v2 = vadd.f32 %v1200_v1, %v1112_v49 }
 0xa78   :  { %5218 = vtanh.f32 %v1202_v2 }
 0xa79   :  { %v1305_v3 = vpop.permute.xlu1 %1304 }
 0xa7a   :  { %v1307_v4 = vadd.f32 %v1305_v3, %v1217_v51 }
 0xa7c   :  { %5220 = vtanh.f32 %v1307_v4 }
 0xa85   :  { %v5219_v5 = vpop.eup %5218 }
 0xa86   :  { %1206 = vrot.lane.b32.xlu0 %v5219_v5, %s5757_s7 }
 0xa89   :  { %v5221_v15 = vpop.eup %5220 }
 0xa8a   :  { %1311 = vrot.lane.b32.xlu1 %v5221_v15, %s5757_s7 }
 0xaf8   :  { %v1207_v17 = vpop.permute.xlu0 %1206 }
 0xaf9   :  { %v1209_v19 = vmul.f32 %v1207_v17, %v1204_v16  ;;  %v1532_v17 = vld [vmem:[#allocation2 + $0xa] sm:$0x3] }
 0xafb   :  { %v6177_v20 = vadd.f32 %v1210_v18, %v1209_v19  ;;  %v1637_v19 = vld [vmem:[#allocation3 + $0x4] sm:$0x3] }
 0xafc   :  { %v1312_v22 = vpop.permute.xlu1 %1311 }
 0xafd   :  { %v1314_v24 = vmul.f32 %v1312_v22, %v1309_v21  ;;  %1213 = vrot.lane.b32.xlu0 %v6177_v20, %s5757_s7 }
 0xaff   :  { %v6182_v25 = vadd.f32 %v1315_v23, %v1314_v24 }
 0xb01   :  { %1318 = vrot.lane.b32.xlu1 %v6182_v25, %s5757_s7 }
 0xb6f   :  { %v1214_v27 = vpop.permute.xlu0 %1213 }
 0xb70   :  { %1216 = vst.msk [vmem:[#allocation6 + $0x6] sm:$0x3] %vm584_vm3, %v1214_v27  ;;  %4830 = vmatmul.mubr.msk.f32.vlgmr.msra.gmra.mxu0 %vm476_vm4, %v1214_v27 }
 0xb71   :  { %4844 = vmatpush3.msra.mxu0 %v5950_v6  ;;  %4851 = vmatprep.mubr.msk.f32.mxu0 %vm5755_vm1, %v5754_v7 }
 0xb72   :  { %4845 = vmatprep.subr.mxu0 %v5754_v7 }
 0xb73   :  { %v1319_v28 = vpop.permute.xlu1 %1318  ;;  %4846 = vmatpush3.msra.mxu0 %v5958_v8 }
 0xb74   :  { %1321 = vst.msk [vmem:[#allocation7 + $0x8] sm:$0x3] %vm584_vm3, %v1319_v28  ;;  %4841 = vmatmul.mubr.msk.f32.vlgmr.msra.gmra.mxu1 %vm476_vm4, %v1319_v28  ;;  %4847 = vmatprep.subr.mxu0 %v5754_v7 }
 0xb75   :  { %4848 = vmatpush3.msra.mxu0 %v5972_v10  ;;  %4855 = vmatpush3.msra.mxu1 %v5963_v9 }
 0xb76   :  { %4849 = vmatprep.subr.mxu0 %v5754_v7  ;;  %4856 = vmatprep.subr.mxu1 %v5754_v7 }
 0xb77   :  { %4850 = vmatpush3.msra.mxu0 %v5986_v12  ;;  %4857 = vmatpush3.msra.mxu1 %v5977_v11 }
 0xb78   :  { %4858 = vmatprep.subr.mxu1 %v5754_v7  ;;  %4862 = vmatprep.mubr.msk.f32.mxu1 %vm5755_vm1, %v5754_v7 }
 0xb79   :  { %4859 = vmatpush3.msra.mxu1 %v5993_v13  ;;  %4865 = vmatprep.subr.mxu0 %v5754_v7 }
 0xb7a   :  { %4860 = vmatprep.subr.mxu1 %v5754_v7 }
 0xb7b   :  { %4861 = vmatpush3.msra.mxu1 %v6003_v14 }
 0xb7c   :  { %4876 = vmatprep.subr.mxu1 %v5754_v7 }
 0xc30   :  { %v1391_v29 = vpop.f32.mrf.mxu0 }
 0xc31   :  { %v1402_v31 = vadd.f32 %v1391_v29, %v6037_v26  ;;  %v1395_v37 = vadd.f32 %v1391_v29, %v1322_v36 }
 0xc32   :  { %v4831_v32 = vpop.f32.mrf.mxu0 }
 0xc33   :  { %1404 = vrot.lane.b32.xlu0 %v1402_v31, %s5756_s3  ;;  %v4453_v39 = vmul.f32 -1.442695, %v1395_v37 }
 0xc34   :  { %v1496_v33 = vpop.f32.mrf.mxu1 }
 0xc35   :  { %v1507_v34 = vadd.f32 %v1496_v33, %v6043_v30  ;;  %v1500_v40 = vadd.f32 %v1496_v33, %v1427_v38  ;;  %5222 = vpow2.f32 %v4453_v39 }
 0xc36   :  { %v4842_v35 = vpop.f32.mrf.mxu1 }
 0xc37   :  { %1509 = vrot.lane.b32.xlu1 %v1507_v34, %s5756_s3  ;;  %v4455_v41 = vmul.f32 -1.442695, %v1500_v40 }
 0xc39   :  { %5224 = vpow2.f32 %v4455_v41 }
 0xc42   :  { %v5223_v42 = vpop.eup %5222 }
 0xc43   :  { %v1399_v43 = vadd.f32 1.0, %v5223_v42 }
 0xc45   :  { %5226 = vrcp.f32 %v1399_v43 }
 0xc46   :  { %v5225_v44 = vpop.eup %5224 }
 0xc47   :  { %v1504_v45 = vadd.f32 1.0, %v5225_v44 }
 0xc49   :  { %5228 = vrcp.f32 %v1504_v45 }
 0xc52   :  { %v5227_v46 = vpop.eup %5226 }
 0xc53   :  { %v1414_v58 = vsub.f32 1.0, %v5227_v46  ;;  %v1420_v60 = vmul.f32 %v5227_v46, %v6177_v20 }
 0xc56   :  { %v5229_v49 = vpop.eup %5228 }
 0xc57   :  { %v1519_v63 = vsub.f32 1.0, %v5229_v49  ;;  %v1525_v1 = vmul.f32 %v5229_v49, %v6182_v25 }
 0xca5   :  { %v1405_v47 = vpop.permute.xlu0 %1404 }
 0xca6   :  { %v1407_v48 = vmul.f32 %v5227_v46, %v1405_v47 }
 0xca8   :  { %1409 = vrot.lane.b32.xlu0 %v1407_v48, %s5756_s3 }
 0xca9   :  { %v1510_v50 = vpop.permute.xlu1 %1509 }
 0xcaa   :  { %v1512_v51 = vmul.f32 %v5229_v49, %v1510_v50 }
 0xcac   :  { %1514 = vrot.lane.b32.xlu1 %v1512_v51, %s5756_s3 }
 0xd1a   :  { %v1410_v52 = vpop.permute.xlu0 %1409 }
 0xd1b   :  { %v1412_v53 = vadd.f32 %v1410_v52, %v1322_v36  ;;  %v5370_v52 = vld [vmem:[%s6789_s28 + $0x18] sm:$0xff] }
 0xd1d   :  { %5230 = vtanh.f32 %v1412_v53 }
 0xd1e   :  { %v1515_v54 = vpop.permute.xlu1 %1514 }
 0xd1f   :  { %v1517_v55 = vadd.f32 %v1515_v54, %v1427_v38  ;;  %v5371_v54 = vld [vmem:[%s6789_s28 + $0x10] sm:$0xff] }
 0xd21   :  { %5232 = vtanh.f32 %v1517_v55  ;;  %v5372_v55 = vld [vmem:[%s6790_s24 + $0x18] sm:$0xff] }
 0xd2a   :  { %v5231_v56 = vpop.eup %5230 }
 0xd2b   :  { %1416 = vrot.lane.b32.xlu0 %v5231_v56, %s5757_s7  ;;  %v5373_v56 = vld [vmem:[%s6790_s24 + $0x10] sm:$0xff] }
 0xd2e   :  { %v5233_v57 = vpop.eup %5232 }
 0xd2f   :  { %1521 = vrot.lane.b32.xlu1 %v5233_v57, %s5757_s7 }
 0xd9d   :  { %v1417_v59 = vpop.permute.xlu0 %1416 }
 0xd9e   :  { %v1419_v61 = vmul.f32 %v1417_v59, %v1414_v58 }
 0xda0   :  { %v6219_v62 = vadd.f32 %v1420_v60, %v1419_v61  ;;  %v1742_v61 = vld [vmem:[#allocation2 + $0xc] sm:$0x3] }
 0xda1   :  { %v1522_v0 = vpop.permute.xlu1 %1521 }
 0xda2   :  { %v1524_v2 = vmul.f32 %v1522_v0, %v1519_v63  ;;  %1423 = vrot.lane.b32.xlu0 %v6219_v62, %s5757_s7  ;;  %v1847_v63 = vld [vmem:[#allocation3 + $0x2] sm:$0x3] }
 0xda4   :  { %v6224_v3 = vadd.f32 %v1525_v1, %v1524_v2 }
 0xda6   :  { %1528 = vrot.lane.b32.xlu1 %v6224_v3, %s5757_s7 }
 0xe14   :  { %v1424_v4 = vpop.permute.xlu0 %1423 }
 0xe15   :  { %1426 = vst.msk [vmem:[#allocation6 + $0x8] sm:$0x3] %vm584_vm3, %v1424_v4  ;;  %4852 = vmatmul.mubr.msk.f32.vlgmr.msra.gmra.mxu0 %vm476_vm4, %v1424_v4 }
 0xe16   :  { %4866 = vmatpush3.msra.mxu0 %v5950_v6  ;;  %4873 = vmatprep.mubr.msk.f32.mxu0 %vm5755_vm1, %v5754_v7 }
 0xe17   :  { %4867 = vmatprep.subr.mxu0 %v5754_v7 }
 0xe18   :  { %v1529_v5 = vpop.permute.xlu1 %1528  ;;  %4868 = vmatpush3.msra.mxu0 %v5958_v8 }
 0xe19   :  { %1531 = vst.msk [vmem:[#allocation7 + $0x6] sm:$0x3] %vm584_vm3, %v1529_v5  ;;  %4863 = vmatmul.mubr.msk.f32.vlgmr.msra.gmra.mxu1 %vm476_vm4, %v1529_v5  ;;  %4869 = vmatprep.subr.mxu0 %v5754_v7 }
 0xe1a   :  { %4870 = vmatpush3.msra.mxu0 %v5972_v10  ;;  %4877 = vmatpush3.msra.mxu1 %v5963_v9 }
 0xe1b   :  { %4871 = vmatprep.subr.mxu0 %v5754_v7  ;;  %4878 = vmatprep.subr.mxu1 %v5754_v7 }
 0xe1c   :  { %4872 = vmatpush3.msra.mxu0 %v5986_v12  ;;  %4879 = vmatpush3.msra.mxu1 %v5977_v11 }
 0xe1d   :  { %4880 = vmatprep.subr.mxu1 %v5754_v7  ;;  %4884 = vmatprep.mubr.msk.f32.mxu1 %vm5755_vm1, %v5754_v7 }
 0xe1e   :  { %4881 = vmatpush3.msra.mxu1 %v5993_v13  ;;  %4887 = vmatprep.subr.mxu0 %v5754_v7 }
 0xe1f   :  { %4882 = vmatprep.subr.mxu1 %v5754_v7 }
 0xe20   :  { %4883 = vmatpush3.msra.mxu1 %v6003_v14 }
 0xe21   :  { %4898 = vmatprep.subr.mxu1 %v5754_v7 }
 0xed5   :  { %v1601_v6 = vpop.f32.mrf.mxu0 }
 0xed6   :  { %v1612_v8 = vadd.f32 %v1601_v6, %v6037_v26  ;;  %v1605_v18 = vadd.f32 %v1601_v6, %v1532_v17 }
 0xed7   :  { %v4853_v9 = vpop.f32.mrf.mxu0 }
 0xed8   :  { %1614 = vrot.lane.b32.xlu0 %v1612_v8, %s5756_s3  ;;  %v4457_v20 = vmul.f32 -1.442695, %v1605_v18 }
 0xed9   :  { %v1706_v11 = vpop.f32.mrf.mxu1 }
 0xeda   :  { %v1717_v15 = vadd.f32 %v1706_v11, %v6043_v30  ;;  %v1710_v21 = vadd.f32 %v1706_v11, %v1637_v19  ;;  %5234 = vpow2.f32 %v4457_v20 }
 0xedb   :  { %v4864_v16 = vpop.f32.mrf.mxu1 }
 0xedc   :  { %1719 = vrot.lane.b32.xlu1 %v1717_v15, %s5756_s3  ;;  %v4459_v22 = vmul.f32 -1.442695, %v1710_v21 }
 0xede   :  { %5236 = vpow2.f32 %v4459_v22 }
 0xee7   :  { %v5235_v23 = vpop.eup %5234 }
 0xee8   :  { %v1609_v24 = vadd.f32 1.0, %v5235_v23 }
 0xeea   :  { %5238 = vrcp.f32 %v1609_v24 }
 0xeeb   :  { %v5237_v25 = vpop.eup %5236 }
 0xeec   :  { %v1714_v27 = vadd.f32 1.0, %v5237_v25 }
 0xeee   :  { %5240 = vrcp.f32 %v1714_v27 }
 0xef7   :  { %v5239_v28 = vpop.eup %5238 }
 0xef8   :  { %v1624_v41 = vsub.f32 1.0, %v5239_v28  ;;  %v1630_v43 = vmul.f32 %v5239_v28, %v6219_v62 }
 0xefb   :  { %v5241_v32 = vpop.eup %5240 }
 0xefc   :  { %v1729_v46 = vsub.f32 1.0, %v5241_v32  ;;  %v1735_v48 = vmul.f32 %v5241_v32, %v6224_v3 }
 0xf4a   :  { %v1615_v29 = vpop.permute.xlu0 %1614 }
 0xf4b   :  { %v1617_v31 = vmul.f32 %v5239_v28, %v1615_v29 }
 0xf4d   :  { %1619 = vrot.lane.b32.xlu0 %v1617_v31, %s5756_s3 }
 0xf4e   :  { %v1720_v33 = vpop.permute.xlu1 %1719 }
 0xf4f   :  { %v1722_v34 = vmul.f32 %v5241_v32, %v1720_v33 }
 0xf51   :  { %1724 = vrot.lane.b32.xlu1 %v1722_v34, %s5756_s3 }
 0xfbf   :  { %v1620_v35 = vpop.permute.xlu0 %1619 }
 0xfc0   :  { %v1622_v36 = vadd.f32 %v1620_v35, %v1532_v17 }
 0xfc2   :  { %5242 = vtanh.f32 %v1622_v36  ;;  %v6322_v36 = vld [vmem:[#allocation6] sm:$0xff] }
 0xfc3   :  { %v1725_v37 = vpop.permute.xlu1 %1724 }
 0xfc4   :  { %v1727_v38 = vadd.f32 %v1725_v37, %v1637_v19 }
 0xfc6   :  { %5244 = vtanh.f32 %v1727_v38 }
 0xfcf   :  { %v5243_v39 = vpop.eup %5242 }
 0xfd0   :  { %1626 = vrot.lane.b32.xlu0 %v5243_v39, %s5757_s7 }
 0xfd3   :  { %v5245_v40 = vpop.eup %5244 }
 0xfd4   :  { %1731 = vrot.lane.b32.xlu1 %v5245_v40, %s5757_s7 }
0x1042   :  { %v1627_v42 = vpop.permute.xlu0 %1626 }
0x1043   :  { %v1629_v44 = vmul.f32 %v1627_v42, %v1624_v41 }
0x1045   :  { %v6261_v45 = vadd.f32 %v1630_v43, %v1629_v44  ;;  %v1952_v43 = vld [vmem:[#allocation2 + $0xe] sm:$0x3] }
0x1046   :  { %v1732_v47 = vpop.permute.xlu1 %1731 }
0x1047   :  { %v1734_v49 = vmul.f32 %v1732_v47, %v1729_v46  ;;  %1633 = vrot.lane.b32.xlu0 %v6261_v45, %s5757_s7 }
0x1049   :  { %v6266_v50 = vadd.f32 %v1735_v48, %v1734_v49 }
0x104b   :  { %1738 = vrot.lane.b32.xlu1 %v6266_v50, %s5757_s7 }
0x10b9   :  { %v1634_v51 = vpop.permute.xlu0 %1633 }
0x10ba   :  { %1636 = vst.msk [vmem:[#allocation6 + $0xa] sm:$0x3] %vm584_vm3, %v1634_v51  ;;  %4874 = vmatmul.mubr.msk.f32.vlgmr.msra.gmra.mxu0 %vm476_vm4, %v1634_v51 }
0x10bb   :  { %4888 = vmatpush3.msra.mxu0 %v5370_v52  ;;  %4895 = vmatprep.mubr.msk.f32.mxu0 %vm5755_vm1, %v5754_v7 }
0x10bc   :  { %4889 = vmatprep.subr.mxu0 %v5754_v7 }
0x10bd   :  { %v1739_v53 = vpop.permute.xlu1 %1738  ;;  %4890 = vmatpush3.msra.mxu0 %v5371_v54 }
0x10be   :  { %1741 = vst.msk [vmem:[#allocation7 + $0x4] sm:$0x3] %vm584_vm3, %v1739_v53  ;;  %4885 = vmatmul.mubr.msk.f32.vlgmr.msra.gmra.mxu1 %vm476_vm4, %v1739_v53  ;;  %4891 = vmatprep.subr.mxu0 %v5754_v7 }
0x10bf   :  { %4892 = vmatpush3.msra.mxu0 %v5972_v10  ;;  %4899 = vmatpush3.msra.mxu1 %v5372_v55 }
0x10c0   :  { %4893 = vmatprep.subr.mxu0 %v5754_v7  ;;  %4900 = vmatprep.subr.mxu1 %v5754_v7 }
0x10c1   :  { %4894 = vmatpush3.msra.mxu0 %v5986_v12  ;;  %4901 = vmatpush3.msra.mxu1 %v5373_v56 }
0x10c2   :  { %4902 = vmatprep.subr.mxu1 %v5754_v7  ;;  %4906 = vmatprep.mubr.msk.f32.mxu1 %vm5755_vm1, %v5754_v7 }
0x10c3   :  { %4903 = vmatpush3.msra.mxu1 %v5993_v13 }
0x10c4   :  { %4904 = vmatprep.subr.mxu1 %v5754_v7 }
0x10c5   :  { %4905 = vmatpush3.msra.mxu1 %v6003_v14 }
0x117a   :  { %v1811_v10 = vpop.f32.mrf.mxu0 }
0x117b   :  { %v1822_v57 = vadd.f32 %v1811_v10, %v6037_v26  ;;  %v1815_v62 = vadd.f32 %v1811_v10, %v1742_v61 }
0x117c   :  { %v4875_v12 = vpop.f32.mrf.mxu0 }
0x117d   :  { %1824 = vrot.lane.b32.xlu0 %v1822_v57, %s5756_s3  ;;  %v4461_v13 = vmul.f32 -1.442695, %v1815_v62  ;;  %v2168_v62 = vld [vmem:[%s6760_s9 + $0x10] sm:$0xff] }
0x117e   :  { %v1916_v58 = vpop.f32.mrf.mxu1 }
0x117f   :  { %v1927_v59 = vadd.f32 %v1916_v58, %v6043_v30  ;;  %v1920_v0 = vadd.f32 %v1916_v58, %v1847_v63  ;;  %5246 = vpow2.f32 %v4461_v13  ;;  %v2173_v13 = vld [vmem:[#allocation22 + $0x18] sm:$0xff] }
0x1180   :  { %v4886_v60 = vpop.f32.mrf.mxu1  ;;  %4909 = vmatprep.subr.mxu0 %v2173_v13 }
0x1181   :  { %1929 = vrot.lane.b32.xlu1 %v1927_v59, %s5756_s3  ;;  %v4463_v1 = vmul.f32 -1.442695, %v1920_v0  ;;  %v2169_v59 = vld [vmem:[%s6760_s9 + $0x18] sm:$0xff]  ;;  %v2166_v0 = vld [vmem:[%s6760_s9] sm:$0xff] }
0x1182   :  { %4920 = vmatprep.subr.mxu1 %v2169_v59 }
0x1183   :  { %5248 = vpow2.f32 %v4463_v1  ;;  %v2172_v1 = vld [vmem:[#allocation22 + $0x10] sm:$0xff] }
0x118c   :  { %v5247_v14 = vpop.eup %5246 }
0x118d   :  { %v1819_v2 = vadd.f32 1.0, %v5247_v14  ;;  %v2350_v14 = vld [vmem:[#allocation28 + $0x18] sm:$0xff] }
0x118f   :  { %5250 = vrcp.f32 %v1819_v2  ;;  %v2171_v2 = vld [vmem:[#allocation22 + $0x8] sm:$0xff] }
0x1190   :  { %v5249_v3 = vpop.eup %5248 }
0x1191   :  { %v1924_v4 = vadd.f32 1.0, %v5249_v3 }
0x1193   :  { %5252 = vrcp.f32 %v1924_v4 }
0x119c   :  { %v5251_v5 = vpop.eup %5250 }
0x119d   :  { %v1834_v22 = vsub.f32 1.0, %v5251_v5  ;;  %v1840_v24 = vmul.f32 %v5251_v5, %v6261_v45  ;;  %v2057_v45 = vld [vmem:[#allocation3] sm:$0x3] }
0x11a0   :  { %v5253_v9 = vpop.eup %5252 }
0x11a1   :  { %v1939_v28 = vsub.f32 1.0, %v5253_v9  ;;  %v1945_v31 = vmul.f32 %v5253_v9, %v6266_v50 }
0x11ef   :  { %v1825_v6 = vpop.permute.xlu0 %1824 }
0x11f0   :  { %v1827_v8 = vmul.f32 %v5251_v5, %v1825_v6 }
0x11f2   :  { %1829 = vrot.lane.b32.xlu0 %v1827_v8, %s5756_s3  ;;  %v2170_v8 = vld [vmem:[#allocation22] sm:$0xff] }
0x11f3   :  { %v1930_v11 = vpop.permute.xlu1 %1929 }
0x11f4   :  { %v1932_v15 = vmul.f32 %v5253_v9, %v1930_v11 }
0x11f6   :  { %1934 = vrot.lane.b32.xlu1 %v1932_v15, %s5756_s3 }
0x1264   :  { %v1830_v16 = vpop.permute.xlu0 %1829 }
0x1265   :  { %v1832_v17 = vadd.f32 %v1830_v16, %v1742_v61  ;;  %v2354_v16 = vld [vmem:[#allocation30 + $0x18] sm:$0xff] }
0x1267   :  { %5254 = vtanh.f32 %v1832_v17 }
0x1268   :  { %v1935_v18 = vpop.permute.xlu1 %1934 }
0x1269   :  { %v1937_v19 = vadd.f32 %v1935_v18, %v1847_v63  ;;  %v2167_v63 = vld [vmem:[%s6760_s9 + $0x8] sm:$0xff] }
0x126b   :  { %5256 = vtanh.f32 %v1937_v19 }
0x1274   :  { %v5255_v20 = vpop.eup %5254 }
0x1275   :  { %1836 = vrot.lane.b32.xlu0 %v5255_v20, %s5757_s7  ;;  %v4479_v20 = vld [vmem:[#allocation34] ss:$0 sm:$0xff] }
0x1278   :  { %v5257_v21 = vpop.eup %5256 }
0x1279   :  { %1941 = vrot.lane.b32.xlu1 %v5257_v21, %s5757_s7  ;;  %v4478_v21 = vld [vmem:[#allocation27] ss:$0 sm:$0xff] }
0x12e7   :  { %v1837_v23 = vpop.permute.xlu0 %1836 }
0x12e8   :  { %v1839_v25 = vmul.f32 %v1837_v23, %v1834_v22 }
0x12ea   :  { %v6309_v27 = vadd.f32 %v1840_v24, %v1839_v25  ;;  %v2349_v25 = vld [vmem:[#allocation28 + $0x10] sm:$0xff] }
0x12eb   :  { %v1942_v29 = vpop.permute.xlu1 %1941 }
0x12ec   :  { %v1944_v32 = vmul.f32 %v1942_v29, %v1939_v28  ;;  %1843 = vrot.lane.b32.xlu0 %v6309_v27, %s5757_s7  ;;  %v2347_v29 = vld [vmem:[#allocation28] sm:$0xff] }
0x12ee   :  { %v6314_v33 = vadd.f32 %v1945_v31, %v1944_v32  ;;  %v2165_v31 = vld [vmem:[#allocation7 + $0x8] sm:$0xff]  ;;  %v2353_v32 = vld [vmem:[#allocation30 + $0x10] sm:$0xff] }
0x12f0   :  { %1948 = vrot.lane.b32.xlu1 %v6314_v33, %s5757_s7 }
0x135e   :  { %v1844_v34 = vpop.permute.xlu0 %1843 }
0x135f   :  { %1846 = vst.msk [vmem:[#allocation6 + $0xc] sm:$0x3] %vm584_vm3, %v1844_v34  ;;  %4896 = vmatmul.mubr.msk.f32.vlgmr.msra.gmra.mxu0 %vm476_vm4, %v1844_v34  ;;  %v6360_v34 = vld [vmem:[#allocation31 + $0x18] sm:$0xff] }
0x1360   :  { %4910 = vmatpush3.msra.mxu0 %v2173_v13 }
0x1361   :  { %4911 = vmatprep.subr.mxu0 %v2172_v1 }
0x1362   :  { %v1949_v35 = vpop.permute.xlu1 %1948  ;;  %4912 = vmatpush3.msra.mxu0 %v2172_v1 }
0x1363   :  { %1951 = vst.msk [vmem:[#allocation7 + $0x2] sm:$0x3] %vm584_vm3, %v1949_v35  ;;  %4907 = vmatmul.mubr.msk.f32.vlgmr.msra.gmra.mxu1 %vm476_vm4, %v1949_v35  ;;  %4913 = vmatprep.subr.mxu0 %v2171_v2  ;;  %v2351_v35 = vld [vmem:[#allocation30] sm:$0xff] }
0x1364   :  { %4928 = vmatprep.mubr.msk.f32.mxu1 %vm476_vm4, %v6322_v36  ;;  %4921 = vmatpush3.msra.mxu1 %v2169_v59 }
0x1365   :  { %4922 = vmatprep.subr.mxu1 %v2168_v62  ;;  %4914 = vmatpush3.msra.mxu0 %v2171_v2 }
0x1366   :  { %4923 = vmatpush3.msra.mxu1 %v2168_v62  ;;  %4915 = vmatprep.subr.mxu0 %v2170_v8 }
0x1367   :  { %4924 = vmatprep.subr.mxu1 %v2167_v63  ;;  %4916 = vmatpush3.msra.mxu0 %v2170_v8 }
0x1368   :  { %4925 = vmatpush3.msra.mxu1 %v2167_v63  ;;  %4931 = vmatprep.subr.mxu0 %v2354_v16 }
0x1369   :  { %4926 = vmatprep.subr.mxu1 %v2166_v0 }
0x136a   :  { %4927 = vmatpush3.msra.mxu1 %v2166_v0 }
0x136b   :  { %4942 = vmatprep.subr.mxu1 %v2350_v14 }
0x141f   :  { %v2021_v37 = vpop.f32.mrf.mxu0 }
0x1420   :  { %v2032_v38 = vadd.f32 %v2021_v37, %v6037_v26  ;;  %v2025_v44 = vadd.f32 %v2021_v37, %v1952_v43  ;;  %v6369_v37 = vld [vmem:[#allocation31 + $0x8] sm:$0xff] }
0x1421   :  { %v4897_v39 = vpop.f32.mrf.mxu0 }
0x1422   :  { %2034 = vrot.lane.b32.xlu0 %v2032_v38, %s5756_s3  ;;  %v4465_v46 = vmul.f32 -1.442695, %v2025_v44  ;;  %v6371_v38 = vld [vmem:[#allocation24 + $0x18] sm:$0xff]  ;;  %v6376_v39 = vld [vmem:[#allocation31] sm:$0xff] }
0x1423   :  { %v2126_v40 = vpop.f32.mrf.mxu1 }
0x1424   :  { %v2137_v41 = vadd.f32 %v2126_v40, %v6043_v30  ;;  %v2130_v47 = vadd.f32 %v2126_v40, %v2057_v45  ;;  %5258 = vpow2.f32 %v4465_v46  ;;  %v6380_v40 = vld [vmem:[#allocation24 + $0x10] sm:$0xff] }
0x1425   :  { %v4908_v42 = vpop.f32.mrf.mxu1 }
0x1426   :  { %2139 = vrot.lane.b32.xlu1 %v2137_v41, %s5756_s3  ;;  %v4467_v48 = vmul.f32 -1.442695, %v2130_v47  ;;  %v6387_v41 = vld [vmem:[#allocation24 + $0x8] sm:$0xff]  ;;  %v6392_v42 = vld [vmem:[#allocation24] sm:$0xff] }
0x1428   :  { %5260 = vpow2.f32 %v4467_v48 }
0x1431   :  { %v5259_v49 = vpop.eup %5258 }
0x1432   :  { %v2029_v50 = vadd.f32 1.0, %v5259_v49 }
0x1434   :  { %5262 = vrcp.f32 %v2029_v50 }
0x1435   :  { %v5261_v26 = vpop.eup %5260 }
0x1436   :  { %v2134_v51 = vadd.f32 1.0, %v5261_v26 }
0x1438   :  { %5264 = vrcp.f32 %v2134_v51 }
0x1441   :  { %v5263_v52 = vpop.eup %5262 }
0x1442   :  { %v2044_v3 = vsub.f32 1.0, %v5263_v52  ;;  %v2050_v5 = vmul.f32 %v5263_v52, %v6309_v27  ;;  %v2348_v27 = vld [vmem:[#allocation28 + $0x8] sm:$0xff] }
0x1445   :  { %v5265_v54 = vpop.eup %5264 }
0x1446   :  { %v2149_v11 = vsub.f32 1.0, %v5265_v54  ;;  %v2155_v17 = vmul.f32 %v5265_v54, %v6314_v33  ;;  %v2352_v33 = vld [vmem:[#allocation30 + $0x8] sm:$0xff] }
0x1494   :  { %v2035_v53 = vpop.permute.xlu0 %2034 }
0x1495   :  { %v2037_v30 = vmul.f32 %v5263_v52, %v2035_v53  ;;  %v4477_v53 = vld [vmem:[#allocation33] ss:$0 sm:$0xff] }
0x1497   :  { %2039 = vrot.lane.b32.xlu0 %v2037_v30, %s5756_s3 }
0x1498   :  { %v2140_v55 = vpop.permute.xlu1 %2139 }
0x1499   :  { %v2142_v56 = vmul.f32 %v5265_v54, %v2140_v55 }
0x149b   :  { %2144 = vrot.lane.b32.xlu1 %v2142_v56, %s5756_s3 }
0x1509   :  { %v2040_v10 = vpop.permute.xlu0 %2039 }
0x150a   :  { %v2042_v57 = vadd.f32 %v2040_v10, %v1952_v43 }
0x150c   :  { %5266 = vtanh.f32 %v2042_v57 }
0x150d   :  { %v2145_v12 = vpop.permute.xlu1 %2144 }
0x150e   :  { %v2147_v58 = vadd.f32 %v2145_v12, %v2057_v45  ;;  %v4472_v45 = vld [vmem:[#allocation25] ss:$0 sm:$0xff] }
0x1510   :  { %5268 = vtanh.f32 %v2147_v58 }
0x1519   :  { %v5267_v60 = vpop.eup %5266 }
0x151a   :  { %2046 = vrot.lane.b32.xlu0 %v5267_v60, %s5757_s7 }
0x151d   :  { %v5269_v61 = vpop.eup %5268 }
0x151e   :  { %2151 = vrot.lane.b32.xlu1 %v5269_v61, %s5757_s7 }
0x158c   :  { %v2047_v4 = vpop.permute.xlu0 %2046 }
0x158d   :  { %v2049_v6 = vmul.f32 %v2047_v4, %v2044_v3 }
0x158f   :  { %v2051_v9 = vadd.f32 %v2050_v5, %v2049_v6 }
0x1590   :  { %v2152_v15 = vpop.permute.xlu1 %2151 }
0x1591   :  { %v2154_v18 = vmul.f32 %v2152_v15, %v2149_v11  ;;  %2053 = vrot.lane.b32.xlu0 %v2051_v9, %s5757_s7 }
0x1593   :  { %v2156_v19 = vadd.f32 %v2155_v17, %v2154_v18 }
0x1595   :  { %2158 = vrot.lane.b32.xlu1 %v2156_v19, %s5757_s7  ;;  %2720 = vrot.lane.b32.xlu0 %v4479_v20, %s5756_s3 }
0x1599   :  { %2614 = vrot.lane.b32.xlu1 %v4478_v21, %s5756_s3 }
0x1603   :  { %v2054_v22 = vpop.permute.xlu0 %2053 }
0x1604   :  { %2056 = vst.msk [vmem:[#allocation6 + $0xe] sm:$0x3] %vm584_vm3, %v2054_v22 }
0x1607   :  { %v2159_v23 = vpop.permute.xlu1 %2158  ;;  %v6424_v54 = vpop.permute.xlu0 %2720 }
0x1608   :  { %2161 = vst.msk [vmem:[#allocation7] sm:$0x3] %vm584_vm3, %v2159_v23 }
0x160b   :  { %v2163_v24 = vld [vmem:[#allocation6 + $0x8] sm:$0xff]  ;;  %v6430_v61 = vpop.permute.xlu1 %2614 }
0x160c   :  { %4929 = vmatmul.mubr.msk.f32.vlgmr.msra.gmra.mxu1 %vm476_vm4, %v2163_v24 }
0x160d   :  { %4943 = vmatpush3.msra.mxu1 %v2350_v14  ;;  %4950 = vmatprep.mubr.msk.f32.mxu1 %vm476_vm4, %v6322_v36  ;;  %v6364_v36 = vld [vmem:[#allocation31 + $0x10] sm:$0xff] }
0x160e   :  { %4944 = vmatprep.subr.mxu1 %v2349_v25 }
0x160f   :  { %4945 = vmatpush3.msra.mxu1 %v2349_v25  ;;  %v2164_v28 = vld [vmem:[#allocation7] sm:$0xff] }
0x1610   :  { %4946 = vmatprep.subr.mxu1 %v2348_v27  ;;  %4917 = vmatprep.mubr.msk.f32.mxu0 %vm476_vm4, %v2164_v28 }
0x1611   :  { %4947 = vmatpush3.msra.mxu1 %v2348_v27  ;;  %4918 = vmatmul.mubr.msk.f32.vlgmr.msra.gmra.mxu0 %vm476_vm4, %v2165_v31 }
0x1612   :  { %4932 = vmatpush3.msra.mxu0 %v2354_v16  ;;  %4948 = vmatprep.subr.mxu1 %v2347_v29 }
0x1613   :  { %4933 = vmatprep.subr.mxu0 %v2353_v32  ;;  %4939 = vmatprep.mubr.msk.f32.mxu0 %vm476_vm4, %v2164_v28 }
0x1614   :  { %4949 = vmatpush3.msra.mxu1 %v2347_v29  ;;  %4934 = vmatpush3.msra.mxu0 %v2353_v32 }
0x1615   :  { %4951 = vmatmul.mubr.msk.f32.vlgmr.msra.gmra.mxu1 %vm476_vm4, %v2163_v24  ;;  %4964 = vmatprep.subr.mxu1 %v5754_v7 }
0x1616   :  { %4935 = vmatprep.subr.mxu0 %v2352_v33  ;;  %4965 = vmatpush3.msra.mxu1 %v6360_v34 }
0x1617   :  { %4936 = vmatpush3.msra.mxu0 %v2352_v33  ;;  %4966 = vmatprep.subr.mxu1 %v5754_v7 }
0x1618   :  { %4937 = vmatprep.subr.mxu0 %v2351_v35  ;;  %4967 = vmatpush3.msra.mxu1 %v6364_v36 }
0x1619   :  { %4938 = vmatpush3.msra.mxu0 %v2351_v35  ;;  %4968 = vmatprep.subr.mxu1 %v5754_v7 }
0x161a   :  { %4940 = vmatmul.mubr.msk.f32.vlgmr.msra.gmra.mxu0 %vm476_vm4, %v2165_v31  ;;  %4953 = vmatprep.subr.mxu0 %v5754_v7 }
0x161b   :  { %4969 = vmatpush3.msra.mxu1 %v6369_v37  ;;  %4954 = vmatpush3.msra.mxu0 %v6371_v38 }
0x161c   :  { %4970 = vmatprep.subr.mxu1 %v5754_v7  ;;  %4955 = vmatprep.subr.mxu0 %v5754_v7 }
0x161d   :  { %4971 = vmatpush3.msra.mxu1 %v6376_v39  ;;  %4972 = vmatprep.mubr.msk.f32.mxu1 %vm5755_vm1, %v5754_v7 }
0x161e   :  { %4956 = vmatpush3.msra.mxu0 %v6380_v40  ;;  %4973 = vmatmul.mubr.f32.vlgmr.msra.gmra.mxu1 %v5754_v7 }
0x161f   :  { %4957 = vmatprep.subr.mxu0 %v5754_v7  ;;  %4961 = vmatprep.mubr.msk.f32.mxu0 %vm5755_vm1, %v5754_v7 }
0x1620   :  { %4958 = vmatpush3.msra.mxu0 %v6387_v41  ;;  %4986 = vmatprep.subr.mxu1 %v5754_v7 }
0x1621   :  { %4959 = vmatprep.subr.mxu0 %v5754_v7  ;;  %4987 = vmatpush3.msra.mxu1 %v6360_v34 }
0x1622   :  { %4960 = vmatpush3.msra.mxu0 %v6392_v42  ;;  %4988 = vmatprep.subr.mxu1 %v5754_v7 }
0x1623   :  { %4962 = vmatmul.mubr.f32.vlgmr.msra.gmra.mxu0 %v5754_v7  ;;  %4989 = vmatpush3.msra.mxu1 %v6364_v36 }
0x1624   :  { %4990 = vmatprep.subr.mxu1 %v5754_v7  ;;  %4975 = vmatprep.subr.mxu0 %v5754_v7 }
0x1625   :  { %4991 = vmatpush3.msra.mxu1 %v6369_v37  ;;  %4976 = vmatpush3.msra.mxu0 %v6371_v38 }
0x1626   :  { %4992 = vmatprep.subr.mxu1 %v5754_v7  ;;  %4977 = vmatprep.subr.mxu0 %v5754_v7 }
0x1627   :  { %4993 = vmatpush3.msra.mxu1 %v6376_v39  ;;  %4994 = vmatprep.mubr.msk.f32.mxu1 %vm5755_vm1, %v5754_v7 }
0x1628   :  { %4978 = vmatpush3.msra.mxu0 %v6380_v40  ;;  %4983 = vmatprep.mubr.msk.f32.mxu0 %vm5755_vm1, %v5754_v7 }
0x1629   :  { %4979 = vmatprep.subr.mxu0 %v5754_v7  ;;  %5008 = vmatprep.subr.mxu1 %v5754_v7 }
0x162a   :  { %4980 = vmatpush3.msra.mxu0 %v6387_v41 }
0x162b   :  { %4981 = vmatprep.subr.mxu0 %v5754_v7 }
0x162c   :  { %4982 = vmatpush3.msra.mxu0 %v6392_v42 }
0x162d   :  { %4997 = vmatprep.subr.mxu0 %v5754_v7 }
0x16cc   :  { %v4930_v43 = vpop.f32.mrf.mxu1 }
0x16ce   :  { %v2327_v47 = vpop.f32.mrf.mxu1 }
0x16d1   :  { %v4919_v44 = vpop.f32.mrf.mxu0 }
0x16d2   :  { %v2333_v46 = vadd.f32 %v4930_v43, %v4919_v44 }
0x16d3   :  { %v2246_v48 = vpop.f32.mrf.mxu0 }
0x16d4   :  { %v2344_v49 = vadd.f32 %v4472_v45, %v2333_v46  ;;  %v2328_v50 = vadd.f32 %v2327_v47, %v2246_v48 }
0x16d5   :  { %v4952_v51 = vpop.f32.mrf.mxu1 }
0x16d6   :  { %2346 = vst.msk [vmem:[#allocation4 + $0x8] sm:$0xff] %vm366_vm2, %v2344_v49  ;;  %v2343_v26 = vadd.f32 %v4472_v45, %v2328_v50 }
0x16d7   :  { %v2496_v55 = vpop.f32.mrf.mxu1 }
0x16d8   :  { %2345 = vst.msk [vmem:[#allocation4] sm:$0xff] %vm366_vm2, %v2343_v26 }
0x16da   :  { %v4941_v52 = vpop.f32.mrf.mxu0 }
0x16db   :  { %v2502_v30 = vadd.f32 %v4952_v51, %v4941_v52 }
0x16dc   :  { %v2421_v56 = vpop.f32.mrf.mxu0 }
0x16dd   :  { %v2513_v10 = vadd.f32 %v4477_v53, %v2502_v30  ;;  %v2497_v57 = vadd.f32 %v2496_v55, %v2421_v56 }
0x16de   :  { %v2709_v12 = vpop.f32.mrf.mxu1 }
0x16df   :  { %2515 = vst.msk [vmem:[#allocation5 + $0x8] sm:$0xff] %vm366_vm2, %v2513_v10  ;;  %v2512_v58 = vadd.f32 %v4477_v53, %v2497_v57  ;;  %v2723_v59 = vadd.f32 %v6424_v54, %v2709_v12  ;;  %v2536_v14 = vld [vmem:[#allocation4] sm:$0x3]  ;;  %v2748_v56 = vld [vmem:[#allocation4 + $0x2] sm:$0x3] }
0x16e0   :  { %v4974_v60 = vpop.f32.mrf.mxu1 }
0x16e1   :  { %2514 = vst.msk [vmem:[#allocation5] sm:$0xff] %vm366_vm2, %v2512_v58  ;;  %2725 = vrot.lane.b32.xlu0 %v2723_v59, %s5756_s3 }
0x16e3   :  { %v2603_v62 = vpop.f32.mrf.mxu0 }
0x16e4   :  { %v2617_v63 = vadd.f32 %v6430_v61, %v2603_v62  ;;  %v2607_v3 = vadd.f32 %v2603_v62, %v2536_v14 }
0x16e5   :  { %v4963_v13 = vpop.f32.mrf.mxu0 }
0x16e6   :  { %2619 = vrot.lane.b32.xlu1 %v2617_v63, %s5756_s3  ;;  %v2642_v0 = vld [vmem:[#allocation5 + $0xe] sm:$0x3]  ;;  %v4480_v4 = vmul.f32 -1.442695, %v2607_v3  ;;  %v2853_v53 = vld [vmem:[#allocation5 + $0xc] sm:$0x3] }
0x16e7   :  { %v2713_v1 = vadd.f32 %v2709_v12, %v2642_v0 }
0x16e9   :  { %v4481_v2 = vmul.f32 -1.442695, %v2713_v1 }
0x16eb   :  { %5270 = vpow2.f32 %v4481_v2 }
0x16ec   :  { %5272 = vpow2.f32 %v4480_v4 }
0x16f8   :  { %v5271_v5 = vpop.eup %5270 }
0x16f9   :  { %v2717_v6 = vadd.f32 1.0, %v5271_v5  ;;  %v5273_v8 = vpop.eup %5272 }
0x16fa   :  { %v2611_v9 = vadd.f32 1.0, %v5273_v8 }
0x16fb   :  { %5274 = vrcp.f32 %v2717_v6 }
0x16fc   :  { %5276 = vrcp.f32 %v2611_v9 }
0x1708   :  { %v5275_v11 = vpop.eup %5274 }
0x1709   :  { %v5277_v17 = vpop.eup %5276  ;;  %v2735_v27 = vsub.f32 1.0, %v5275_v11  ;;  %v2741_v29 = vmul.f32 0.0, %v5275_v11 }
0x170a   :  { %v2629_v33 = vsub.f32 1.0, %v5277_v17  ;;  %v2635_v43 = vmul.f32 0.0, %v5277_v17 }
0x1753   :  { %v2726_v15 = vpop.permute.xlu0 %2725 }
0x1754   :  { %v2728_v16 = vmul.f32 %v5275_v11, %v2726_v15 }
0x1756   :  { %2730 = vrot.lane.b32.xlu0 %v2728_v16, %s5756_s3 }
0x1758   :  { %v2620_v18 = vpop.permute.xlu1 %2619 }
0x1759   :  { %v2622_v19 = vmul.f32 %v5277_v17, %v2620_v18 }
0x175b   :  { %2624 = vrot.lane.b32.xlu1 %v2622_v19, %s5756_s3 }
0x17c8   :  { %v2731_v20 = vpop.permute.xlu0 %2730 }
0x17c9   :  { %v2733_v21 = vadd.f32 %v2731_v20, %v2642_v0 }
0x17cb   :  { %5278 = vtanh.f32 %v2733_v21 }
0x17cd   :  { %v2625_v22 = vpop.permute.xlu1 %2624 }
0x17ce   :  { %v2627_v23 = vadd.f32 %v2625_v22, %v2536_v14 }
0x17d0   :  { %5280 = vtanh.f32 %v2627_v23 }
0x17d8   :  { %v5279_v24 = vpop.eup %5278 }
0x17d9   :  { %2737 = vrot.lane.b32.xlu0 %v5279_v24, %s5757_s7 }
0x17dd   :  { %v5281_v25 = vpop.eup %5280 }
0x17de   :  { %2631 = vrot.lane.b32.xlu1 %v5281_v25, %s5757_s7 }
0x184b   :  { %v2738_v28 = vpop.permute.xlu0 %2737 }
0x184c   :  { %v2740_v31 = vmul.f32 %v2738_v28, %v2735_v27 }
0x184e   :  { %v6438_v32 = vadd.f32 %v2741_v29, %v2740_v31 }
0x1850   :  { %2744 = vrot.lane.b32.xlu0 %v6438_v32, %s5757_s7  ;;  %v2632_v35 = vpop.permute.xlu1 %2631 }
0x1851   :  { %v2634_v44 = vmul.f32 %v2632_v35, %v2629_v33  ;;  %v3063_v33 = vld [vmem:[#allocation5 + $0xa] sm:$0x3] }
0x1853   :  { %v6442_v45 = vadd.f32 %v2635_v43, %v2634_v44  ;;  %v2958_v44 = vld [vmem:[#allocation4 + $0x4] sm:$0x3] }
0x1855   :  { %2638 = vrot.lane.b32.xlu1 %v6442_v45, %s5757_s7 }
0x18c2   :  { %v2745_v46 = vpop.permute.xlu0 %2744 }
0x18c3   :  { %2747 = vst.msk [vmem:[#allocation9 + $0xe] sm:$0x3] %vm584_vm3, %v2745_v46  ;;  %4995 = vmatmul.mubr.msk.f32.vlgmr.msra.gmra.mxu1 %vm476_vm4, %v2745_v46 }
0x18c4   :  { %5009 = vmatpush3.msra.mxu1 %v6360_v34  ;;  %5016 = vmatprep.mubr.msk.f32.mxu1 %vm5755_vm1, %v5754_v7 }
0x18c5   :  { %5010 = vmatprep.subr.mxu1 %v5754_v7 }
0x18c6   :  { %5011 = vmatpush3.msra.mxu1 %v6364_v36 }
0x18c7   :  { %v2639_v47 = vpop.permute.xlu1 %2638  ;;  %5012 = vmatprep.subr.mxu1 %v5754_v7 }
0x18c8   :  { %2641 = vst.msk [vmem:[#allocation8] sm:$0x3] %vm584_vm3, %v2639_v47  ;;  %4984 = vmatmul.mubr.msk.f32.vlgmr.msra.gmra.mxu0 %vm476_vm4, %v2639_v47  ;;  %5013 = vmatpush3.msra.mxu1 %v6369_v37 }
0x18c9   :  { %4998 = vmatpush3.msra.mxu0 %v6371_v38  ;;  %5014 = vmatprep.subr.mxu1 %v5754_v7 }
0x18ca   :  { %5015 = vmatpush3.msra.mxu1 %v6376_v39  ;;  %4999 = vmatprep.subr.mxu0 %v5754_v7 }
0x18cb   :  { %5000 = vmatpush3.msra.mxu0 %v6380_v40  ;;  %5005 = vmatprep.mubr.msk.f32.mxu0 %vm5755_vm1, %v5754_v7 }
0x18cc   :  { %5001 = vmatprep.subr.mxu0 %v5754_v7  ;;  %5030 = vmatprep.subr.mxu1 %v5754_v7 }
0x18cd   :  { %5002 = vmatpush3.msra.mxu0 %v6387_v41 }
0x18ce   :  { %5003 = vmatprep.subr.mxu0 %v5754_v7 }
0x18cf   :  { %5004 = vmatpush3.msra.mxu0 %v6392_v42 }
0x18d0   :  { %5019 = vmatprep.subr.mxu0 %v5754_v7 }
0x1983   :  { %v2922_v48 = vpop.f32.mrf.mxu1 }
0x1984   :  { %v2933_v49 = vadd.f32 %v2922_v48, %v6424_v54  ;;  %v2926_v30 = vadd.f32 %v2922_v48, %v2853_v53 }
0x1985   :  { %v4996_v50 = vpop.f32.mrf.mxu1 }
0x1986   :  { %2935 = vrot.lane.b32.xlu0 %v2933_v49, %s5756_s3  ;;  %v4485_v55 = vmul.f32 -1.442695, %v2926_v30 }
0x1988   :  { %v2817_v26 = vpop.f32.mrf.mxu0  ;;  %5282 = vpow2.f32 %v4485_v55 }
0x1989   :  { %v2828_v51 = vadd.f32 %v2817_v26, %v6430_v61  ;;  %v2821_v10 = vadd.f32 %v2817_v26, %v2748_v56 }
0x198a   :  { %v4985_v52 = vpop.f32.mrf.mxu0 }
0x198b   :  { %2830 = vrot.lane.b32.xlu1 %v2828_v51, %s5756_s3  ;;  %v4483_v57 = vmul.f32 -1.442695, %v2821_v10 }
0x198d   :  { %5284 = vpow2.f32 %v4483_v57 }
0x1995   :  { %v5283_v12 = vpop.eup %5282 }
0x1996   :  { %v2930_v58 = vadd.f32 1.0, %v5283_v12 }
0x1998   :  { %5286 = vrcp.f32 %v2930_v58 }
0x199a   :  { %v5285_v59 = vpop.eup %5284 }
0x199b   :  { %v2825_v60 = vadd.f32 1.0, %v5285_v59 }
0x199d   :  { %5288 = vrcp.f32 %v2825_v60 }
0x19a5   :  { %v5287_v62 = vpop.eup %5286 }
0x19a6   :  { %v2945_v9 = vsub.f32 1.0, %v5287_v62  ;;  %v2951_v15 = vmul.f32 %v5287_v62, %v6438_v32 }
0x19aa   :  { %v5289_v0 = vpop.eup %5288 }
0x19ab   :  { %v2840_v18 = vsub.f32 1.0, %v5289_v0  ;;  %v2846_v20 = vmul.f32 %v5289_v0, %v6442_v45 }
0x19f8   :  { %v2936_v63 = vpop.permute.xlu0 %2935 }
0x19f9   :  { %v2938_v13 = vmul.f32 %v5287_v62, %v2936_v63 }
0x19fb   :  { %2940 = vrot.lane.b32.xlu0 %v2938_v13, %s5756_s3 }
0x19fd   :  { %v2831_v1 = vpop.permute.xlu1 %2830 }
0x19fe   :  { %v2833_v14 = vmul.f32 %v5289_v0, %v2831_v1 }
0x1a00   :  { %2835 = vrot.lane.b32.xlu1 %v2833_v14, %s5756_s3 }
0x1a6d   :  { %v2941_v2 = vpop.permute.xlu0 %2940 }
0x1a6e   :  { %v2943_v3 = vadd.f32 %v2941_v2, %v2853_v53 }
0x1a70   :  { %5290 = vtanh.f32 %v2943_v3 }
0x1a72   :  { %v2836_v4 = vpop.permute.xlu1 %2835 }
0x1a73   :  { %v2838_v5 = vadd.f32 %v2836_v4, %v2748_v56 }
0x1a75   :  { %5292 = vtanh.f32 %v2838_v5 }
0x1a7d   :  { %v5291_v6 = vpop.eup %5290 }
0x1a7e   :  { %2947 = vrot.lane.b32.xlu0 %v5291_v6, %s5757_s7 }
0x1a82   :  { %v5293_v8 = vpop.eup %5292 }
0x1a83   :  { %2842 = vrot.lane.b32.xlu1 %v5293_v8, %s5757_s7 }
0x1af0   :  { %v2948_v11 = vpop.permute.xlu0 %2947 }
0x1af1   :  { %v2950_v16 = vmul.f32 %v2948_v11, %v2945_v9 }
0x1af3   :  { %v6479_v17 = vadd.f32 %v2951_v15, %v2950_v16 }
0x1af5   :  { %2954 = vrot.lane.b32.xlu0 %v6479_v17, %s5757_s7  ;;  %v2843_v19 = vpop.permute.xlu1 %2842 }
0x1af6   :  { %v2845_v21 = vmul.f32 %v2843_v19, %v2840_v18  ;;  %v3273_v18 = vld [vmem:[#allocation5 + $0x8] sm:$0x3] }
0x1af8   :  { %v6484_v22 = vadd.f32 %v2846_v20, %v2845_v21  ;;  %v3168_v21 = vld [vmem:[#allocation4 + $0x6] sm:$0x3] }
0x1afa   :  { %2849 = vrot.lane.b32.xlu1 %v6484_v22, %s5757_s7 }
0x1b67   :  { %v2955_v23 = vpop.permute.xlu0 %2954 }
0x1b68   :  { %2957 = vst.msk [vmem:[#allocation9 + $0xc] sm:$0x3] %vm584_vm3, %v2955_v23  ;;  %5017 = vmatmul.mubr.msk.f32.vlgmr.msra.gmra.mxu1 %vm476_vm4, %v2955_v23 }
0x1b69   :  { %5031 = vmatpush3.msra.mxu1 %v6360_v34  ;;  %5038 = vmatprep.mubr.msk.f32.mxu1 %vm5755_vm1, %v5754_v7 }
0x1b6a   :  { %5032 = vmatprep.subr.mxu1 %v5754_v7 }
0x1b6b   :  { %5033 = vmatpush3.msra.mxu1 %v6364_v36 }
0x1b6c   :  { %v2850_v24 = vpop.permute.xlu1 %2849  ;;  %5034 = vmatprep.subr.mxu1 %v5754_v7 }
0x1b6d   :  { %2852 = vst.msk [vmem:[#allocation8 + $0x2] sm:$0x3] %vm584_vm3, %v2850_v24  ;;  %5006 = vmatmul.mubr.msk.f32.vlgmr.msra.gmra.mxu0 %vm476_vm4, %v2850_v24  ;;  %5035 = vmatpush3.msra.mxu1 %v6369_v37 }
0x1b6e   :  { %5020 = vmatpush3.msra.mxu0 %v6371_v38  ;;  %5036 = vmatprep.subr.mxu1 %v5754_v7 }
0x1b6f   :  { %5037 = vmatpush3.msra.mxu1 %v6376_v39  ;;  %5021 = vmatprep.subr.mxu0 %v5754_v7 }
0x1b70   :  { %5022 = vmatpush3.msra.mxu0 %v6380_v40  ;;  %5027 = vmatprep.mubr.msk.f32.mxu0 %vm5755_vm1, %v5754_v7 }
0x1b71   :  { %5023 = vmatprep.subr.mxu0 %v5754_v7  ;;  %5052 = vmatprep.subr.mxu1 %v5754_v7 }
0x1b72   :  { %5024 = vmatpush3.msra.mxu0 %v6387_v41 }
0x1b73   :  { %5025 = vmatprep.subr.mxu0 %v5754_v7 }
0x1b74   :  { %5026 = vmatpush3.msra.mxu0 %v6392_v42 }
0x1b75   :  { %5041 = vmatprep.subr.mxu0 %v5754_v7 }
0x1c28   :  { %v3132_v25 = vpop.f32.mrf.mxu1 }
0x1c29   :  { %v3143_v27 = vadd.f32 %v3132_v25, %v6424_v54  ;;  %v3136_v35 = vadd.f32 %v3132_v25, %v3063_v33 }
0x1c2a   :  { %v5018_v28 = vpop.f32.mrf.mxu1 }
0x1c2b   :  { %3145 = vrot.lane.b32.xlu0 %v3143_v27, %s5756_s3  ;;  %v4489_v43 = vmul.f32 -1.442695, %v3136_v35 }
0x1c2d   :  { %v3027_v29 = vpop.f32.mrf.mxu0  ;;  %5294 = vpow2.f32 %v4489_v43 }
0x1c2e   :  { %v3038_v31 = vadd.f32 %v3027_v29, %v6430_v61  ;;  %v3031_v45 = vadd.f32 %v3027_v29, %v2958_v44 }
0x1c2f   :  { %v5007_v32 = vpop.f32.mrf.mxu0 }
0x1c30   :  { %3040 = vrot.lane.b32.xlu1 %v3038_v31, %s5756_s3  ;;  %v4487_v46 = vmul.f32 -1.442695, %v3031_v45 }
0x1c32   :  { %5296 = vpow2.f32 %v4487_v46 }
0x1c3a   :  { %v5295_v47 = vpop.eup %5294 }
0x1c3b   :  { %v3140_v48 = vadd.f32 1.0, %v5295_v47 }
0x1c3d   :  { %5298 = vrcp.f32 %v3140_v48 }
0x1c3f   :  { %v5297_v49 = vpop.eup %5296 }
0x1c40   :  { %v3035_v50 = vadd.f32 1.0, %v5297_v49 }
0x1c42   :  { %5300 = vrcp.f32 %v3035_v50 }
0x1c4a   :  { %v5299_v26 = vpop.eup %5298 }
0x1c4b   :  { %v3155_v60 = vsub.f32 1.0, %v5299_v26  ;;  %v3161_v63 = vmul.f32 %v5299_v26, %v6479_v17 }
0x1c4f   :  { %v5301_v53 = vpop.eup %5300 }
0x1c50   :  { %v3050_v1 = vsub.f32 1.0, %v5301_v53  ;;  %v3056_v2 = vmul.f32 %v5301_v53, %v6484_v22 }
0x1c9d   :  { %v3146_v51 = vpop.permute.xlu0 %3145 }
0x1c9e   :  { %v3148_v52 = vmul.f32 %v5299_v26, %v3146_v51 }
0x1ca0   :  { %3150 = vrot.lane.b32.xlu0 %v3148_v52, %s5756_s3 }
0x1ca2   :  { %v3041_v30 = vpop.permute.xlu1 %3040 }
0x1ca3   :  { %v3043_v55 = vmul.f32 %v5301_v53, %v3041_v30 }
0x1ca5   :  { %3045 = vrot.lane.b32.xlu1 %v3043_v55, %s5756_s3 }
0x1d12   :  { %v3151_v56 = vpop.permute.xlu0 %3150 }
0x1d13   :  { %v3153_v10 = vadd.f32 %v3151_v56, %v3063_v33 }
0x1d15   :  { %5302 = vtanh.f32 %v3153_v10 }
0x1d17   :  { %v3046_v57 = vpop.permute.xlu1 %3045 }
0x1d18   :  { %v3048_v12 = vadd.f32 %v3046_v57, %v2958_v44 }
0x1d1a   :  { %5304 = vtanh.f32 %v3048_v12 }
0x1d22   :  { %v5303_v58 = vpop.eup %5302 }
0x1d23   :  { %3157 = vrot.lane.b32.xlu0 %v5303_v58, %s5757_s7 }
0x1d27   :  { %v5305_v59 = vpop.eup %5304 }
0x1d28   :  { %3052 = vrot.lane.b32.xlu1 %v5305_v59, %s5757_s7 }
0x1d95   :  { %v3158_v62 = vpop.permute.xlu0 %3157 }
0x1d96   :  { %v3160_v13 = vmul.f32 %v3158_v62, %v3155_v60 }
0x1d98   :  { %v6521_v0 = vadd.f32 %v3161_v63, %v3160_v13 }
0x1d9a   :  { %3164 = vrot.lane.b32.xlu0 %v6521_v0, %s5757_s7  ;;  %v3053_v14 = vpop.permute.xlu1 %3052 }
0x1d9b   :  { %v3055_v3 = vmul.f32 %v3053_v14, %v3050_v1  ;;  %v3483_v1 = vld [vmem:[#allocation5 + $0x6] sm:$0x3] }
0x1d9d   :  { %v6526_v4 = vadd.f32 %v3056_v2, %v3055_v3  ;;  %v3378_v3 = vld [vmem:[#allocation4 + $0x8] sm:$0x3] }
0x1d9f   :  { %3059 = vrot.lane.b32.xlu1 %v6526_v4, %s5757_s7 }
0x1e0c   :  { %v3165_v5 = vpop.permute.xlu0 %3164 }
0x1e0d   :  { %3167 = vst.msk [vmem:[#allocation9 + $0xa] sm:$0x3] %vm584_vm3, %v3165_v5  ;;  %5039 = vmatmul.mubr.msk.f32.vlgmr.msra.gmra.mxu1 %vm476_vm4, %v3165_v5 }
0x1e0e   :  { %5053 = vmatpush3.msra.mxu1 %v6360_v34  ;;  %5060 = vmatprep.mubr.msk.f32.mxu1 %vm5755_vm1, %v5754_v7 }
0x1e0f   :  { %5054 = vmatprep.subr.mxu1 %v5754_v7 }
0x1e10   :  { %5055 = vmatpush3.msra.mxu1 %v6364_v36 }
0x1e11   :  { %v3060_v6 = vpop.permute.xlu1 %3059  ;;  %5056 = vmatprep.subr.mxu1 %v5754_v7 }
0x1e12   :  { %3062 = vst.msk [vmem:[#allocation8 + $0x4] sm:$0x3] %vm584_vm3, %v3060_v6  ;;  %5028 = vmatmul.mubr.msk.f32.vlgmr.msra.gmra.mxu0 %vm476_vm4, %v3060_v6  ;;  %5057 = vmatpush3.msra.mxu1 %v6369_v37 }
0x1e13   :  { %5042 = vmatpush3.msra.mxu0 %v6371_v38  ;;  %5058 = vmatprep.subr.mxu1 %v5754_v7 }
0x1e14   :  { %5059 = vmatpush3.msra.mxu1 %v6376_v39  ;;  %5043 = vmatprep.subr.mxu0 %v5754_v7 }
0x1e15   :  { %5044 = vmatpush3.msra.mxu0 %v6380_v40  ;;  %5049 = vmatprep.mubr.msk.f32.mxu0 %vm5755_vm1, %v5754_v7 }
0x1e16   :  { %5045 = vmatprep.subr.mxu0 %v5754_v7  ;;  %5074 = vmatprep.subr.mxu1 %v5754_v7 }
0x1e17   :  { %5046 = vmatpush3.msra.mxu0 %v6387_v41 }
0x1e18   :  { %5047 = vmatprep.subr.mxu0 %v5754_v7 }
0x1e19   :  { %5048 = vmatpush3.msra.mxu0 %v6392_v42 }
0x1e1a   :  { %5063 = vmatprep.subr.mxu0 %v5754_v7 }
0x1ecd   :  { %v3342_v8 = vpop.f32.mrf.mxu1 }
0x1ece   :  { %v3353_v9 = vadd.f32 %v3342_v8, %v6424_v54  ;;  %v3346_v19 = vadd.f32 %v3342_v8, %v3273_v18 }
0x1ecf   :  { %v5040_v11 = vpop.f32.mrf.mxu1 }
0x1ed0   :  { %3355 = vrot.lane.b32.xlu0 %v3353_v9, %s5756_s3  ;;  %v4493_v20 = vmul.f32 -1.442695, %v3346_v19 }
0x1ed2   :  { %v3237_v15 = vpop.f32.mrf.mxu0  ;;  %5306 = vpow2.f32 %v4493_v20 }
0x1ed3   :  { %v3248_v16 = vadd.f32 %v3237_v15, %v6430_v61  ;;  %v3241_v22 = vadd.f32 %v3237_v15, %v3168_v21 }
0x1ed4   :  { %v5029_v17 = vpop.f32.mrf.mxu0 }
0x1ed5   :  { %3250 = vrot.lane.b32.xlu1 %v3248_v16, %s5756_s3  ;;  %v4491_v23 = vmul.f32 -1.442695, %v3241_v22 }
0x1ed7   :  { %5308 = vpow2.f32 %v4491_v23 }
0x1edf   :  { %v5307_v24 = vpop.eup %5306 }
0x1ee0   :  { %v3350_v25 = vadd.f32 1.0, %v5307_v24 }
0x1ee2   :  { %5310 = vrcp.f32 %v3350_v25 }
0x1ee4   :  { %v5309_v27 = vpop.eup %5308 }
0x1ee5   :  { %v3245_v28 = vadd.f32 1.0, %v5309_v27 }
0x1ee7   :  { %5312 = vrcp.f32 %v3245_v28 }
0x1eef   :  { %v5311_v29 = vpop.eup %5310 }
0x1ef0   :  { %v3365_v50 = vsub.f32 1.0, %v5311_v29  ;;  %v3371_v51 = vmul.f32 %v5311_v29, %v6521_v0 }
0x1ef4   :  { %v5313_v33 = vpop.eup %5312 }
0x1ef5   :  { %v3260_v30 = vsub.f32 1.0, %v5313_v33  ;;  %v3266_v56 = vmul.f32 %v5313_v33, %v6526_v4 }
0x1f42   :  { %v3356_v31 = vpop.permute.xlu0 %3355 }
0x1f43   :  { %v3358_v32 = vmul.f32 %v5311_v29, %v3356_v31 }
0x1f45   :  { %3360 = vrot.lane.b32.xlu0 %v3358_v32, %s5756_s3 }
0x1f47   :  { %v3251_v35 = vpop.permute.xlu1 %3250 }
0x1f48   :  { %v3253_v43 = vmul.f32 %v5313_v33, %v3251_v35 }
0x1f4a   :  { %3255 = vrot.lane.b32.xlu1 %v3253_v43, %s5756_s3 }
0x1fb7   :  { %v3361_v44 = vpop.permute.xlu0 %3360 }
0x1fb8   :  { %v3363_v45 = vadd.f32 %v3361_v44, %v3273_v18 }
0x1fba   :  { %5314 = vtanh.f32 %v3363_v45 }
0x1fbc   :  { %v3256_v46 = vpop.permute.xlu1 %3255 }
0x1fbd   :  { %v3258_v47 = vadd.f32 %v3256_v46, %v3168_v21 }
0x1fbf   :  { %5316 = vtanh.f32 %v3258_v47 }
0x1fc7   :  { %v5315_v48 = vpop.eup %5314 }
0x1fc8   :  { %3367 = vrot.lane.b32.xlu0 %v5315_v48, %s5757_s7 }
0x1fcc   :  { %v5317_v49 = vpop.eup %5316 }
0x1fcd   :  { %3262 = vrot.lane.b32.xlu1 %v5317_v49, %s5757_s7 }
0x203a   :  { %v3368_v26 = vpop.permute.xlu0 %3367 }
0x203b   :  { %v3370_v52 = vmul.f32 %v3368_v26, %v3365_v50 }
0x203d   :  { %v6563_v53 = vadd.f32 %v3371_v51, %v3370_v52  ;;  %v3693_v52 = vld [vmem:[#allocation5 + $0x4] sm:$0x3] }
0x203f   :  { %3374 = vrot.lane.b32.xlu0 %v6563_v53, %s5757_s7  ;;  %v3263_v55 = vpop.permute.xlu1 %3262 }
0x2040   :  { %v3265_v10 = vmul.f32 %v3263_v55, %v3260_v30  ;;  %v3588_v55 = vld [vmem:[#allocation4 + $0xa] sm:$0x3] }
0x2042   :  { %v6568_v57 = vadd.f32 %v3266_v56, %v3265_v10 }
0x2044   :  { %3269 = vrot.lane.b32.xlu1 %v6568_v57, %s5757_s7 }
0x20b1   :  { %v3375_v12 = vpop.permute.xlu0 %3374 }
0x20b2   :  { %3377 = vst.msk [vmem:[#allocation9 + $0x8] sm:$0x3] %vm584_vm3, %v3375_v12  ;;  %5061 = vmatmul.mubr.msk.f32.vlgmr.msra.gmra.mxu1 %vm476_vm4, %v3375_v12 }
0x20b3   :  { %5075 = vmatpush3.msra.mxu1 %v6360_v34  ;;  %5082 = vmatprep.mubr.msk.f32.mxu1 %vm5755_vm1, %v5754_v7 }
0x20b4   :  { %5076 = vmatprep.subr.mxu1 %v5754_v7 }
0x20b5   :  { %5077 = vmatpush3.msra.mxu1 %v6364_v36 }
0x20b6   :  { %v3270_v58 = vpop.permute.xlu1 %3269  ;;  %5078 = vmatprep.subr.mxu1 %v5754_v7 }
0x20b7   :  { %3272 = vst.msk [vmem:[#allocation8 + $0x6] sm:$0x3] %vm584_vm3, %v3270_v58  ;;  %5050 = vmatmul.mubr.msk.f32.vlgmr.msra.gmra.mxu0 %vm476_vm4, %v3270_v58  ;;  %5079 = vmatpush3.msra.mxu1 %v6369_v37 }
0x20b8   :  { %5064 = vmatpush3.msra.mxu0 %v6371_v38  ;;  %5080 = vmatprep.subr.mxu1 %v5754_v7 }
0x20b9   :  { %5081 = vmatpush3.msra.mxu1 %v6376_v39  ;;  %5065 = vmatprep.subr.mxu0 %v5754_v7 }
0x20ba   :  { %5066 = vmatpush3.msra.mxu0 %v6380_v40  ;;  %5071 = vmatprep.mubr.msk.f32.mxu0 %vm5755_vm1, %v5754_v7 }
0x20bb   :  { %5067 = vmatprep.subr.mxu0 %v5754_v7  ;;  %5096 = vmatprep.subr.mxu1 %v5754_v7 }
0x20bc   :  { %5068 = vmatpush3.msra.mxu0 %v6387_v41 }
0x20bd   :  { %5069 = vmatprep.subr.mxu0 %v5754_v7 }
0x20be   :  { %5070 = vmatpush3.msra.mxu0 %v6392_v42 }
0x20bf   :  { %5085 = vmatprep.subr.mxu0 %v5754_v7 }
0x2172   :  { %v3552_v59 = vpop.f32.mrf.mxu1 }
0x2173   :  { %v3563_v60 = vadd.f32 %v3552_v59, %v6424_v54  ;;  %v3556_v14 = vadd.f32 %v3552_v59, %v3483_v1 }
0x2174   :  { %v5062_v62 = vpop.f32.mrf.mxu1 }
0x2175   :  { %3565 = vrot.lane.b32.xlu0 %v3563_v60, %s5756_s3  ;;  %v4497_v2 = vmul.f32 -1.442695, %v3556_v14 }
0x2177   :  { %v3447_v63 = vpop.f32.mrf.mxu0  ;;  %5318 = vpow2.f32 %v4497_v2 }
0x2178   :  { %v3458_v13 = vadd.f32 %v3447_v63, %v6430_v61  ;;  %v3451_v4 = vadd.f32 %v3447_v63, %v3378_v3 }
0x2179   :  { %v5051_v0 = vpop.f32.mrf.mxu0 }
0x217a   :  { %3460 = vrot.lane.b32.xlu1 %v3458_v13, %s5756_s3  ;;  %v4495_v5 = vmul.f32 -1.442695, %v3451_v4 }
0x217c   :  { %5320 = vpow2.f32 %v4495_v5 }
0x2184   :  { %v5319_v6 = vpop.eup %5318 }
0x2185   :  { %v3560_v8 = vadd.f32 1.0, %v5319_v6 }
0x2187   :  { %5322 = vrcp.f32 %v3560_v8 }
0x2189   :  { %v5321_v9 = vpop.eup %5320 }
0x218a   :  { %v3455_v11 = vadd.f32 1.0, %v5321_v9 }
0x218c   :  { %5324 = vrcp.f32 %v3455_v11 }
0x2194   :  { %v5323_v15 = vpop.eup %5322 }
0x2195   :  { %v3575_v28 = vsub.f32 1.0, %v5323_v15  ;;  %v3581_v31 = vmul.f32 %v5323_v15, %v6563_v53 }
0x2199   :  { %v5325_v18 = vpop.eup %5324 }
0x219a   :  { %v3470_v35 = vsub.f32 1.0, %v5325_v18  ;;  %v3476_v44 = vmul.f32 %v5325_v18, %v6568_v57 }
0x21e7   :  { %v3566_v16 = vpop.permute.xlu0 %3565 }
0x21e8   :  { %v3568_v17 = vmul.f32 %v5323_v15, %v3566_v16 }
0x21ea   :  { %3570 = vrot.lane.b32.xlu0 %v3568_v17, %s5756_s3 }
0x21ec   :  { %v3461_v19 = vpop.permute.xlu1 %3460 }
0x21ed   :  { %v3463_v20 = vmul.f32 %v5325_v18, %v3461_v19 }
0x21ef   :  { %3465 = vrot.lane.b32.xlu1 %v3463_v20, %s5756_s3 }
0x225c   :  { %v3571_v21 = vpop.permute.xlu0 %3570 }
0x225d   :  { %v3573_v22 = vadd.f32 %v3571_v21, %v3483_v1 }
0x225f   :  { %5326 = vtanh.f32 %v3573_v22 }
0x2261   :  { %v3466_v23 = vpop.permute.xlu1 %3465 }
0x2262   :  { %v3468_v24 = vadd.f32 %v3466_v23, %v3378_v3  ;;  %v5374_v23 = vld [vmem:[#allocation31 + $0x18] sm:$0xff] }
0x2264   :  { %5328 = vtanh.f32 %v3468_v24  ;;  %v5375_v24 = vld [vmem:[#allocation31 + $0x10] sm:$0xff] }
0x226c   :  { %v5327_v25 = vpop.eup %5326 }
0x226d   :  { %3577 = vrot.lane.b32.xlu0 %v5327_v25, %s5757_s7 }
0x2271   :  { %v5329_v27 = vpop.eup %5328 }
0x2272   :  { %3472 = vrot.lane.b32.xlu1 %v5329_v27, %s5757_s7 }
0x22df   :  { %v3578_v29 = vpop.permute.xlu0 %3577 }
0x22e0   :  { %v3580_v32 = vmul.f32 %v3578_v29, %v3575_v28  ;;  %v3903_v29 = vld [vmem:[#allocation5 + $0x2] sm:$0x3] }
0x22e2   :  { %v6605_v33 = vadd.f32 %v3581_v31, %v3580_v32 }
0x22e4   :  { %3584 = vrot.lane.b32.xlu0 %v6605_v33, %s5757_s7  ;;  %v3473_v43 = vpop.permute.xlu1 %3472 }
0x22e5   :  { %v3475_v45 = vmul.f32 %v3473_v43, %v3470_v35 }
0x22e7   :  { %v6610_v46 = vadd.f32 %v3476_v44, %v3475_v45 }
0x22e9   :  { %3479 = vrot.lane.b32.xlu1 %v6610_v46, %s5757_s7 }
0x2356   :  { %v3585_v47 = vpop.permute.xlu0 %3584 }
0x2357   :  { %3587 = vst.msk [vmem:[#allocation9 + $0x6] sm:$0x3] %vm584_vm3, %v3585_v47  ;;  %5083 = vmatmul.mubr.msk.f32.vlgmr.msra.gmra.mxu1 %vm476_vm4, %v3585_v47 }
0x2358   :  { %5097 = vmatpush3.msra.mxu1 %v6360_v34  ;;  %5104 = vmatprep.mubr.msk.f32.mxu1 %vm5755_vm1, %v5754_v7 }
0x2359   :  { %5098 = vmatprep.subr.mxu1 %v5754_v7 }
0x235a   :  { %5099 = vmatpush3.msra.mxu1 %v6364_v36 }
0x235b   :  { %v3480_v48 = vpop.permute.xlu1 %3479  ;;  %5100 = vmatprep.subr.mxu1 %v5754_v7 }
0x235c   :  { %3482 = vst.msk [vmem:[#allocation8 + $0x8] sm:$0x3] %vm584_vm3, %v3480_v48  ;;  %5072 = vmatmul.mubr.msk.f32.vlgmr.msra.gmra.mxu0 %vm476_vm4, %v3480_v48  ;;  %5101 = vmatpush3.msra.mxu1 %v6369_v37 }
0x235d   :  { %5086 = vmatpush3.msra.mxu0 %v6371_v38  ;;  %5102 = vmatprep.subr.mxu1 %v5754_v7 }
0x235e   :  { %5103 = vmatpush3.msra.mxu1 %v6376_v39  ;;  %5087 = vmatprep.subr.mxu0 %v5754_v7 }
0x235f   :  { %5088 = vmatpush3.msra.mxu0 %v6380_v40  ;;  %5093 = vmatprep.mubr.msk.f32.mxu0 %vm5755_vm1, %v5754_v7 }
0x2360   :  { %5089 = vmatprep.subr.mxu0 %v5754_v7  ;;  %5118 = vmatprep.subr.mxu1 %v5754_v7 }
0x2361   :  { %5090 = vmatpush3.msra.mxu0 %v6387_v41 }
0x2362   :  { %5091 = vmatprep.subr.mxu0 %v5754_v7 }
0x2363   :  { %5092 = vmatpush3.msra.mxu0 %v6392_v42 }
0x2364   :  { %5107 = vmatprep.subr.mxu0 %v5754_v7 }
0x2417   :  { %v3762_v34 = vpop.f32.mrf.mxu1 }
0x2418   :  { %v3773_v36 = vadd.f32 %v3762_v34, %v6424_v54  ;;  %v3766_v53 = vadd.f32 %v3762_v34, %v3693_v52 }
0x2419   :  { %v5084_v49 = vpop.f32.mrf.mxu1 }
0x241a   :  { %3775 = vrot.lane.b32.xlu0 %v3773_v36, %s5756_s3  ;;  %v4501_v30 = vmul.f32 -1.442695, %v3766_v53 }
0x241c   :  { %v3657_v50 = vpop.f32.mrf.mxu0  ;;  %5330 = vpow2.f32 %v4501_v30 }
0x241d   :  { %v3668_v26 = vadd.f32 %v3657_v50, %v6430_v61  ;;  %v3661_v56 = vadd.f32 %v3657_v50, %v3588_v55 }
0x241e   :  { %v5073_v51 = vpop.f32.mrf.mxu0 }
0x241f   :  { %3670 = vrot.lane.b32.xlu1 %v3668_v26, %s5756_s3  ;;  %v4499_v10 = vmul.f32 -1.442695, %v3661_v56 }
0x2421   :  { %5332 = vpow2.f32 %v4499_v10 }
0x2429   :  { %v5331_v57 = vpop.eup %5330 }
0x242a   :  { %v3770_v12 = vadd.f32 1.0, %v5331_v57 }
0x242c   :  { %5334 = vrcp.f32 %v3770_v12 }
0x242e   :  { %v5333_v58 = vpop.eup %5332 }
0x242f   :  { %v3665_v59 = vadd.f32 1.0, %v5333_v58 }
0x2431   :  { %5336 = vrcp.f32 %v3665_v59 }
0x2439   :  { %v5335_v60 = vpop.eup %5334 }
0x243a   :  { %v3785_v8 = vsub.f32 1.0, %v5335_v60  ;;  %v3791_v11 = vmul.f32 %v5335_v60, %v6605_v33 }
0x243e   :  { %v5337_v13 = vpop.eup %5336 }
0x243f   :  { %v3680_v17 = vsub.f32 1.0, %v5337_v13  ;;  %v3686_v19 = vmul.f32 %v5337_v13, %v6610_v46 }
0x248c   :  { %v3776_v62 = vpop.permute.xlu0 %3775 }
0x248d   :  { %v3778_v63 = vmul.f32 %v5335_v60, %v3776_v62 }
0x248f   :  { %3780 = vrot.lane.b32.xlu0 %v3778_v63, %s5756_s3 }
0x2491   :  { %v3671_v0 = vpop.permute.xlu1 %3670 }
0x2492   :  { %v3673_v1 = vmul.f32 %v5337_v13, %v3671_v0  ;;  %v4218_v13 = vld [vmem:[#allocation8] sm:$0xff] }
0x2494   :  { %3675 = vrot.lane.b32.xlu1 %v3673_v1, %s5756_s3 }
0x2501   :  { %v3781_v14 = vpop.permute.xlu0 %3780 }
0x2502   :  { %v3783_v2 = vadd.f32 %v3781_v14, %v3693_v52 }
0x2504   :  { %5338 = vtanh.f32 %v3783_v2 }
0x2506   :  { %v3676_v3 = vpop.permute.xlu1 %3675 }
0x2507   :  { %v3678_v4 = vadd.f32 %v3676_v3, %v3588_v55 }
0x2509   :  { %5340 = vtanh.f32 %v3678_v4 }
0x2511   :  { %v5339_v5 = vpop.eup %5338 }
0x2512   :  { %3787 = vrot.lane.b32.xlu0 %v5339_v5, %s5757_s7 }
0x2516   :  { %v5341_v6 = vpop.eup %5340 }
0x2517   :  { %3682 = vrot.lane.b32.xlu1 %v5341_v6, %s5757_s7  ;;  %v4113_v6 = vld [vmem:[#allocation5] sm:$0x3] }
0x2584   :  { %v3788_v9 = vpop.permute.xlu0 %3787 }
0x2585   :  { %v3790_v15 = vmul.f32 %v3788_v9, %v3785_v8 }
0x2587   :  { %v6647_v16 = vadd.f32 %v3791_v11, %v3790_v15  ;;  %v4008_v11 = vld [vmem:[#allocation4 + $0xe] sm:$0x3] }
0x2589   :  { %3794 = vrot.lane.b32.xlu0 %v6647_v16, %s5757_s7  ;;  %v3683_v18 = vpop.permute.xlu1 %3682 }
0x258a   :  { %v3685_v20 = vmul.f32 %v3683_v18, %v3680_v17 }
0x258c   :  { %v6652_v21 = vadd.f32 %v3686_v19, %v3685_v20 }
0x258e   :  { %3689 = vrot.lane.b32.xlu1 %v6652_v21, %s5757_s7 }
0x25fb   :  { %v3795_v22 = vpop.permute.xlu0 %3794 }
0x25fc   :  { %3797 = vst.msk [vmem:[#allocation9 + $0x4] sm:$0x3] %vm584_vm3, %v3795_v22  ;;  %5105 = vmatmul.mubr.msk.f32.vlgmr.msra.gmra.mxu1 %vm476_vm4, %v3795_v22 }
0x25fd   :  { %5119 = vmatpush3.msra.mxu1 %v5374_v23  ;;  %5126 = vmatprep.mubr.msk.f32.mxu1 %vm5755_vm1, %v5754_v7 }
0x25fe   :  { %5120 = vmatprep.subr.mxu1 %v5754_v7 }
0x25ff   :  { %5121 = vmatpush3.msra.mxu1 %v5375_v24 }
0x2600   :  { %v3690_v25 = vpop.permute.xlu1 %3689  ;;  %5122 = vmatprep.subr.mxu1 %v5754_v7 }
0x2601   :  { %3692 = vst.msk [vmem:[#allocation8 + $0xa] sm:$0x3] %vm584_vm3, %v3690_v25  ;;  %5094 = vmatmul.mubr.msk.f32.vlgmr.msra.gmra.mxu0 %vm476_vm4, %v3690_v25  ;;  %5123 = vmatpush3.msra.mxu1 %v6369_v37 }
0x2602   :  { %5108 = vmatpush3.msra.mxu0 %v6371_v38  ;;  %5124 = vmatprep.subr.mxu1 %v5754_v7 }
0x2603   :  { %5125 = vmatpush3.msra.mxu1 %v6376_v39  ;;  %5109 = vmatprep.subr.mxu0 %v5754_v7 }
0x2604   :  { %5110 = vmatpush3.msra.mxu0 %v6380_v40  ;;  %5115 = vmatprep.mubr.msk.f32.mxu0 %vm5755_vm1, %v5754_v7 }
0x2605   :  { %5111 = vmatprep.subr.mxu0 %v5754_v7 }
0x2606   :  { %5112 = vmatpush3.msra.mxu0 %v6387_v41  ;;  %v3798_v41 = vld [vmem:[#allocation4 + $0xc] sm:$0x3] }
0x2607   :  { %5113 = vmatprep.subr.mxu0 %v5754_v7 }
0x2608   :  { %5114 = vmatpush3.msra.mxu0 %v6392_v42 }
0x26bc   :  { %v3972_v37 = vpop.f32.mrf.mxu1 }
0x26bd   :  { %v3983_v38 = vadd.f32 %v3972_v37, %v6424_v54  ;;  %v3976_v31 = vadd.f32 %v3972_v37, %v3903_v29 }
0x26be   :  { %v5106_v27 = vpop.f32.mrf.mxu1 }
0x26bf   :  { %3985 = vrot.lane.b32.xlu0 %v3983_v38, %s5756_s3  ;;  %v4505_v32 = vmul.f32 -1.442695, %v3976_v31  ;;  %v4227_v31 = vld [vmem:[%s6771_s20 + $0x8] sm:$0xff] }
0x26c1   :  { %v3867_v39 = vpop.f32.mrf.mxu0  ;;  %5342 = vpow2.f32 %v4505_v32  ;;  %v4225_v32 = vld [vmem:[%s6770_s19 + $0x18] sm:$0xff] }
0x26c2   :  { %v3878_v40 = vadd.f32 %v3867_v39, %v6430_v61  ;;  %v3871_v33 = vadd.f32 %v3867_v39, %v3798_v41  ;;  %5140 = vmatprep.subr.mxu1 %v4225_v32 }
0x26c3   :  { %v5095_v28 = vpop.f32.mrf.mxu0 }
0x26c4   :  { %3880 = vrot.lane.b32.xlu1 %v3878_v40, %s5756_s3  ;;  %v4503_v7 = vmul.f32 -1.442695, %v3871_v33  ;;  %v4229_v28 = vld [vmem:[%s6771_s20 + $0x18] sm:$0xff]  ;;  %v4224_v33 = vld [vmem:[%s6770_s19 + $0x10] sm:$0xff] }
0x26c5   :  { %5129 = vmatprep.subr.mxu0 %v4229_v28 }
0x26c6   :  { %5344 = vpow2.f32 %v4503_v7 }
0x26ce   :  { %v5343_v42 = vpop.eup %5342 }
0x26cf   :  { %v3980_v35 = vadd.f32 1.0, %v5343_v42 }
0x26d1   :  { %5346 = vrcp.f32 %v3980_v35  ;;  %v4223_v35 = vld [vmem:[%s6770_s19 + $0x8] sm:$0xff] }
0x26d3   :  { %v5345_v43 = vpop.eup %5344 }
0x26d4   :  { %v3875_v44 = vadd.f32 1.0, %v5345_v43 }
0x26d6   :  { %5348 = vrcp.f32 %v3875_v44 }
0x26de   :  { %v5347_v45 = vpop.eup %5346 }
0x26df   :  { %v3995_v30 = vsub.f32 1.0, %v5347_v45  ;;  %v4001_v56 = vmul.f32 %v5347_v45, %v6647_v16 }
0x26e3   :  { %v5349_v48 = vpop.eup %5348 }
0x26e4   :  { %v3890_v12 = vsub.f32 1.0, %v5349_v48  ;;  %v3896_v59 = vmul.f32 %v5349_v48, %v6652_v21 }
0x2731   :  { %v3986_v46 = vpop.permute.xlu0 %3985 }
0x2732   :  { %v3988_v47 = vmul.f32 %v5347_v45, %v3986_v46  ;;  %v4222_v45 = vld [vmem:[%s6770_s19] sm:$0xff] }
0x2734   :  { %3990 = vrot.lane.b32.xlu0 %v3988_v47, %s5756_s3 }
0x2736   :  { %v3881_v34 = vpop.permute.xlu1 %3880 }
0x2737   :  { %v3883_v36 = vmul.f32 %v5349_v48, %v3881_v34 }
0x2739   :  { %3885 = vrot.lane.b32.xlu1 %v3883_v36, %s5756_s3 }
0x27a6   :  { %v3991_v49 = vpop.permute.xlu0 %3990 }
0x27a7   :  { %v3993_v50 = vadd.f32 %v3991_v49, %v3903_v29  ;;  %v4228_v29 = vld [vmem:[%s6771_s20 + $0x10] sm:$0xff] }
0x27a9   :  { %5350 = vtanh.f32 %v3993_v50 }
0x27ab   :  { %v3886_v26 = vpop.permute.xlu1 %3885 }
0x27ac   :  { %v3888_v51 = vadd.f32 %v3886_v26, %v3798_v41  ;;  %v4226_v41 = vld [vmem:[%s6771_s20] sm:$0xff] }
0x27ae   :  { %5352 = vtanh.f32 %v3888_v51 }
0x27b6   :  { %v5351_v52 = vpop.eup %5350 }
0x27b7   :  { %3997 = vrot.lane.b32.xlu0 %v5351_v52, %s5757_s7  ;;  %v4221_v52 = vld [vmem:[#allocation9 + $0x8] sm:$0xff] }
0x27bb   :  { %v5353_v53 = vpop.eup %5352 }
0x27bc   :  { %3892 = vrot.lane.b32.xlu1 %v5353_v53, %s5757_s7 }
0x2829   :  { %v3998_v55 = vpop.permute.xlu0 %3997 }
0x282a   :  { %v4000_v10 = vmul.f32 %v3998_v55, %v3995_v30 }
0x282c   :  { %v6685_v57 = vadd.f32 %v4001_v56, %v4000_v10  ;;  %v4514_v56 = vld [vmem:[%s6772_s21] ss:$0 sm:$0xff] }
0x282e   :  { %4004 = vrot.lane.b32.xlu0 %v6685_v57, %s5757_s7  ;;  %v3893_v58 = vpop.permute.xlu1 %3892 }
0x282f   :  { %v3895_v60 = vmul.f32 %v3893_v58, %v3890_v12 }
0x2831   :  { %v6690_v62 = vadd.f32 %v3896_v59, %v3895_v60 }
0x2833   :  { %3899 = vrot.lane.b32.xlu1 %v6690_v62, %s5757_s7 }
0x28a0   :  { %v4005_v63 = vpop.permute.xlu0 %4004 }
0x28a1   :  { %4007 = vst.msk [vmem:[#allocation9 + $0x2] sm:$0x3] %vm584_vm3, %v4005_v63  ;;  %5127 = vmatmul.mubr.msk.f32.vlgmr.msra.gmra.mxu1 %vm476_vm4, %v4005_v63 }
0x28a2   :  { %5148 = vmatprep.mubr.msk.f32.mxu1 %vm476_vm4, %v4218_v13  ;;  %5141 = vmatpush3.msra.mxu1 %v4225_v32 }
0x28a3   :  { %5142 = vmatprep.subr.mxu1 %v4224_v33 }
0x28a4   :  { %5143 = vmatpush3.msra.mxu1 %v4224_v33 }
0x28a5   :  { %v3900_v0 = vpop.permute.xlu1 %3899  ;;  %5144 = vmatprep.subr.mxu1 %v4223_v35 }
0x28a6   :  { %3902 = vst.msk [vmem:[#allocation8 + $0xc] sm:$0x3] %vm584_vm3, %v3900_v0  ;;  %5116 = vmatmul.mubr.msk.f32.vlgmr.msra.gmra.mxu0 %vm476_vm4, %v3900_v0  ;;  %5145 = vmatpush3.msra.mxu1 %v4223_v35 }
0x28a7   :  { %5130 = vmatpush3.msra.mxu0 %v4229_v28  ;;  %5146 = vmatprep.subr.mxu1 %v4222_v45 }
0x28a8   :  { %5131 = vmatprep.subr.mxu0 %v4228_v29  ;;  %5147 = vmatpush3.msra.mxu1 %v4222_v45 }
0x28a9   :  { %5132 = vmatpush3.msra.mxu0 %v4228_v29 }
0x28aa   :  { %5133 = vmatprep.subr.mxu0 %v4227_v31 }
0x28ab   :  { %5134 = vmatpush3.msra.mxu0 %v4227_v31 }
0x28ac   :  { %5135 = vmatprep.subr.mxu0 %v4226_v41 }
0x28ad   :  { %5136 = vmatpush3.msra.mxu0 %v4226_v41 }
0x2961   :  { %v4182_v1 = vpop.f32.mrf.mxu1 }
0x2962   :  { %v4193_v14 = vadd.f32 %v4182_v1, %v6424_v54  ;;  %v4186_v8 = vadd.f32 %v4182_v1, %v4113_v6 }
0x2963   :  { %v5128_v2 = vpop.f32.mrf.mxu1 }
0x2964   :  { %4195 = vrot.lane.b32.xlu0 %v4193_v14, %s5756_s3  ;;  %v4509_v9 = vmul.f32 -1.442695, %v4186_v8 }
0x2966   :  { %v4077_v3 = vpop.f32.mrf.mxu0  ;;  %5354 = vpow2.f32 %v4509_v9 }
0x2967   :  { %v4088_v4 = vadd.f32 %v4077_v3, %v6430_v61  ;;  %v4081_v15 = vadd.f32 %v4077_v3, %v4008_v11 }
0x2968   :  { %v5117_v5 = vpop.f32.mrf.mxu0 }
0x2969   :  { %4090 = vrot.lane.b32.xlu1 %v4088_v4, %s5756_s3  ;;  %v4507_v16 = vmul.f32 -1.442695, %v4081_v15 }
0x296b   :  { %5356 = vpow2.f32 %v4507_v16 }
0x2973   :  { %v5355_v17 = vpop.eup %5354 }
0x2974   :  { %v4190_v18 = vadd.f32 1.0, %v5355_v17 }
0x2976   :  { %5358 = vrcp.f32 %v4190_v18 }
0x2978   :  { %v5357_v54 = vpop.eup %5356 }
0x2979   :  { %v4085_v19 = vadd.f32 1.0, %v5357_v54 }
0x297b   :  { %5360 = vrcp.f32 %v4085_v19 }
0x2983   :  { %v5359_v20 = vpop.eup %5358 }
0x2984   :  { %v4205_v7 = vsub.f32 1.0, %v5359_v20  ;;  %v4211_v43 = vmul.f32 %v5359_v20, %v6685_v57 }
0x2988   :  { %v5361_v22 = vpop.eup %5360 }
0x2989   :  { %v4100_v47 = vsub.f32 1.0, %v5361_v22  ;;  %v4106_v34 = vmul.f32 %v5361_v22, %v6690_v62 }
0x29d6   :  { %v4196_v21 = vpop.permute.xlu0 %4195 }
0x29d7   :  { %v4198_v61 = vmul.f32 %v5359_v20, %v4196_v21 }
0x29d9   :  { %4200 = vrot.lane.b32.xlu0 %v4198_v61, %s5756_s3 }
0x29db   :  { %v4091_v23 = vpop.permute.xlu1 %4090 }
0x29dc   :  { %v4093_v24 = vmul.f32 %v5361_v22, %v4091_v23 }
0x29de   :  { %4095 = vrot.lane.b32.xlu1 %v4093_v24, %s5756_s3 }
0x2a4b   :  { %v4201_v25 = vpop.permute.xlu0 %4200 }
0x2a4c   :  { %v4203_v37 = vadd.f32 %v4201_v25, %v4113_v6 }
0x2a4e   :  { %5362 = vtanh.f32 %v4203_v37 }
0x2a50   :  { %v4096_v38 = vpop.permute.xlu1 %4095 }
0x2a51   :  { %v4098_v27 = vadd.f32 %v4096_v38, %v4008_v11 }
0x2a53   :  { %5364 = vtanh.f32 %v4098_v27 }
0x2a5b   :  { %v5363_v39 = vpop.eup %5362 }
0x2a5c   :  { %4207 = vrot.lane.b32.xlu0 %v5363_v39, %s5757_s7 }
0x2a60   :  { %v5365_v40 = vpop.eup %5364 }
0x2a61   :  { %4102 = vrot.lane.b32.xlu1 %v5365_v40, %s5757_s7 }
0x2ace   :  { %v4208_v42 = vpop.permute.xlu0 %4207 }
0x2acf   :  { %v4210_v44 = vmul.f32 %v4208_v42, %v4205_v7 }
0x2ad1   :  { %v4212_v46 = vadd.f32 %v4211_v43, %v4210_v44 }
0x2ad3   :  { %4214 = vrot.lane.b32.xlu0 %v4212_v46, %s5757_s7  ;;  %v4103_v48 = vpop.permute.xlu1 %4102 }
0x2ad4   :  { %v4105_v36 = vmul.f32 %v4103_v48, %v4100_v47 }
0x2ad6   :  { %v4107_v49 = vadd.f32 %v4106_v34, %v4105_v36 }
0x2ad8   :  { %4109 = vrot.lane.b32.xlu1 %v4107_v49, %s5757_s7  ;;  %s5758_s7 = smov [#allocation36]  }
0x2ad9   :  { %s4410_s28 = sshll.u32 %s5758_s7, 4  ;;  %s4411_s28 = int_to_ptr.vmem [resolvable:$true] %s4410_s28 }
0x2ada   :  { %s5696_s10 = scalar_lea.vmem %s4411_s28, 256  ;;  %p5701_p11 = scmp.lt.s32.totalorder %s4411_s28, %s4411_s28 }
0x2adb   :  { %p5697_p10 = scmp.ne.s32.totalorder %s4411_s28, %s5696_s10  ;;  %p5702_p12 = scmp.lt.s32.totalorder %s5696_s10, %s5696_s10 }
0x2add   :  { %p5703_p13 = por %p5702_p12, %p5701_p11 }
0x2adf   :  { %p5704_p0 = pnand %p5703_p13, %p5697_p10 }
0x2b45   :  { %v4215_v50 = vpop.permute.xlu0 %4214 }
0x2b46   :  { %4217 = vst.msk [vmem:[#allocation9] sm:$0x3] %vm584_vm3, %v4215_v50 }
0x2b4a   :  { %v4110_v26 = vpop.permute.xlu1 %4109 }
0x2b4b   :  { %4112 = vst.msk [vmem:[#allocation8 + $0xe] sm:$0x3] %vm584_vm3, %v4110_v26 }
0x2b4d   :  { %v4220_v51 = vld [vmem:[#allocation9] sm:$0xff] }
0x2b4e   :  { %5137 = vmatprep.mubr.msk.f32.mxu0 %vm476_vm4, %v4220_v51 }
0x2b4f   :  { %5138 = vmatmul.mubr.msk.f32.vlgmr.msra.gmra.mxu0 %vm476_vm4, %v4221_v52 }
0x2b52   :  { %v4219_v53 = vld [vmem:[#allocation8 + $0x8] sm:$0xff] }
0x2b53   :  { %5149 = vmatmul.mubr.msk.f32.vlgmr.msra.gmra.mxu1 %vm476_vm4, %v4219_v53 }
0x2c0f   :  { %v5139_v30 = vpop.f32.mrf.mxu0 }
0x2c11   :  { %v4302_v57 = vpop.f32.mrf.mxu0 }
0x2c13   :  { %v5150_v55 = vpop.f32.mrf.mxu1 }
0x2c14   :  { %v4389_v10 = vadd.f32 %v5150_v55, %v5139_v30 }
0x2c15   :  { %v4383_v12 = vpop.f32.mrf.mxu1 }
0x2c16   :  { %v4400_v58 = vadd.f32 %v4514_v56, %v4389_v10  ;;  %v4384_v59 = vadd.f32 %v4383_v12, %v4302_v57 }
0x2c18   :  { %5366 = vtanh.f32 %v4400_v58  ;;  %v4399_v60 = vadd.f32 %v4514_v56, %v4384_v59 }
0x2c1a   :  { %5368 = vtanh.f32 %v4399_v60 }
0x2c25   :  { %v5367_v62 = vpop.eup %5366 }
0x2c26   :  { %4404 = vst.msk [vmem:[#allocation36 + $0x8] sm:$0xff] %vm284_vm0, %v5367_v62 }
0x2c27   :  { %v5369_v63 = vpop.eup %5368 }
0x2c28   :  { %4403 = vst.msk [vmem:[#allocation36] sm:$0xff] %vm284_vm0, %v5369_v63 }
0x2c29   :  { %5707 = shalt.err (!%p5704_p0)
}
0x2c2a   :  { %s6791_s5 = sld [smem:[#allocation54_spill]] }
0x2c30   :  { %4416 = dma.vmem_to_hbm [thread:$0]  %s4411_s28, 256, %s6791_s5, [#allocation12], %s5738_s0, %s5738_s0, %s5739_s23  }
0x2c31   :  { %5734 = dma.done.wait [#allocation12], 256  }
0x2c32   :  { %5735 = vsyncadd [#allocation12], 4294967040 }
0x2c33   :  { %4420 = vsyncpa [#allocation11], 1 }
0x2c34   :  { %4421 = vsyncpa [#allocation14], 1 }
0x2c35   :  { %4422 = vsyncpa [#allocation17], 1 }
0x2c36   :  { %4423 = vsyncpa [#allocation20], 1 }
0x2c37   :  { %4424 = vsyncpa [#allocation23], 1 }
0x2c38   :  { %4425 = vsyncpa [#allocation26], 1 }
0x2c39   :  { %4426 = vsyncpa [#allocation29], 1 }
0x2c3a   :  { %4427 = vsyncpa [#allocation32], 1 }
0x2c3b   :  { %4428 = vsyncpa [#allocation35], 1 }
0x2c3c   :  { %4429 = vsyncpa [#allocation12], 1 }

</bundles_post_ra>
